<compile_context>
chip_gen: v6e
topology: v6e:2x2x1
jax: 0.10.0
libtpu: 0.0.40
codegen_flags: <defaults>
</compile_context>

<pallas_src>
import functools

import jax
import jax.numpy as jnp
from jax import lax
from jax.experimental import pallas as pl
from jax.experimental.pallas import tpu as pltpu


def _round_up(v, m):
    return (v + m - 1) // m * m


def _shift_rows(v, delta):
    """Circular shift along axis 0: result[i] = v[(i + delta) % n], delta in {-1, 0, +1}.

    Used for the +/-1 column taps of the 3x3 convs on the (H*Wr)-flattened
    row-major layout.  The circular wrap always lands in a zero pad column, so
    it reproduces the conv's zero padding exactly.  (pltpu.roll is the
    XLU-native alternative; concat-of-slices keeps the semantics explicit.)
    """
    if delta == 0:
        return v
    if delta == 1:
        return jnp.concatenate([v[1:], v[:1]], axis=0)
    return jnp.concatenate([v[-1:], v[:-1]], axis=0)


# ------------------------------- Pallas kernel ------------------------------ #

def _laff_kernel(x_ref, w1_ref, w2_ref, o_ref, xpad_ref, mid_ref, *, H, W, Wr):
    """Fused conv3x3(pad1)+ReLU -> conv3x3(pad1)+ReLU for one image.

    x_ref   : (1, H, W, C)      unpadded NHWC input block, bf16
    w1_ref  : (3, 3*C, Cf)      conv1 weights (dh, dw-major K-fused), bf16, VMEM resident
    w2_ref  : (3, Cf, 3*C)      conv2 weights (dh, dw-major N-fused), bf16, VMEM resident
    o_ref   : (1, H, Wr, C)     output block (padded width), bf16
    xpad_ref: (H+2, Wr, C)      VMEM scratch, zero-padded input layout, bf16
    mid_ref : (H+2, Wr, Cf)     VMEM scratch, zero-padded conv1 intermediate, bf16
    """
    C = x_ref.shape[-1]
    Cf = mid_ref.shape[-1]
    npix = H * Wr

    # --- stage the input into its zero-padded layout (padding done in-kernel).
    # Only the small halo is written with zeros each step; no state is carried
    # across grid iterations (megacore / "parallel"-safe).
    xz = jnp.zeros((1, Wr, C), x_ref.dtype)
    xpad_ref[0:1, :, :] = xz                                  # top pad row
    xpad_ref[H + 1:H + 2, :, :] = xz                          # bottom pad row
    xpad_ref[1:1 + H, 0:W, :] = x_ref[0]                      # image interior
    xpad_ref[1:1 + H, W:Wr, :] = jnp.zeros((H, Wr - W, C), x_ref.dtype)  # right pad cols

    # ---- conv1: C -> Cf.  K-fused: 3 MXU dots with K = 3*C, f32 accumulate.
    acc1 = jnp.zeros((npix, Cf), jnp.float32)
    for dh in range(3):
        # Contiguous row band; layout-preserving reshape (Wr % 8 == 0, C % 128 == 0).
        band = xpad_ref[dh:dh + H, :, :].reshape(npix, C)
        taps = jnp.concatenate(
            [_shift_rows(band, -1), band, _shift_rows(band, 1)], axis=-1)  # (npix, 3C)
        acc1 = acc1 + jnp.dot(taps, w1_ref[dh],
                              preferred_element_type=jnp.float32)

    # ReLU, then store the intermediate with its halo into VMEM (no HBM trip).
    y1 = jnp.maximum(acc1, 0.0).astype(mid_ref.dtype)
    mz = jnp.zeros((1, Wr, Cf), mid_ref.dtype)
    mid_ref[0:1, :, :] = mz
    mid_ref[H + 1:H + 2, :, :] = mz
    mid_ref[1:1 + H, :, :] = y1.reshape(H, Wr, Cf)            # full-width aligned store
    # conv1 also produced (meaningless) values at the pad columns; zero them so
    # conv2's circular column taps read exact zeros there.
    mid_ref[1:1 + H, W:Wr, :] = jnp.zeros((H, Wr - W, Cf), mid_ref.dtype)

    # ---- conv2: Cf -> C.  N-fused: 3 dots with N = 3*C; the +/-1 column
    # shifts are applied to the cheap C-wide f32 results, never to the Cf-wide
    # inputs, and the accumulator is only C wide.
    acc2 = jnp.zeros((npix, C), jnp.float32)
    for dh in range(3):
        band = mid_ref[dh:dh + H, :, :].reshape(npix, Cf)
        y = jnp.dot(band, w2_ref[dh], preferred_element_type=jnp.float32)   # (npix, 3C)
        acc2 = (acc2
                + _shift_rows(y[:, 0:C], -1)      # dw = 0 tap
                + y[:, C:2 * C]                   # dw = 1 tap
                + _shift_rows(y[:, 2 * C:3 * C], 1))  # dw = 2 tap

    o_ref[...] = jnp.maximum(acc2, 0.0).astype(o_ref.dtype).reshape(1, H, Wr, C)


# ------------------------------- wrapper ------------------------------------ #

def locality_aware_feedforward(x, shape, w1_oihw, w2_oihw):
    """Pallas implementation of LocalityAwareFeedforward.forward(input, shape).

    x       : array of any shape with prod == prod(shape)  (PyTorch `input`)
    shape   : static (N, C, H, W)                           (PyTorch `shape`)
    w1_oihw : (Cf, C, 3, 3)  conv1 weight, PyTorch Conv2d layout, bias=False
    w2_oihw : (C, Cf, 3, 3)  conv2 weight
    """
    N, C, H, W = shape
    Cf = w1_oihw.shape[0]
    Wr = _round_up(W + 2, 8)      # padded width, rounded so row bands stay (8,128)-aligned
    in_shape = x.shape

    # Faithful to the PyTorch forward: raw view to (N, C, H, W), then NHWC so
    # channels sit on the lane axis.  No spatial pre-pad: padding is in-kernel.
    xi = x.reshape(N, C, H, W)
    x_nhwc = jnp.transpose(xi, (0, 2, 3, 1)).astype(jnp.bfloat16)

    # Conv weights: PyTorch OIHW -> tap-fused matmul layouts (bf16).
    #   w1_k: (3, 3*C, Cf)  per dh, the 3 dw taps concatenated along INPUT channels.
    #   w2_n: (3, Cf, 3*C)  per dh, the 3 dw taps concatenated along OUTPUT channels.
    w1_hwio = jnp.transpose(w1_oihw, (2, 3, 1, 0))                       # (3,3,C,Cf)
    w2_hwio = jnp.transpose(w2_oihw, (2, 3, 1, 0))                       # (3,3,Cf,C)
    w1_k = w1_hwio.reshape(3, 3 * C, Cf).astype(jnp.bfloat16)
    w2_n = jnp.transpose(w2_hwio, (0, 2, 1, 3)).reshape(3, Cf, 3 * C).astype(jnp.bfloat16)

    # Explicit VMEM budget: resident weights + both padded scratch buffers +
    # double-buffered I/O blocks + the large in-kernel temporaries (+50%).
    bpe = 2  # bf16
    vmem_needed = (
        w1_k.size * bpe + w2_n.size * bpe
        + (H + 2) * Wr * (C + Cf) * bpe
        + 2 * H * W * C * bpe + 2 * H * Wr * C * bpe
        + H * Wr * (Cf * 4 + C * 4 + 3 * C * (4 + bpe) + 3 * Cf * bpe))
    vmem_limit = int(min(100 * 2 ** 20, max(32 * 2 ** 20, vmem_needed * 3 // 2)))

    cost = pl.CostEstimate(
        flops=2 * 2 * 9 * N * H * W * C * Cf,                     # two 3x3 convs
        bytes_accessed=(N * H * W * C + N * H * Wr * C + 18 * C * Cf) * bpe,
        transcendentals=0)

    out = pl.pallas_call(
        functools.partial(_laff_kernel, H=H, W=W, Wr=Wr),
        out_shape=jax.ShapeDtypeStruct((N, H, Wr, C), jnp.bfloat16),
        grid=(N,),
        in_specs=[
            pl.BlockSpec((1, H, W, C), lambda n: (n, 0, 0, 0)),
            # Whole-array VMEM residency for the weights: no per-step re-DMA and
            # no 2x pipeline buffering (matters at the 512/2048 module defaults).
            pl.BlockSpec(memory_space=pltpu.MemorySpace.VMEM),
            pl.BlockSpec(memory_space=pltpu.MemorySpace.VMEM),
        ],
        out_specs=pl.BlockSpec((1, H, Wr, C), lambda n: (n, 0, 0, 0)),
        scratch_shapes=[
            pltpu.VMEM((H + 2, Wr, C), jnp.bfloat16),    # zero-padded input image
            pltpu.VMEM((H + 2, Wr, Cf), jnp.bfloat16),   # padded conv1 intermediate
        ],
        compiler_params=pltpu.CompilerParams(
            dimension_semantics=("parallel",),           # batch sharded across TCs
            vmem_limit_bytes=vmem_limit),
        cost_estimate=cost,
    )(x_nhwc, w1_k, w2_n)

    # TODO(synk): nn.Dropout(p) is identity in eval mode; training-mode
    #             stochastic masking is not implemented.
    out = out[:, :, :W, :]                               # strip width padding (lane-dense store)
    out_nchw = jnp.transpose(out, (0, 3, 1, 2)).astype(jnp.float32)
    return out_nchw.reshape(in_shape)


# ------------------------- pure-JAX reference (check) ----------------------- #

def _conv3x3_ref(x_nhwc_bf16, w_hwio_bf16):
    return lax.conv_general_dilated(
        x_nhwc_bf16, w_hwio_bf16, window_strides=(1, 1),
        padding=((1, 1), (1, 1)),
        dimension_numbers=("NHWC", "HWIO", "NHWC"),
        preferred_element_type=jnp.float32)


def reference_forward(x, shape, w1_oihw, w2_oihw):
    N, C, H, W = shape
    w1_hwio = jnp.transpose(w1_oihw, (2, 3, 1, 0)).astype(jnp.bfloat16)
    w2_hwio = jnp.transpose(w2_oihw, (2, 3, 1, 0)).astype(jnp.bfloat16)
    xi = x.reshape(N, C, H, W)
    y = jnp.transpose(xi, (0, 2, 3, 1)).astype(jnp.bfloat16)
    y = jnp.maximum(_conv3x3_ref(y, w1_hwio), 0.0).astype(jnp.bfloat16)
    y = jnp.maximum(_conv3x3_ref(y, w2_hwio), 0.0)
    return jnp.transpose(y, (0, 3, 1, 2)).astype(jnp.float32).reshape(x.shape)


# ---------------------------------- main ------------------------------------ #

if __name__ == "__main__":
    key = jax.random.PRNGKey(0)
    k_x, k_w1, k_w2 = jax.random.split(key, 3)

    # Small, lane-dense shapes consistent with the module (channel widths are
    # multiples of 128; the module defaults 512/2048 also qualify).
    N, H, W = 2, 8, 8
    hidden_dim, filter_size = 128, 256

    # SATRN feeds the FFN a (N, H*W, hidden) sequence plus shape=(N, C, H, W);
    # the PyTorch forward does a raw view, which we reproduce exactly.
    x = jax.random.normal(k_x, (N, H * W, hidden_dim), jnp.float32)
    shape = (N, hidden_dim, H, W)

    # PyTorch Conv2d weight layout (Cout, Cin, 3, 3), bias=False.
    w1_oihw = jax.random.normal(k_w1, (filter_size, hidden_dim, 3, 3),
                                jnp.float32) / jnp.sqrt(9.0 * hidden_dim)
    w2_oihw = jax.random.normal(k_w2, (hidden_dim, filter_size, 3, 3),
                                jnp.float32) / jnp.sqrt(9.0 * filter_size)

    fwd = jax.jit(locality_aware_feedforward, static_argnums=(1,))
    out = fwd(x, shape, w1_oihw, w2_oihw)
    out = jax.block_until_ready(out)

    assert out.shape == x.shape, out.shape
    assert out.dtype == jnp.float32
    assert bool(jnp.all(out >= 0.0))          # final ReLU

    ref = reference_forward(x, shape, w1_oihw, w2_oihw)
    assert bool(jnp.allclose(out, ref, rtol=3e-2, atol=3e-2)), float(
        jnp.max(jnp.abs(out - ref)))

    print("KERNEL_OK")
</pallas_src>

<mosaic_0001>
module attributes {stable_mosaic.version = 11 : i64} {
  func.func @_laff_kernel(%arg0: i32, %arg1: memref<1x8x8x128xbf16, #tpu.memory_space<vmem>>, %arg2: memref<3x384x256xbf16, #tpu.memory_space<vmem>>, %arg3: memref<3x256x384xbf16, #tpu.memory_space<vmem>>, %arg4: memref<1x8x16x128xbf16, #tpu.memory_space<vmem>>, %arg5: memref<10x16x128xbf16, #tpu.memory_space<vmem>>, %arg6: memref<10x16x256xbf16, #tpu.memory_space<vmem>>) attributes {dimension_semantics = [#tpu.dimension_semantics<parallel>], iteration_bounds = array<i64: 2>, scalar_prefetch = 0 : i64, scratch_operands = 2 : i64, tpu.core_type = #tpu.core_type<tc>, window_params = [{transform_indices = @transform_0, window_bounds = array<i64: 1, 8, 8, 128>}, {pipeline_mode = #tpu.pipeline_mode<synchronous>, transform_indices = @transform_1, window_bounds = array<i64: 3, 384, 256>}, {pipeline_mode = #tpu.pipeline_mode<synchronous>, transform_indices = @transform_2, window_bounds = array<i64: 3, 256, 384>}, {transform_indices = @transform_3, window_bounds = array<i64: 1, 8, 16, 128>}]} {
    %cst = arith.constant 0.000000e+00 : bf16
    %0 = vector.broadcast %cst : bf16 to vector<1x16x128xbf16>
    %c0 = arith.constant 0 : index
    %c0_0 = arith.constant 0 : index
    %c0_1 = arith.constant 0 : index
    %1 = vector.load %arg5[%c0, %c0_0, %c0_1] : memref<10x16x128xbf16, #tpu.memory_space<vmem>>, vector<1x16x128xbf16>
    tpu.vector_store %arg5[%c0, %c0_0, %c0_1], %0 {strides = array<i32>} : memref<10x16x128xbf16, #tpu.memory_space<vmem>>, vector<1x16x128xbf16>,
    %c9 = arith.constant 9 : index
    %c0_2 = arith.constant 0 : index
    %c0_3 = arith.constant 0 : index
    %2 = vector.load %arg5[%c9, %c0_2, %c0_3] : memref<10x16x128xbf16, #tpu.memory_space<vmem>>, vector<1x16x128xbf16>
    tpu.vector_store %arg5[%c9, %c0_2, %c0_3], %0 {strides = array<i32>} : memref<10x16x128xbf16, #tpu.memory_space<vmem>>, vector<1x16x128xbf16>,
    %c0_4 = arith.constant 0 : index
    %c0_5 = arith.constant 0 : index
    %c0_6 = arith.constant 0 : index
    %c0_7 = arith.constant 0 : index
    %3 = vector.load %arg1[%c0_4, %c0_5, %c0_6, %c0_7] : memref<1x8x8x128xbf16, #tpu.memory_space<vmem>>, vector<1x8x8x128xbf16>
    %4 = vector.shape_cast %3 : vector<1x8x8x128xbf16> to vector<8x8x128xbf16>
    %c1 = arith.constant 1 : index
    %c0_8 = arith.constant 0 : index
    %c0_9 = arith.constant 0 : index
    %5 = vector.load %arg5[%c1, %c0_8, %c0_9] : memref<10x16x128xbf16, #tpu.memory_space<vmem>>, vector<8x8x128xbf16>
    tpu.vector_store %arg5[%c1, %c0_8, %c0_9], %4 {strides = array<i32>} : memref<10x16x128xbf16, #tpu.memory_space<vmem>>, vector<8x8x128xbf16>,
    %cst_10 = arith.constant 0.000000e+00 : bf16
    %6 = vector.broadcast %cst_10 : bf16 to vector<8x8x128xbf16>
    %c1_11 = arith.constant 1 : index
    %c8 = arith.constant 8 : index
    %c0_12 = arith.constant 0 : index
    %7 = vector.load %arg5[%c1_11, %c8, %c0_12] : memref<10x16x128xbf16, #tpu.memory_space<vmem>>, vector<8x8x128xbf16>
    tpu.vector_store %arg5[%c1_11, %c8, %c0_12], %6 {strides = array<i32>} : memref<10x16x128xbf16, #tpu.memory_space<vmem>>, vector<8x8x128xbf16>,
    %cst_13 = arith.constant 0.000000e+00 : f32
    %8 = vector.broadcast %cst_13 : f32 to vector<128x256xf32>
    %c0_14 = arith.constant 0 : index
    %c0_15 = arith.constant 0 : index
    %c0_16 = arith.constant 0 : index
    %9 = vector.load %arg5[%c0_14, %c0_15, %c0_16] : memref<10x16x128xbf16, #tpu.memory_space<vmem>>, vector<8x16x128xbf16>
    %10 = vector.shape_cast %9 : vector<8x16x128xbf16> to vector<128x128xbf16>
    %11 = vector.extract_strided_slice %10 {offsets = [127, 0], sizes = [1, 128], strides = [1, 1]} : vector<128x128xbf16> to vector<1x128xbf16>
    %12 = vector.extract_strided_slice %10 {offsets = [0, 0], sizes = [127, 128], strides = [1, 1]} : vector<128x128xbf16> to vector<127x128xbf16>
    %13 = tpu.concatenate %11, %12 in 0 : vector<1x128xbf16>, vector<127x128xbf16> -> vector<128x128xbf16>
    %14 = vector.extract_strided_slice %10 {offsets = [1, 0], sizes = [127, 128], strides = [1, 1]} : vector<128x128xbf16> to vector<127x128xbf16>
    %15 = vector.extract_strided_slice %10 {offsets = [0, 0], sizes = [1, 128], strides = [1, 1]} : vector<128x128xbf16> to vector<1x128xbf16>
    %16 = tpu.concatenate %14, %15 in 0 : vector<127x128xbf16>, vector<1x128xbf16> -> vector<128x128xbf16>
    %17 = tpu.concatenate %13, %10, %16 in 1 : vector<128x128xbf16>, vector<128x128xbf16>, vector<128x128xbf16> -> vector<128x384xbf16>
    %c0_17 = arith.constant 0 : index
    %c0_18 = arith.constant 0 : index
    %c0_19 = arith.constant 0 : index
    %18 = vector.load %arg2[%c0_17, %c0_18, %c0_19] : memref<3x384x256xbf16, #tpu.memory_space<vmem>>, vector<1x384x256xbf16>
    %19 = vector.shape_cast %18 : vector<1x384x256xbf16> to vector<384x256xbf16>
    %cst_20 = arith.constant dense<0.000000e+00> : vector<128x256xf32>
    %20 = tpu.matmul %17, %19, %cst_20 {dimension_numbers = #tpu.dot_dimension_numbers<[1], [0], [0], [1], [0, 0, 1, 1], [], []>} : vector<128x384xbf16>, vector<384x256xbf16>, vector<128x256xf32> -> vector<128x256xf32>
    %21 = arith.addf %8, %20 : vector<128x256xf32>
    %c1_21 = arith.constant 1 : index
    %c0_22 = arith.constant 0 : index
    %c0_23 = arith.constant 0 : index
    %22 = vector.load %arg5[%c1_21, %c0_22, %c0_23] : memref<10x16x128xbf16, #tpu.memory_space<vmem>>, vector<8x16x128xbf16>
    %23 = vector.shape_cast %22 : vector<8x16x128xbf16> to vector<128x128xbf16>
    %24 = vector.extract_strided_slice %23 {offsets = [127, 0], sizes = [1, 128], strides = [1, 1]} : vector<128x128xbf16> to vector<1x128xbf16>
    %25 = vector.extract_strided_slice %23 {offsets = [0, 0], sizes = [127, 128], strides = [1, 1]} : vector<128x128xbf16> to vector<127x128xbf16>
    %26 = tpu.concatenate %24, %25 in 0 : vector<1x128xbf16>, vector<127x128xbf16> -> vector<128x128xbf16>
    %27 = vector.extract_strided_slice %23 {offsets = [1, 0], sizes = [127, 128], strides = [1, 1]} : vector<128x128xbf16> to vector<127x128xbf16>
    %28 = vector.extract_strided_slice %23 {offsets = [0, 0], sizes = [1, 128], strides = [1, 1]} : vector<128x128xbf16> to vector<1x128xbf16>
    %29 = tpu.concatenate %27, %28 in 0 : vector<127x128xbf16>, vector<1x128xbf16> -> vector<128x128xbf16>
    %30 = tpu.concatenate %26, %23, %29 in 1 : vector<128x128xbf16>, vector<128x128xbf16>, vector<128x128xbf16> -> vector<128x384xbf16>
    %c1_24 = arith.constant 1 : index
    %c0_25 = arith.constant 0 : index
    %c0_26 = arith.constant 0 : index
    %31 = vector.load %arg2[%c1_24, %c0_25, %c0_26] : memref<3x384x256xbf16, #tpu.memory_space<vmem>>, vector<1x384x256xbf16>
    %32 = vector.shape_cast %31 : vector<1x384x256xbf16> to vector<384x256xbf16>
    %cst_27 = arith.constant dense<0.000000e+00> : vector<128x256xf32>
    %33 = tpu.matmul %30, %32, %cst_27 {dimension_numbers = #tpu.dot_dimension_numbers<[1], [0], [0], [1], [0, 0, 1, 1], [], []>} : vector<128x384xbf16>, vector<384x256xbf16>, vector<128x256xf32> -> vector<128x256xf32>
    %34 = arith.addf %21, %33 : vector<128x256xf32>
    %c2 = arith.constant 2 : index
    %c0_28 = arith.constant 0 : index
    %c0_29 = arith.constant 0 : index
    %35 = vector.load %arg5[%c2, %c0_28, %c0_29] : memref<10x16x128xbf16, #tpu.memory_space<vmem>>, vector<8x16x128xbf16>
    %36 = vector.shape_cast %35 : vector<8x16x128xbf16> to vector<128x128xbf16>
    %37 = vector.extract_strided_slice %36 {offsets = [127, 0], sizes = [1, 128], strides = [1, 1]} : vector<128x128xbf16> to vector<1x128xbf16>
    %38 = vector.extract_strided_slice %36 {offsets = [0, 0], sizes = [127, 128], strides = [1, 1]} : vector<128x128xbf16> to vector<127x128xbf16>
    %39 = tpu.concatenate %37, %38 in 0 : vector<1x128xbf16>, vector<127x128xbf16> -> vector<128x128xbf16>
    %40 = vector.extract_strided_slice %36 {offsets = [1, 0], sizes = [127, 128], strides = [1, 1]} : vector<128x128xbf16> to vector<127x128xbf16>
    %41 = vector.extract_strided_slice %36 {offsets = [0, 0], sizes = [1, 128], strides = [1, 1]} : vector<128x128xbf16> to vector<1x128xbf16>
    %42 = tpu.concatenate %40, %41 in 0 : vector<127x128xbf16>, vector<1x128xbf16> -> vector<128x128xbf16>
    %43 = tpu.concatenate %39, %36, %42 in 1 : vector<128x128xbf16>, vector<128x128xbf16>, vector<128x128xbf16> -> vector<128x384xbf16>
    %c2_30 = arith.constant 2 : index
    %c0_31 = arith.constant 0 : index
    %c0_32 = arith.constant 0 : index
    %44 = vector.load %arg2[%c2_30, %c0_31, %c0_32] : memref<3x384x256xbf16, #tpu.memory_space<vmem>>, vector<1x384x256xbf16>
    %45 = vector.shape_cast %44 : vector<1x384x256xbf16> to vector<384x256xbf16>
    %cst_33 = arith.constant dense<0.000000e+00> : vector<128x256xf32>
    %46 = tpu.matmul %43, %45, %cst_33 {dimension_numbers = #tpu.dot_dimension_numbers<[1], [0], [0], [1], [0, 0, 1, 1], [], []>} : vector<128x384xbf16>, vector<384x256xbf16>, vector<128x256xf32> -> vector<128x256xf32>
    %47 = arith.addf %34, %46 : vector<128x256xf32>
    %cst_34 = arith.constant 0.000000e+00 : f32
    %48 = vector.broadcast %cst_34 : f32 to vector<128x256xf32>
    %49 = arith.maximumf %47, %48 : vector<128x256xf32>
    %50 = arith.truncf %49 : vector<128x256xf32> to vector<128x256xbf16>
    %cst_35 = arith.constant 0.000000e+00 : bf16
    %51 = vector.broadcast %cst_35 : bf16 to vector<1x16x256xbf16>
    %c0_36 = arith.constant 0 : index
    %c0_37 = arith.constant 0 : index
    %c0_38 = arith.constant 0 : index
    %52 = vector.load %arg6[%c0_36, %c0_37, %c0_38] : memref<10x16x256xbf16, #tpu.memory_space<vmem>>, vector<1x16x256xbf16>
    tpu.vector_store %arg6[%c0_36, %c0_37, %c0_38], %51 {strides = array<i32>} : memref<10x16x256xbf16, #tpu.memory_space<vmem>>, vector<1x16x256xbf16>,
    %c9_39 = arith.constant 9 : index
    %c0_40 = arith.constant 0 : index
    %c0_41 = arith.constant 0 : index
    %53 = vector.load %arg6[%c9_39, %c0_40, %c0_41] : memref<10x16x256xbf16, #tpu.memory_space<vmem>>, vector<1x16x256xbf16>
    tpu.vector_store %arg6[%c9_39, %c0_40, %c0_41], %51 {strides = array<i32>} : memref<10x16x256xbf16, #tpu.memory_space<vmem>>, vector<1x16x256xbf16>,
    %54 = vector.shape_cast %50 : vector<128x256xbf16> to vector<8x16x256xbf16>
    %c1_42 = arith.constant 1 : index
    %c0_43 = arith.constant 0 : index
    %c0_44 = arith.constant 0 : index
    %55 = vector.load %arg6[%c1_42, %c0_43, %c0_44] : memref<10x16x256xbf16, #tpu.memory_space<vmem>>, vector<8x16x256xbf16>
    tpu.vector_store %arg6[%c1_42, %c0_43, %c0_44], %54 {strides = array<i32>} : memref<10x16x256xbf16, #tpu.memory_space<vmem>>, vector<8x16x256xbf16>,
    %cst_45 = arith.constant 0.000000e+00 : bf16
    %56 = vector.broadcast %cst_45 : bf16 to vector<8x8x256xbf16>
    %c1_46 = arith.constant 1 : index
    %c8_47 = arith.constant 8 : index
    %c0_48 = arith.constant 0 : index
    %57 = vector.load %arg6[%c1_46, %c8_47, %c0_48] : memref<10x16x256xbf16, #tpu.memory_space<vmem>>, vector<8x8x256xbf16>
    tpu.vector_store %arg6[%c1_46, %c8_47, %c0_48], %56 {strides = array<i32>} : memref<10x16x256xbf16, #tpu.memory_space<vmem>>, vector<8x8x256xbf16>,
    %cst_49 = arith.constant 0.000000e+00 : f32
    %58 = vector.broadcast %cst_49 : f32 to vector<128x128xf32>
    %c0_50 = arith.constant 0 : index
    %c0_51 = arith.constant 0 : index
    %c0_52 = arith.constant 0 : index
    %59 = vector.load %arg6[%c0_50, %c0_51, %c0_52] : memref<10x16x256xbf16, #tpu.memory_space<vmem>>, vector<8x16x256xbf16>
    %60 = vector.shape_cast %59 : vector<8x16x256xbf16> to vector<128x256xbf16>
    %c0_53 = arith.constant 0 : index
    %c0_54 = arith.constant 0 : index
    %c0_55 = arith.constant 0 : index
    %61 = vector.load %arg3[%c0_53, %c0_54, %c0_55] : memref<3x256x384xbf16, #tpu.memory_space<vmem>>, vector<1x256x384xbf16>
    %62 = vector.shape_cast %61 : vector<1x256x384xbf16> to vector<256x384xbf16>
    %cst_56 = arith.constant dense<0.000000e+00> : vector<128x384xf32>
    %63 = tpu.matmul %60, %62, %cst_56 {dimension_numbers = #tpu.dot_dimension_numbers<[1], [0], [0], [1], [0, 0, 1, 1], [], []>} : vector<128x256xbf16>, vector<256x384xbf16>, vector<128x384xf32> -> vector<128x384xf32>
    %64 = vector.extract_strided_slice %63 {offsets = [0, 0], sizes = [128, 128], strides = [1, 1]} : vector<128x384xf32> to vector<128x128xf32>
    %65 = vector.extract_strided_slice %64 {offsets = [127, 0], sizes = [1, 128], strides = [1, 1]} : vector<128x128xf32> to vector<1x128xf32>
    %66 = vector.extract_strided_slice %64 {offsets = [0, 0], sizes = [127, 128], strides = [1, 1]} : vector<128x128xf32> to vector<127x128xf32>
    %67 = tpu.concatenate %65, %66 in 0 : vector<1x128xf32>, vector<127x128xf32> -> vector<128x128xf32>
    %68 = arith.addf %58, %67 : vector<128x128xf32>
    %69 = vector.extract_strided_slice %63 {offsets = [0, 128], sizes = [128, 128], strides = [1, 1]} : vector<128x384xf32> to vector<128x128xf32>
    %70 = arith.addf %68, %69 : vector<128x128xf32>
    %71 = vector.extract_strided_slice %63 {offsets = [0, 256], sizes = [128, 128], strides = [1, 1]} : vector<128x384xf32> to vector<128x128xf32>
    %72 = vector.extract_strided_slice %71 {offsets = [1, 0], sizes = [127, 128], strides = [1, 1]} : vector<128x128xf32> to vector<127x128xf32>
    %73 = vector.extract_strided_slice %71 {offsets = [0, 0], sizes = [1, 128], strides = [1, 1]} : vector<128x128xf32> to vector<1x128xf32>
    %74 = tpu.concatenate %72, %73 in 0 : vector<127x128xf32>, vector<1x128xf32> -> vector<128x128xf32>
    %75 = arith.addf %70, %74 : vector<128x128xf32>
    %c1_57 = arith.constant 1 : index
    %c0_58 = arith.constant 0 : index
    %c0_59 = arith.constant 0 : index
    %76 = vector.load %arg6[%c1_57, %c0_58, %c0_59] : memref<10x16x256xbf16, #tpu.memory_space<vmem>>, vector<8x16x256xbf16>
    %77 = vector.shape_cast %76 : vector<8x16x256xbf16> to vector<128x256xbf16>
    %c1_60 = arith.constant 1 : index
    %c0_61 = arith.constant 0 : index
    %c0_62 = arith.constant 0 : index
    %78 = vector.load %arg3[%c1_60, %c0_61, %c0_62] : memref<3x256x384xbf16, #tpu.memory_space<vmem>>, vector<1x256x384xbf16>
    %79 = vector.shape_cast %78 : vector<1x256x384xbf16> to vector<256x384xbf16>
    %cst_63 = arith.constant dense<0.000000e+00> : vector<128x384xf32>
    %80 = tpu.matmul %77, %79, %cst_63 {dimension_numbers = #tpu.dot_dimension_numbers<[1], [0], [0], [1], [0, 0, 1, 1], [], []>} : vector<128x256xbf16>, vector<256x384xbf16>, vector<128x384xf32> -> vector<128x384xf32>
    %81 = vector.extract_strided_slice %80 {offsets = [0, 0], sizes = [128, 128], strides = [1, 1]} : vector<128x384xf32> to vector<128x128xf32>
    %82 = vector.extract_strided_slice %81 {offsets = [127, 0], sizes = [1, 128], strides = [1, 1]} : vector<128x128xf32> to vector<1x128xf32>
    %83 = vector.extract_strided_slice %81 {offsets = [0, 0], sizes = [127, 128], strides = [1, 1]} : vector<128x128xf32> to vector<127x128xf32>
    %84 = tpu.concatenate %82, %83 in 0 : vector<1x128xf32>, vector<127x128xf32> -> vector<128x128xf32>
    %85 = arith.addf %75, %84 : vector<128x128xf32>
    %86 = vector.extract_strided_slice %80 {offsets = [0, 128], sizes = [128, 128], strides = [1, 1]} : vector<128x384xf32> to vector<128x128xf32>
    %87 = arith.addf %85, %86 : vector<128x128xf32>
    %88 = vector.extract_strided_slice %80 {offsets = [0, 256], sizes = [128, 128], strides = [1, 1]} : vector<128x384xf32> to vector<128x128xf32>
    %89 = vector.extract_strided_slice %88 {offsets = [1, 0], sizes = [127, 128], strides = [1, 1]} : vector<128x128xf32> to vector<127x128xf32>
    %90 = vector.extract_strided_slice %88 {offsets = [0, 0], sizes = [1, 128], strides = [1, 1]} : vector<128x128xf32> to vector<1x128xf32>
    %91 = tpu.concatenate %89, %90 in 0 : vector<127x128xf32>, vector<1x128xf32> -> vector<128x128xf32>
    %92 = arith.addf %87, %91 : vector<128x128xf32>
    %c2_64 = arith.constant 2 : index
    %c0_65 = arith.constant 0 : index
    %c0_66 = arith.constant 0 : index
    %93 = vector.load %arg6[%c2_64, %c0_65, %c0_66] : memref<10x16x256xbf16, #tpu.memory_space<vmem>>, vector<8x16x256xbf16>
    %94 = vector.shape_cast %93 : vector<8x16x256xbf16> to vector<128x256xbf16>
    %c2_67 = arith.constant 2 : index
    %c0_68 = arith.constant 0 : index
    %c0_69 = arith.constant 0 : index
    %95 = vector.load %arg3[%c2_67, %c0_68, %c0_69] : memref<3x256x384xbf16, #tpu.memory_space<vmem>>, vector<1x256x384xbf16>
    %96 = vector.shape_cast %95 : vector<1x256x384xbf16> to vector<256x384xbf16>
    %cst_70 = arith.constant dense<0.000000e+00> : vector<128x384xf32>
    %97 = tpu.matmul %94, %96, %cst_70 {dimension_numbers = #tpu.dot_dimension_numbers<[1], [0], [0], [1], [0, 0, 1, 1], [], []>} : vector<128x256xbf16>, vector<256x384xbf16>, vector<128x384xf32> -> vector<128x384xf32>
    %98 = vector.extract_strided_slice %97 {offsets = [0, 0], sizes = [128, 128], strides = [1, 1]} : vector<128x384xf32> to vector<128x128xf32>
    %99 = vector.extract_strided_slice %98 {offsets = [127, 0], sizes = [1, 128], strides = [1, 1]} : vector<128x128xf32> to vector<1x128xf32>
    %100 = vector.extract_strided_slice %98 {offsets = [0, 0], sizes = [127, 128], strides = [1, 1]} : vector<128x128xf32> to vector<127x128xf32>
    %101 = tpu.concatenate %99, %100 in 0 : vector<1x128xf32>, vector<127x128xf32> -> vector<128x128xf32>
    %102 = arith.addf %92, %101 : vector<128x128xf32>
    %103 = vector.extract_strided_slice %97 {offsets = [0, 128], sizes = [128, 128], strides = [1, 1]} : vector<128x384xf32> to vector<128x128xf32>
    %104 = arith.addf %102, %103 : vector<128x128xf32>
    %105 = vector.extract_strided_slice %97 {offsets = [0, 256], sizes = [128, 128], strides = [1, 1]} : vector<128x384xf32> to vector<128x128xf32>
    %106 = vector.extract_strided_slice %105 {offsets = [1, 0], sizes = [127, 128], strides = [1, 1]} : vector<128x128xf32> to vector<127x128xf32>
    %107 = vector.extract_strided_slice %105 {offsets = [0, 0], sizes = [1, 128], strides = [1, 1]} : vector<128x128xf32> to vector<1x128xf32>
    %108 = tpu.concatenate %106, %107 in 0 : vector<127x128xf32>, vector<1x128xf32> -> vector<128x128xf32>
    %109 = arith.addf %104, %108 : vector<128x128xf32>
    %cst_71 = arith.constant 0.000000e+00 : f32
    %110 = vector.broadcast %cst_71 : f32 to vector<128x128xf32>
    %111 = arith.maximumf %109, %110 : vector<128x128xf32>
    %112 = arith.truncf %111 : vector<128x128xf32> to vector<128x128xbf16>
    %113 = vector.shape_cast %112 : vector<128x128xbf16> to vector<1x8x16x128xbf16>
    %c0_72 = arith.constant 0 : index
    %c0_73 = arith.constant 0 : index
    %c0_74 = arith.constant 0 : index
    %c0_75 = arith.constant 0 : index
    %114 = vector.load %arg4[%c0_72, %c0_73, %c0_74, %c0_75] : memref<1x8x16x128xbf16, #tpu.memory_space<vmem>>, vector<1x8x16x128xbf16>
    tpu.vector_store %arg4[%c0_72, %c0_73, %c0_74, %c0_75], %113 {strides = array<i32>} : memref<1x8x16x128xbf16, #tpu.memory_space<vmem>>, vector<1x8x16x128xbf16>,
    return
  }
  func.func @transform_0(%arg0: i32) -> (i32, i32, i32, i32) {
    %c0_i32 = arith.constant 0 : i32
    %c0_i32_0 = arith.constant 0 : i32
    %c0_i32_1 = arith.constant 0 : i32
    %c0_i32_2 = arith.constant 0 : i32
    return %arg0, %c0_i32, %c0_i32_0, %c0_i32_1 : i32, i32, i32, i32
  }
  func.func @transform_1(%arg0: i32) -> (i32, i32, i32) {
    %c0_i32 = arith.constant 0 : i32
    %c0_i32_0 = arith.constant 0 : i32
    %c0_i32_1 = arith.constant 0 : i32
    %c0_i32_2 = arith.constant 0 : i32
    return %c0_i32, %c0_i32_0, %c0_i32_1 : i32, i32, i32
  }
  func.func @transform_2(%arg0: i32) -> (i32, i32, i32) {
    %c0_i32 = arith.constant 0 : i32
    %c0_i32_0 = arith.constant 0 : i32
    %c0_i32_1 = arith.constant 0 : i32
    %c0_i32_2 = arith.constant 0 : i32
    return %c0_i32, %c0_i32_0, %c0_i32_1 : i32, i32, i32
  }
  func.func @transform_3(%arg0: i32) -> (i32, i32, i32, i32) {
    %c0_i32 = arith.constant 0 : i32
    %c0_i32_0 = arith.constant 0 : i32
    %c0_i32_1 = arith.constant 0 : i32
    %c0_i32_2 = arith.constant 0 : i32
    return %arg0, %c0_i32, %c0_i32_0, %c0_i32_1 : i32, i32, i32, i32
  }
}

</mosaic_0001>

<bundles_post_ra>
// kernel: locality_aware_feedforward.1
= control target key start
LH: loop header
LB: loop body
LE: loop exit
PB: predicated region body
PF: predicated region fallthrough
CT: control target
= control target key end

     0   :  { %s6449_s12 = smov 0   ;;  %s8469_s0 = inlined_call_operand.vmem [shape: bf16[2,8,8,128], index: 0, kind: input, shape index: {}]   ;;  %s8470_s1 = inlined_call_operand.vmem [shape: bf16[3,384,256], index: 1, kind: input, shape index: {}]   ;;  %s8471_s2 = inlined_call_operand.vmem [shape: bf16[3,256,384], index: 2, kind: input, shape index: {}]   ;;  %s8472_s3 = inlined_call_operand.vmem [shape: bf16[2,8,16,128], index: 3, kind: output, shape index: {}]  }
   0x1 LB: > { %s5051_s13 = sadd.s32 4294967295, %s6426_s12   ;;  %p5055_p0 = scmp.ge.s32.totalorder %s6426_s12, 1  ;;  %s6426_s12 = sphi %s6449_s12, %s13_s12  }
   0x2   : > { %p137_p1 = scmp.lt.s32.totalorder %s6426_s12, 3 }
   0x4   : > { %p138_p2 = pnand %p5055_p0, %p137_p1 }
   0x5   : > { %p161_p3 = scmp.lt.s32.totalorder (!%p138_p2), %s5051_s13, 1 }
   0x6   : > { %141 = sbr.rel (%p138_p2) target bundleno = 814 (0x32e), region = 32 }
   0xb   : > { %v5982_v0 = vld [vmem:[%s8470_s1 + $0x1f4] ss:$8 sps:$4 sm:$0xff]   ;;  %v6428_v2 = vmov 0   ;;  %v5986_v3 = vld [vmem:[%s8470_s1 + $0x1f0] ss:$8 sps:$4 sm:$0xff]   ;;  %s8478_s13 = smov (!%p161_p3, %s5051_s13), 1 }
   0xc   : > { %v5984_v1 = vld [vmem:[%s8470_s1 + $0x2f4] ss:$8 sps:$4 sm:$0xff]   ;;  %1050 = vmatprep.mubr.bf16.mxu1 %v6428_v2  ;;  %172 = vst [vmem:[#allocation2] sm:$0xf] %v6428_v2  ;;  %173 = vst [vmem:[#allocation2 + $0x4] sm:$0xf] %v6428_v2  ;;  %905 = vmatprep.subr.bf16.mxu0 %v5982_v0 }
   0xd   : > { %175 = vst [vmem:[#allocation2 + $0x48] sm:$0xf] %v6428_v2  ;;  %176 = vst [vmem:[#allocation2 + $0x4c] sm:$0xf] %v6428_v2  ;;  %v5987_v4 = vld [vmem:[%s8470_s1 + $0x2f0] ss:$8 sps:$4 sm:$0xff]   ;;  %1018 = vmatprep.subr.bf16.mxu1 %v5984_v1  ;;  %906 = vmatpush1.bf16.msra.mxu0 %v5986_v3 }
   0xe   : > { %194 = vst [vmem:[#allocation2 + $0xc] sm:$0xf] %v6428_v2  ;;  %195 = vst [vmem:[#allocation2 + $0x14] sm:$0xf] %v6428_v2  ;;  %v5988_v5 = vld [vmem:[%s8470_s1 + $0x1e4] ss:$8 sps:$4 sm:$0xff]   ;;  %1019 = vmatpush1.bf16.msra.mxu1 %v5987_v4 }
   0xf   : > { %196 = vst [vmem:[#allocation2 + $0x1c] sm:$0xf] %v6428_v2  ;;  %197 = vst [vmem:[#allocation2 + $0x24] sm:$0xf] %v6428_v2  ;;  %v5990_v6 = vld [vmem:[%s8470_s1 + $0x2e4] ss:$8 sps:$4 sm:$0xff]   ;;  %907 = vmatprep.subr.bf16.mxu0 %v5988_v5 }
  0x10   : > { %198 = vst [vmem:[#allocation2 + $0x2c] sm:$0xf] %v6428_v2  ;;  %199 = vst [vmem:[#allocation2 + $0x34] sm:$0xf] %v6428_v2  ;;  %v5992_v7 = vld [vmem:[%s8470_s1 + $0x1e0] ss:$8 sps:$4 sm:$0xff]   ;;  %1020 = vmatprep.subr.bf16.mxu1 %v5990_v6 }
  0x11   : > { %200 = vst [vmem:[#allocation2 + $0x3c] sm:$0xf] %v6428_v2  ;;  %201 = vst [vmem:[#allocation2 + $0x44] sm:$0xf] %v6428_v2  ;;  %v5993_v8 = vld [vmem:[%s8470_s1 + $0x2e0] ss:$8 sps:$4 sm:$0xff]   ;;  %908 = vmatpush1.bf16.msra.mxu0 %v5992_v7 }
  0x12   : > { %v5994_v9 = vld [vmem:[%s8470_s1 + $0x1d4] ss:$8 sps:$4 sm:$0xff]   ;;  %v5998_v11 = vld [vmem:[%s8470_s1 + $0x1d0] ss:$8 sps:$4 sm:$0xff]   ;;  %1021 = vmatpush1.bf16.msra.mxu1 %v5993_v8  ;;  %v6000_v13 = vld [vmem:[%s8470_s1 + $0x1c4] ss:$8 sps:$4 sm:$0xff]  }
  0x13   : > { %v5996_v10 = vld [vmem:[%s8470_s1 + $0x2d4] ss:$8 sps:$4 sm:$0xff]   ;;  %v5999_v12 = vld [vmem:[%s8470_s1 + $0x2d0] ss:$8 sps:$4 sm:$0xff]   ;;  %909 = vmatprep.subr.bf16.mxu0 %v5994_v9  ;;  %v6002_v14 = vld [vmem:[%s8470_s1 + $0x2c4] ss:$8 sps:$4 sm:$0xff]  }
  0x14   : > { %1022 = vmatprep.subr.bf16.mxu1 %v5996_v10  ;;  %v6004_v15 = vld [vmem:[%s8470_s1 + $0x1c0] ss:$8 sps:$4 sm:$0xff]   ;;  %v6006_v17 = vld [vmem:[%s8470_s1 + $0x1b4] ss:$8 sps:$4 sm:$0xff]   ;;  %v6010_v19 = vld [vmem:[%s8470_s1 + $0x1b0] ss:$8 sps:$4 sm:$0xff]  }
  0x15   : > { %910 = vmatpush1.bf16.msra.mxu0 %v5998_v11  ;;  %v6005_v16 = vld [vmem:[%s8470_s1 + $0x2c0] ss:$8 sps:$4 sm:$0xff]   ;;  %v6008_v18 = vld [vmem:[%s8470_s1 + $0x2b4] ss:$8 sps:$4 sm:$0xff]   ;;  %v6011_v20 = vld [vmem:[%s8470_s1 + $0x2b0] ss:$8 sps:$4 sm:$0xff]  }
  0x16   : > { %1023 = vmatpush1.bf16.msra.mxu1 %v5999_v12  ;;  %911 = vmatprep.subr.bf16.mxu0 %v6000_v13  ;;  %v6012_v21 = vld [vmem:[%s8470_s1 + $0x1a4] ss:$8 sps:$4 sm:$0xff]   ;;  %s5684_s4 = sshll.u32 %s8478_s13, 5  ;;  %v6016_v23 = vld [vmem:[%s8470_s1 + $0x1a0] ss:$8 sps:$4 sm:$0xff]   ;;  %vm336_vm2 = vcmask 1040384  }
  0x17   : > { %1024 = vmatprep.subr.bf16.mxu1 %v6002_v14  ;;  %v6014_v22 = vld [vmem:[%s8470_s1 + $0x2a4] ss:$8 sps:$4 sm:$0xff]   ;;  %s6549_s11 = scalar_lea.vmem %s8469_s0, %s5684_s4  ;;  %v6017_v24 = vld [vmem:[%s8470_s1 + $0x2a0] ss:$8 sps:$4 sm:$0xff]   ;;  %v6018_v25 = vld [vmem:[%s8470_s1 + $0x194] ss:$8 sps:$4 sm:$0xff]  }
  0x18   : > { %v6020_v26 = vld [vmem:[%s8470_s1 + $0x294] ss:$8 sps:$4 sm:$0xff]   ;;  %v177_v27 = vld [vmem:[%s6549_s11] sm:$0xf]  ;;  %v178_v28 = vld [vmem:[%s6549_s11 + $0x4] sm:$0xf] }
  0x19   : > { %912 = vmatpush1.bf16.msra.mxu0 %v6004_v15  ;;  %v6022_v29 = vld [vmem:[%s8470_s1 + $0x190] ss:$8 sps:$4 sm:$0xff]   ;;  %186 = vst [vmem:[#allocation2 + $0x8] sm:$0xf] %v177_v27  ;;  %187 = vst [vmem:[#allocation2 + $0x10] sm:$0xf] %v178_v28 }
  0x1a   : > { %1025 = vmatpush1.bf16.msra.mxu1 %v6005_v16  ;;  %913 = vmatprep.subr.bf16.mxu0 %v6006_v17  ;;  %v6023_v30 = vld [vmem:[%s8470_s1 + $0x290] ss:$8 sps:$4 sm:$0xff]   ;;  %v6024_v31 = vld [vmem:[%s8470_s1 + $0x184] ss:$8 sps:$4 sm:$0xff]   ;;  %v6028_v33 = vld [vmem:[%s8470_s1 + $0x180] ss:$8 sps:$4 sm:$0xff]  }
  0x1b   : > { %1026 = vmatprep.subr.bf16.mxu1 %v6008_v18  ;;  %v6026_v32 = vld [vmem:[%s8470_s1 + $0x284] ss:$8 sps:$4 sm:$0xff]   ;;  %v6029_v34 = vld [vmem:[%s8470_s1 + $0x280] ss:$8 sps:$4 sm:$0xff]   ;;  %v6030_v35 = vld [vmem:[%s8470_s1 + $0x274] ss:$8 sps:$4 sm:$0xff]  }
  0x1c   : > { %v437_v36 = vld [vmem:[#allocation2 + $0xc] sm:$0xf]  ;;  %v6036_v37 = vld [vmem:[%s8470_s1 + $0x74] ss:$8 sps:$4 sm:$0xff]   ;;  %v179_v38 = vld [vmem:[%s6549_s11 + $0x8] sm:$0xf] }
  0x1d   : > { %914 = vmatpush1.bf16.msra.mxu0 %v6010_v19  ;;  %188 = vst [vmem:[#allocation2 + $0x18] sm:$0xf] %v179_v38  ;;  %v6037_v43 = vld [vmem:[%s8470_s1 + $0x270] ss:$8 sps:$4 sm:$0xff]   ;;  %v6038_v46 = vld [vmem:[%s8470_s1 + $0x264] ss:$8 sps:$4 sm:$0xff]  }
  0x1e   : > { %1027 = vmatpush1.bf16.msra.mxu1 %v6011_v20  ;;  %915 = vmatprep.subr.bf16.mxu0 %v6012_v21  ;;  %vm339_vm0 = vsmask.f32 7424  ;;  %v6034_v49 = vld [vmem:[%s8470_s1 + $0x70] ss:$8 sps:$4 sm:$0xff]   ;;  %v6043_v50 = vld [vmem:[%s8470_s1 + $0x260] ss:$8 sps:$4 sm:$0xff]  }
  0x1f   : > { %1028 = vmatprep.subr.bf16.mxu1 %v6014_v22  ;;  %v180_v51 = vld [vmem:[%s6549_s11 + $0xc] sm:$0xf]  ;;  %v6044_v56 = vld [vmem:[%s8470_s1 + $0x254] ss:$8 sps:$4 sm:$0xff]   ;;  %v6050_v59 = vld [vmem:[%s8470_s1 + $0x250] ss:$8 sps:$4 sm:$0xff]  }
  0x20   : > { %v6587_v39 = vld [vmem:[#allocation2 + $0x8] sm:$0xf]  ;;  %v6589_v40 = vld [vmem:[#allocation2 + $0x10] sm:$0xff]   ;;  %189 = vst [vmem:[#allocation2 + $0x20] sm:$0xf] %v180_v51  ;;  %vm377_vm4 = vcmask 1047552  }
  0x21   : > { %916 = vmatpush1.bf16.msra.mxu0 %v6016_v23  ;;  %v6592_v41 = vcombine.low %v6587_v39, %v437_v36  ;;  %v509_v42 = vshll.u32 %v6589_v40, 16  ;;  %v506_v54 = vshrl.u32 %v6589_v40, 16  ;;  %v6042_v55 = vld [vmem:[%s8470_s1 + $0x64] ss:$8 sps:$4 sm:$0xff]   ;;  %v6040_v60 = vld [vmem:[%s8470_s1 + $0x60] ss:$8 sps:$4 sm:$0xff]   ;;  %vm6893_vm5 = vmand %vm377_vm4, %vm339_vm0 }
  0x22   : > { %1029 = vmatpush1.bf16.msra.mxu1 %v6017_v24  ;;  %917 = vmatprep.subr.bf16.mxu0 %v6018_v25  ;;  %v6051_v63 = vld [vmem:[%s8470_s1 + $0x244] ss:$8 sps:$4 sm:$0xff]   ;;  %v6049_v0 = vld [vmem:[%s8470_s1 + $0x54] ss:$8 sps:$4 sm:$0xff]   ;;  %v181_v1 = vld [vmem:[%s6549_s11 + $0x10] sm:$0xf] }
  0x23   : > { %1030 = vmatprep.subr.bf16.mxu1 %v6020_v26  ;;  %v499_v44 = vshrl.u32 %v6592_v41, 16  ;;  %v502_v45 = vshll.u32 %v6592_v41, 16  ;;  %937 = vmatprep.mubr.bf16.mxu0 %v6592_v41  ;;  %v572_v48 = vrot.slane %v509_v42, 1  ;;  %190 = vst [vmem:[#allocation2 + $0x28] sm:$0xf] %v181_v1  ;;  %vm3223_vm6 = vcmask 1046528  }
  0x24   : > { %v6617_v53 = vld [vmem:[#allocation2 + $0x18] sm:$0xff]   ;;  %v6056_v3 = vld [vmem:[%s8470_s1 + $0x240] ss:$8 sps:$4 sm:$0xff]   ;;  %v6055_v7 = vld [vmem:[%s8470_s1 + $0x44] ss:$8 sps:$4 sm:$0xff]   ;;  %s5685_s21 = sshll.u32 %s8478_s13, 6 }
  0x25   : > { %918 = vmatpush1.bf16.msra.mxu0 %v6022_v29  ;;  %v570_v47 = vrot.slane %v502_v45, 1  ;;  %v517_v58 = vshll.u32 %v6617_v53, 16  ;;  %v574_v61 = vor.u32 %v572_v48, %v506_v54  ;;  %v6047_v6 = vld [vmem:[%s8470_s1 + $0x50] ss:$8 sps:$4 sm:$0xff]   ;;  %v514_v8 = vshrl.u32 %v6617_v53, 16  ;;  %s8392_s24 = scalar_lea.vmem %s8472_s3, %s5685_s21 }
  0x26   : > { %1031 = vmatpush1.bf16.msra.mxu1 %v6023_v30  ;;  %919 = vmatprep.subr.bf16.mxu0 %v6024_v31  ;;  %v6057_v9 = vld [vmem:[%s8470_s1 + $0x234] ss:$8 sps:$4 sm:$0xff]   ;;  %v6053_v11 = vld [vmem:[%s8470_s1 + $0x40] ss:$8 sps:$4 sm:$0xff]   ;;  %v6063_v12 = vld [vmem:[%s8470_s1 + $0x230] ss:$8 sps:$4 sm:$0xff]  }
  0x27   : > { %1032 = vmatprep.subr.bf16.mxu1 %v6026_v32  ;;  %v571_v52 = vor.u32 %v570_v47, %v499_v44  ;;  %v575_v62 = vrot.slane %v517_v58, 1  ;;  %v6649_v4 = vld [vmem:[#allocation2 + $0x20] sm:$0xff]   ;;  %v6062_v14 = vld [vmem:[%s8470_s1 + $0x34] ss:$8 sps:$4 sm:$0xff]   ;;  %v6060_v24 = vld [vmem:[%s8470_s1 + $0x30] ss:$8 sps:$4 sm:$0xff]  }
  0x28   : > { %v525_v10 = vshll.u32 %v6649_v4, 16  ;;  %v6064_v15 = vld [vmem:[%s8470_s1 + $0x224] ss:$8 sps:$4 sm:$0xff]   ;;  %v184_v16 = vld [vmem:[%s6549_s11 + $0x1c] sm:$0xf]  ;;  %v522_v25 = vshrl.u32 %v6649_v4, 16 }
  0x29   : > { %920 = vmatpush1.bf16.msra.mxu0 %v6028_v33  ;;  %v573_v57 = vsel %vm339_vm0, %v571_v52, %v572_v48  ;;  %v576_v5 = vsel %vm339_vm0, %v574_v61, %v575_v62  ;;  %v577_v17 = vor.u32 %v575_v62, %v514_v8  ;;  %193 = vst [vmem:[#allocation2 + $0x40] sm:$0xf] %v184_v16  ;;  %v6681_v18 = vld [vmem:[#allocation2 + $0x44] sm:$0xf]  ;;  %v182_v19 = vld [vmem:[%s6549_s11 + $0x14] sm:$0xf] }
  0x2a   : > { %1033 = vmatpush1.bf16.msra.mxu1 %v6029_v34  ;;  %921 = vmatprep.subr.bf16.mxu0 %v6030_v35  ;;  %v578_v13 = vrot.slane %v525_v10, 1  ;;  %v6684_v20 = vld [vmem:[#allocation2 + $0x28] sm:$0xff]   ;;  %191 = vst [vmem:[#allocation2 + $0x30] sm:$0xf] %v182_v19  ;;  %v5070_v22 = vcombine.low %v6681_v18, %v6681_v18  ;;  %v6070_v28 = vld [vmem:[%s8470_s1 + $0x214] ss:$8 sps:$4 sm:$0xff]  }
  0x2b   : > { %1371 = vmatprep.subr.bf16.mxu1 %v6036_v37  ;;  %v6069_v21 = vld [vmem:[%s8470_s1 + $0x220] ss:$8 sps:$4 sm:$0xff]   ;;  %v533_v26 = vshll.u32 %v6684_v20, 16  ;;  %v6068_v27 = vld [vmem:[%s8470_s1 + $0x24] ss:$8 sps:$4 sm:$0xff]   ;;  %v6705_v29 = vrot.slane %v499_v44, 7 }
  0x2c   : > { %v579_v23 = vsel %vm339_vm0, %v577_v17, %v578_v13  ;;  %vm264_vm1 = vsmask.f32 256  ;;  %v183_v30 = vld [vmem:[%s6549_s11 + $0x18] sm:$0xf]  ;;  %v6066_v31 = vld [vmem:[%s8470_s1 + $0x20] ss:$8 sps:$4 sm:$0xff]   ;;  %v580_v34 = vor.u32 %v578_v13, %v522_v25 }
  0x2d   : > { %922 = vmatpush2.bf16.msra.mxu0 %v6037_v43  ;;  %1051 = vmatmul.mubr.bf16.vlgmr.msra.gmra.mxu1 %v573_v57  ;;  %v6076_v32 = vld [vmem:[%s8470_s1 + $0x210] ss:$8 sps:$4 sm:$0xff]   ;;  %v456_v33 = vshrl.u32 %v5070_v22, 16  ;;  %192 = vst [vmem:[#allocation2 + $0x38] sm:$0xf] %v183_v30  ;;  %v581_v35 = vrot.slane %v533_v26, 1  ;;  %v504_v47 = vor.u32 %v502_v45, %v6705_v29  ;;  %vm6742_vm3 = vmand %vm336_vm2, %vm264_vm1 }
  0x2e   : > { %923 = vmatprep.subr.bf16.mxu0 %v6038_v46  ;;  %1372 = vmatpush1.bf16.msra.mxu1 %v6034_v49  ;;  %v6077_v36 = vld [vmem:[%s8470_s1 + $0x204] ss:$8 sps:$4 sm:$0xff]   ;;  %v6075_v38 = vld [vmem:[%s8470_s1 + $0x14] ss:$8 sps:$4 sm:$0xff]   ;;  %v6073_v43 = vld [vmem:[%s8470_s1 + $0x10] ss:$8 sps:$4 sm:$0xff]  }
  0x2f   : > { %1060 = vmatprep.mubr.bf16.mxu1 %v6428_v2  ;;  %1373 = vmatprep.subr.bf16.mxu1 %v6042_v55  ;;  %v6082_v44 = vld [vmem:[%s8470_s1 + $0x200] ss:$8 sps:$4 sm:$0xff]   ;;  %v458_v46 = vrot.slane %v456_v33, 3  ;;  %v582_v48 = vsel %vm339_vm0, %v580_v34, %v581_v35  ;;  %v6081_v49 = vld [vmem:[%s8470_s1 + $0x4] ss:$8 sps:$4 sm:$0xff]   ;;  %v530_v51 = vshrl.u32 %v6684_v20, 16 }
  0x30   : > { %v6091_v41 = vld [vmem:[%s8470_s1 + $0x174] ss:$8 sps:$4 sm:$0xff]   ;;  %v6079_v45 = vld [vmem:[%s8470_s1] ss:$8 sps:$4 sm:$0xff]   ;;  %v6089_v55 = vld [vmem:[%s8470_s1 + $0x170] ss:$8 sps:$4 sm:$0xff]  }
  0x31   : > { %924 = vmatpush2.bf16.msra.mxu0 %v6043_v50  ;;  %v6722_v37 = vld [vmem:[#allocation2 + $0x30] sm:$0xff]   ;;  %v508_v57 = vrot.slane %v506_v54, 7  ;;  %v6099_v1 = vld [vmem:[%s8470_s1 + $0x160] ss:$8 sps:$4 sm:$0xff]   ;;  %v6120_v16 = vld [vmem:[%s8470_s1 + $0x144] ss:$8 sps:$4 sm:$0xff]  }
  0x32   : > { %925 = vmatprep.subr.bf16.mxu0 %v6044_v56  ;;  %1374 = vmatpush1.bf16.msra.mxu1 %v6040_v60  ;;  %v541_v52 = vshll.u32 %v6722_v37, 16  ;;  %v569_v56 = vsel %vm6742_vm3, %v458_v46, %v504_v47  ;;  %v583_v60 = vor.u32 %v581_v35, %v530_v51  ;;  %v6088_v54 = vld [vmem:[%s8470_s1 + $0xf4] ss:$8 sps:$4 sm:$0xff]   ;;  %v6118_v22 = vld [vmem:[%s8470_s1 + $0x140] ss:$8 sps:$4 sm:$0xff]  }
  0x33   : > { %1375 = vmatprep.subr.bf16.mxu1 %v6049_v0  ;;  %v511_v0 = vor.u32 %v509_v42, %v508_v57  ;;  %v6794_v42 = vrot.slane %v514_v8, 7  ;;  %v6098_v17 = vld [vmem:[%s8470_s1 + $0xd4] ss:$8 sps:$4 sm:$0xff]   ;;  %v6852_v33 = vld [vmem:[#allocation2] sm:$0xf] }
  0x34   : > { %v584_v61 = vrot.slane %v541_v52, 1  ;;  %v6769_v62 = vld [vmem:[#allocation2 + $0x38] sm:$0xff]   ;;  %v6113_v47 = vld [vmem:[%s8470_s1 + $0xa4] ss:$8 sps:$4 sm:$0xff]  }
  0x35   : > { %926 = vmatpush2.bf16.msra.mxu0 %v6050_v59  ;;  %1061 = vmatmul.mubr.bf16.gmra.mxu1 %v576_v5  ;;  %v6101_v59 = vld [vmem:[%s8470_s1 + $0x164] ss:$8 sps:$4 sm:$0xff]   ;;  %v512_v13 = vsel %vm264_vm1, %v6705_v29, %v511_v0  ;;  %v519_v19 = vor.u32 %v517_v58, %v6794_v42  ;;  %v6102_v58 = vld [vmem:[%s8470_s1 + $0xc0] ss:$8 sps:$4 sm:$0xff]   ;;  %v6107_v30 = vld [vmem:[%s8470_s1 + $0xb4] ss:$8 sps:$4 sm:$0xff]  }
  0x36   : > { %927 = vmatprep.subr.bf16.mxu0 %v6051_v63  ;;  %1376 = vmatpush1.bf16.msra.mxu1 %v6047_v6  ;;  %v6086_v63 = vld [vmem:[%s8470_s1 + $0xf0] ss:$8 sps:$4 sm:$0xff]   ;;  %v585_v5 = vsel %vm339_vm0, %v583_v60, %v584_v61  ;;  %v6094_v6 = vld [vmem:[%s8470_s1 + $0xe4] ss:$8 sps:$4 sm:$0xff]  }
  0x37   : > { %1070 = vmatprep.mubr.bf16.mxu1 %v6428_v2  ;;  %1377 = vmatprep.subr.bf16.mxu1 %v6055_v7  ;;  %v538_v7 = vshrl.u32 %v6722_v37, 16  ;;  %v6127_v34 = vld [vmem:[%s8470_s1 + $0x130] ss:$8 sps:$4 sm:$0xff]  }
  0x38   : > { %v6105_v46 = vld [vmem:[%s8470_s1 + $0xb0] ss:$8 sps:$4 sm:$0xff]  }
  0x39   : > { %928 = vmatpush2.bf16.msra.mxu0 %v6056_v3  ;;  %v450_v3 = vld [vmem:[#allocation2 + $0x40] sm:$0xf]  ;;  %v586_v8 = vor.u32 %v584_v61, %v538_v7  ;;  %v6115_v0 = vld [vmem:[%s8470_s1 + $0x90] ss:$8 sps:$4 sm:$0xff]  }
  0x3a   : > { %929 = vmatprep.subr.bf16.mxu0 %v6057_v9  ;;  %1378 = vmatpush1.bf16.msra.mxu1 %v6053_v11  ;;  %v549_v9 = vshll.u32 %v6769_v62, 16  ;;  %v6797_v11 = vcombine.low %v450_v3, %v6681_v18  ;;  %v6096_v18 = vld [vmem:[%s8470_s1 + $0xd0] ss:$8 sps:$4 sm:$0xff]  }
  0x3b   : > { %1379 = vmatprep.subr.bf16.mxu1 %v6062_v14  ;;  %v6108_v14 = vld [vmem:[%s8470_s1 + $0x150] ss:$8 sps:$4 sm:$0xff]  }
  0x3d   : > { %930 = vmatpush2.bf16.msra.mxu0 %v6063_v12  ;;  %1071 = vmatmul.mubr.bf16.gmra.mxu1 %v579_v23  ;;  %v6092_v12 = vld [vmem:[%s8470_s1 + $0xe0] ss:$8 sps:$4 sm:$0xff]  }
  0x3e   : > { %931 = vmatprep.subr.bf16.mxu0 %v6064_v15  ;;  %1380 = vmatpush1.bf16.msra.mxu1 %v6060_v24  ;;  %v587_v15 = vrot.slane %v549_v9, 1  ;;  %v6104_v24 = vld [vmem:[%s8470_s1 + $0xc4] ss:$8 sps:$4 sm:$0xff]  }
  0x3f   : > { %1080 = vmatprep.mubr.bf16.mxu1 %v6428_v2  ;;  %1381 = vmatprep.subr.bf16.mxu1 %v6068_v27  ;;  %v546_v27 = vshrl.u32 %v6769_v62, 16 }
  0x40   : > { %v588_v23 = vsel %vm339_vm0, %v586_v8, %v587_v15  ;;  %v6121_v8 = vld [vmem:[%s8470_s1 + $0x80] ss:$8 sps:$4 sm:$0xff]  }
  0x41   : > { %932 = vmatpush2.bf16.msra.mxu0 %v6069_v21  ;;  %v557_v21 = vshll.u32 %v6797_v11, 16  ;;  %v589_v35 = vor.u32 %v587_v15, %v546_v27 }
  0x42   : > { %933 = vmatprep.subr.bf16.mxu0 %v6070_v28  ;;  %1382 = vmatpush1.bf16.msra.mxu1 %v6066_v31  ;;  %v520_v28 = vsel %vm264_vm1, %v508_v57, %v519_v19  ;;  %v6848_v31 = vrot.slane %v522_v25, 7  ;;  %v6133_v25 = vld [vmem:[%s8470_s1 + $0x124] ss:$8 sps:$4 sm:$0xff]   ;;  %v6135_v57 = vld [vmem:[%s8470_s1 + $0x110] ss:$8 sps:$4 sm:$0xff]  }
  0x43   : > { %1383 = vmatprep.subr.bf16.mxu1 %v6075_v38  ;;  %v590_v29 = vrot.slane %v557_v21, 1 }
  0x45   : > { %934 = vmatpush2.bf16.msra.mxu0 %v6076_v32  ;;  %1081 = vmatmul.mubr.bf16.gmra.mxu1 %v582_v48  ;;  %v5079_v32 = vcombine.low %v6587_v39, %v6587_v39  ;;  %v527_v39 = vor.u32 %v525_v10, %v6848_v31  ;;  %v6881_v48 = vld [vmem:[#allocation2 + $0x3c] sm:$0xf] }
  0x46   : > { %935 = vmatprep.subr.bf16.mxu0 %v6077_v36  ;;  %1384 = vmatpush1.bf16.msra.mxu1 %v6073_v43  ;;  %v203_v36 = vld [vmem:[#allocation2 + $0x4] sm:$0xf]  ;;  %v6131_v43 = vld [vmem:[%s8470_s1 + $0x120] ss:$8 sps:$4 sm:$0xff]  }
  0x47   : > { %1090 = vmatprep.mubr.bf16.mxu1 %v6428_v2  ;;  %1385 = vmatprep.subr.bf16.mxu1 %v6081_v49  ;;  %v603_v38 = vshll.u32 %v5079_v32, 16  ;;  %v6879_v10 = vcombine.low %v6852_v33, %v203_v36  ;;  %v6137_v49 = vld [vmem:[%s8470_s1 + $0x114] ss:$8 sps:$4 sm:$0xff]   ;;  %v6152_v36 = vld [vmem:[%s8470_s1 + $0x350] ss:$8 sps:$4 sm:$0xff]  }
  0x48   : > { %v6980_v32 = vld [vmem:[#allocation2 + $0x18] sm:$0xff]  }
  0x49   : > { %936 = vmatpush2.bf16.msra.mxu0 %v6082_v44  ;;  %v591_v44 = vsel %vm339_vm0, %v589_v35, %v590_v29  ;;  %v605_v60 = vrot.slane %v603_v38, 1  ;;  %v266_v61 = vshrl.u32 %v6879_v10, 16 }
  0x4a   : > { %1484 = vmatprep.subr.bf16.mxu0 %v6091_v41  ;;  %1386 = vmatpush1.bf16.msra.mxu1 %v6079_v45  ;;  %v6111_v41 = vld [vmem:[%s8470_s1 + $0xa0] ss:$8 sps:$4 sm:$0xff]   ;;  %v528_v45 = vsel %vm264_vm1, %v6794_v42, %v527_v39  ;;  %v269_v42 = vshll.u32 %v6879_v10, 16  ;;  %v289_v39 = vshrl.u32 %v6980_v32, 16 }
  0x4b   : > { %1387 = vmatprep.subr.bf16.mxu1 %v6088_v54  ;;  %v5060_v54 = vcombine.low %v6881_v48, %v6881_v48 }
  0x4c   : > { %938 = vmatmul.mubr.bf16.vlgmr.msra.gmra.mxu0 %v569_v56  ;;  %v532_v56 = vrot.slane %v530_v51, 7  ;;  %v6141_v51 = vld [vmem:[%s8470_s1 + $0x104] ss:$8 sps:$4 sm:$0xff]  }
  0x4d   : > { %1485 = vmatpush1.bf16.msra.mxu0 %v6089_v55  ;;  %947 = vmatprep.mubr.bf16.mxu0 %v6589_v40  ;;  %v6110_v40 = vld [vmem:[%s8470_s1 + $0x154] ss:$8 sps:$4 sm:$0xff]  }
  0x4e   : > { %1486 = vmatprep.subr.bf16.mxu0 %v6101_v59  ;;  %1091 = vmatmul.mubr.bf16.gmra.mxu1 %v585_v5  ;;  %v535_v3 = vor.u32 %v533_v26, %v532_v56  ;;  %v6139_v5 = vld [vmem:[%s8470_s1 + $0x100] ss:$8 sps:$4 sm:$0xff]  }
  0x4f   : > { %1388 = vmatpush2.bf16.msra.mxu1 %v6086_v63  ;;  %1100 = vmatprep.mubr.bf16.mxu1 %v6428_v2  ;;  %v6117_v63 = vld [vmem:[%s8470_s1 + $0x94] ss:$8 sps:$4 sm:$0xff]  }
  0x50   : > { %1389 = vmatprep.subr.bf16.mxu1 %v6094_v6  ;;  %v536_v26 = vsel %vm264_vm1, %v6848_v31, %v535_v3  ;;  %v6154_v31 = vld [vmem:[%s8470_s1 + $0x354] ss:$8 sps:$4 sm:$0xff]  }
  0x51   : > { %1487 = vmatpush1.bf16.msra.mxu0 %v6099_v1  ;;  %v6123_v1 = vld [vmem:[%s8470_s1 + $0x84] ss:$8 sps:$4 sm:$0xff]  }
  0x52   : > { %1488 = vmatprep.subr.bf16.mxu0 %v6110_v40  ;;  %v268_v40 = vrot.slane %v266_v61, 7 }
  0x53   : > { %1390 = vmatpush2.bf16.msra.mxu1 %v6092_v12  ;;  %v222_v12 = vshrl.u32 %v5060_v54, 16  ;;  %v6166_v54 = vld [vmem:[%s8470_s1 + $0x320] ss:$8 sps:$4 sm:$0xff]  }
  0x54   : > { %948 = vmatmul.mubr.bf16.gmra.mxu0 %v512_v13  ;;  %1391 = vmatprep.subr.bf16.mxu1 %v6098_v17  ;;  %v6931_v13 = vld [vmem:[#allocation2 + $0x8] sm:$0xff]  }
  0x55   : > { %957 = vmatprep.mubr.bf16.mxu0 %v6617_v53  ;;  %1489 = vmatpush1.bf16.msra.mxu0 %v6108_v14  ;;  %v6129_v53 = vld [vmem:[%s8470_s1 + $0x134] ss:$8 sps:$4 sm:$0xff]   ;;  %v540_v14 = vrot.slane %v538_v7, 7  ;;  %v224_v15 = vrot.slane %v222_v12, 3  ;;  %v273_v17 = vshrl.u32 %v6931_v13, 16 }
  0x56   : > { %1490 = vmatprep.subr.bf16.mxu0 %v6120_v16  ;;  %1101 = vmatmul.mubr.bf16.gmra.mxu1 %v588_v23  ;;  %v271_v16 = vor.u32 %v269_v42, %v268_v40  ;;  %v276_v23 = vshll.u32 %v6931_v13, 16  ;;  %v6149_v12 = vld [vmem:[%s8470_s1 + $0x470] ss:$8 sps:$4 sm:$0xff]  }
  0x57   : > { %1392 = vmatpush2.bf16.msra.mxu1 %v6096_v18  ;;  %1110 = vmatprep.mubr.bf16.mxu1 %v6428_v2  ;;  %v6144_v18 = vld [vmem:[%s8470_s1 + $0x374] ss:$8 sps:$4 sm:$0xff]   ;;  %v543_v7 = vor.u32 %v541_v52, %v540_v14 }
  0x58   : > { %1393 = vmatprep.subr.bf16.mxu1 %v6104_v24  ;;  %v338_v19 = vsel %vm6742_vm3, %v224_v15, %v271_v16  ;;  %v6958_v24 = vld [vmem:[#allocation2 + $0x10] sm:$0xff]   ;;  %v342_v3 = vrot.slane %v276_v23, 1  ;;  %v6159_v15 = vld [vmem:[%s8470_s1 + $0x460] ss:$8 sps:$4 sm:$0xff]  }
  0x59   : > { %1491 = vmatpush1.bf16.msra.mxu0 %v6118_v22  ;;  %v275_v22 = vrot.slane %v273_v17, 7  ;;  %v544_v52 = vsel %vm264_vm1, %v532_v56, %v543_v7  ;;  %v6162_v56 = vld [vmem:[%s8470_s1 + $0x330] ss:$8 sps:$4 sm:$0xff]   ;;  %v6171_v7 = vld [vmem:[%s8470_s1 + $0x454] ss:$8 sps:$4 sm:$0xff]  }
  0x5a   : > { %1492 = vmatprep.subr.bf16.mxu0 %v6129_v53  ;;  %v6142_v53 = vld [vmem:[%s8470_s1 + $0x370] ss:$8 sps:$4 sm:$0xff]  }
  0x5b   : > { %1394 = vmatpush2.bf16.msra.mxu1 %v6102_v58  ;;  %v548_v58 = vrot.slane %v546_v27, 7 }
  0x5c   : > { %958 = vmatmul.mubr.bf16.gmra.mxu0 %v520_v28  ;;  %1395 = vmatprep.subr.bf16.mxu1 %v6107_v30  ;;  %v278_v28 = vor.u32 %v276_v23, %v275_v22  ;;  %v6146_v30 = vld [vmem:[%s8470_s1 + $0x360] ss:$8 sps:$4 sm:$0xff]   ;;  %v6182_v23 = vld [vmem:[%s8470_s1 + $0x3f0] ss:$8 sps:$4 sm:$0xff]  }
  0x5d   : > { %967 = vmatprep.mubr.bf16.mxu0 %v6649_v4  ;;  %1493 = vmatpush1.bf16.msra.mxu0 %v6127_v34  ;;  %v554_v4 = vshrl.u32 %v6797_v11, 16  ;;  %v551_v27 = vor.u32 %v549_v9, %v548_v58 }
  0x5e   : > { %1494 = vmatprep.subr.bf16.mxu0 %v6133_v25  ;;  %1111 = vmatmul.mubr.bf16.gmra.mxu1 %v591_v44  ;;  %v279_v34 = vsel %vm264_vm1, %v268_v40, %v278_v28  ;;  %v284_v25 = vshll.u32 %v6958_v24, 16  ;;  %v6156_v44 = vld [vmem:[%s8470_s1 + $0x340] ss:$8 sps:$4 sm:$0xff]  }
  0x5f   : > { %1396 = vmatpush2.bf16.msra.mxu1 %v6105_v46  ;;  %1120 = vmatprep.mubr.bf16.mxu1 %v6428_v2  ;;  %v592_v59 = vor.u32 %v590_v29, %v554_v4  ;;  %v281_v29 = vshrl.u32 %v6958_v24, 16  ;;  %v552_v9 = vsel %vm264_vm1, %v540_v14, %v551_v27  ;;  %v556_v38 = vrot.slane %v554_v4, 7  ;;  %v6164_v46 = vld [vmem:[%s8470_s1 + $0x334] ss:$8 sps:$4 sm:$0xff]  }
  0x60   : > { %1397 = vmatprep.subr.bf16.mxu1 %v6113_v47  ;;  %v291_v4 = vrot.slane %v289_v39, 7  ;;  %v345_v16 = vrot.slane %v284_v25, 1 }
  0x61   : > { %1495 = vmatpush1.bf16.msra.mxu0 %v6131_v43  ;;  %v607_v6 = vsel %vm6893_vm5, %v592_v59, %v605_v60  ;;  %v283_v35 = vrot.slane %v281_v29, 7  ;;  %v559_v47 = vor.u32 %v557_v21, %v556_v38  ;;  %v340_v21 = vrot.slane %v269_v42, 1  ;;  %v6178_v42 = vld [vmem:[%s8470_s1 + $0x304] ss:$8 sps:$4 sm:$0xff]  }
  0x62   : > { %1496 = vmatprep.subr.bf16.mxu0 %v6137_v49  ;;  %v292_v49 = vshll.u32 %v6980_v32, 16 }
  0x63   : > { %1398 = vmatpush2.bf16.msra.mxu1 %v6111_v41  ;;  %v286_v43 = vor.u32 %v284_v25, %v283_v35  ;;  %v7009_v41 = vld [vmem:[#allocation2 + $0x20] sm:$0xff]  }
  0x64   : > { %968 = vmatmul.mubr.bf16.gmra.mxu0 %v528_v45  ;;  %1399 = vmatprep.subr.bf16.mxu1 %v6117_v63  ;;  %v294_v59 = vor.u32 %v292_v49, %v291_v4  ;;  %v297_v60 = vshrl.u32 %v7009_v41, 16  ;;  %v7031_v63 = vld [vmem:[#allocation2 + $0x28] sm:$0xff]   ;;  %v300_v40 = vshll.u32 %v7009_v41, 16  ;;  %v348_v25 = vrot.slane %v292_v49, 1 }
  0x65   : > { %977 = vmatprep.mubr.bf16.mxu0 %v6684_v20  ;;  %1497 = vmatpush1.bf16.msra.mxu0 %v6135_v57  ;;  %v6151_v20 = vld [vmem:[%s8470_s1 + $0x474] ss:$8 sps:$4 sm:$0xff]   ;;  %v287_v45 = vsel %vm264_vm1, %v275_v22, %v286_v43  ;;  %v560_v57 = vsel %vm264_vm1, %v548_v58, %v559_v47  ;;  %v344_v22 = vor.u32 %v342_v3, %v273_v17  ;;  %v216_v17 = vld [vmem:[#allocation2 + $0x38] sm:$0xf]  ;;  %v6181_v58 = vld [vmem:[%s8470_s1 + $0x444] ss:$8 sps:$4 sm:$0xff]  }
  0x66   : > { %1498 = vmatprep.subr.bf16.mxu0 %v6141_v51  ;;  %1121 = vmatmul.mubr.bf16.gmra.mxu1 %v607_v6  ;;  %v6174_v51 = vld [vmem:[%s8470_s1 + $0x314] ss:$8 sps:$4 sm:$0xff]   ;;  %v299_v6 = vrot.slane %v297_v60, 7  ;;  %v7114_v38 = vcombine.low %v216_v17, %v6881_v48  ;;  %v6191_v43 = vld [vmem:[%s8470_s1 + $0x3d0] ss:$8 sps:$4 sm:$0xff]  }
  0x67   : > { %1400 = vmatpush2.bf16.msra.mxu1 %v6115_v0  ;;  %1403 = vmatprep.mubr.bf16.mxu1 %v6879_v10  ;;  %v6172_v0 = vld [vmem:[%s8470_s1 + $0x310] ss:$8 sps:$4 sm:$0xff]   ;;  %v6161_v10 = vld [vmem:[%s8470_s1 + $0x464] ss:$8 sps:$4 sm:$0xff]   ;;  %v346_v28 = vsel %vm339_vm0, %v344_v22, %v345_v16  ;;  %v6194_v49 = vld [vmem:[%s8470_s1 + $0x3c0] ss:$8 sps:$4 sm:$0xff]  }
  0x68   : > { %1401 = vmatprep.subr.bf16.mxu1 %v6123_v1  ;;  %v341_v1 = vor.u32 %v340_v21, %v266_v61  ;;  %v6176_v61 = vld [vmem:[%s8470_s1 + $0x300] ss:$8 sps:$4 sm:$0xff]   ;;  %v302_v14 = vor.u32 %v300_v40, %v299_v6  ;;  %v6196_v47 = vld [vmem:[%s8470_s1 + $0x3c4] ss:$8 sps:$4 sm:$0xff]   ;;  %v6188_v48 = vld [vmem:[%s8470_s1 + $0x430] ss:$8 sps:$4 sm:$0xff]  }
  0x69   : > { %1499 = vmatpush1.bf16.msra.mxu0 %v6139_v5  ;;  %v295_v5 = vsel %vm264_vm1, %v283_v35, %v294_v59  ;;  %v6179_v35 = vld [vmem:[%s8470_s1 + $0x440] ss:$8 sps:$4 sm:$0xff]   ;;  %v1599_v21 = vld [vmem:[#allocation2 + $0x14] sm:$0xf]  ;;  %v6209_v22 = vld [vmem:[%s8470_s1 + $0x390] ss:$8 sps:$4 sm:$0xff]  }
  0x6a   : > { %2180 = vmatprep.subr.bf16.mxu0 %v6151_v20  ;;  %v343_v20 = vsel %vm339_vm0, %v341_v1, %v342_v3  ;;  %v6208_v59 = vld [vmem:[%s8470_s1 + $0x414] ss:$8 sps:$4 sm:$0xff]  }
  0x6b   : > { %1402 = vmatpush2.bf16.msra.mxu1 %v6121_v8  ;;  %v305_v8 = vshrl.u32 %v7031_v63, 16 }
  0x6c   : > { %978 = vmatmul.mubr.bf16.gmra.mxu0 %v536_v26  ;;  %2067 = vmatprep.subr.bf16.mxu1 %v6144_v18  ;;  %v6184_v26 = vld [vmem:[%s8470_s1 + $0x3f4] ss:$8 sps:$4 sm:$0xff]  }
  0x6d   : > { %987 = vmatprep.mubr.bf16.mxu0 %v6722_v37  ;;  %v6148_v37 = vld [vmem:[%s8470_s1 + $0x364] ss:$8 sps:$4 sm:$0xff]   ;;  %v7066_v18 = vld [vmem:[#allocation2 + $0x30] sm:$0xff]  }
  0x6e   : > { %1404 = vmatmul.mubr.bf16.vlgmr.msra.gmra.mxu1 %v338_v19  ;;  %v308_v19 = vshll.u32 %v7031_v63, 16  ;;  %v313_v27 = vshrl.u32 %v7066_v18, 16 }
  0x6f   : > { %1413 = vmatprep.mubr.bf16.mxu1 %v6931_v13  ;;  %2068 = vmatpush1.bf16.msra.mxu1 %v6142_v53  ;;  %v303_v53 = vsel %vm264_vm1, %v291_v4, %v302_v14  ;;  %v6187_v13 = vld [vmem:[%s8470_s1 + $0x3e4] ss:$8 sps:$4 sm:$0xff]   ;;  %v321_v4 = vshrl.u32 %v7114_v38, 16 }
  0x70   : > { %2069 = vmatprep.subr.bf16.mxu1 %v6148_v37  ;;  %v307_v37 = vrot.slane %v305_v8, 7 }
  0x71   : > { %v323_v3 = vrot.slane %v321_v4, 7 }
  0x73   : > { %2070 = vmatpush1.bf16.msra.mxu1 %v6146_v30  ;;  %v6185_v30 = vld [vmem:[%s8470_s1 + $0x3e0] ss:$8 sps:$4 sm:$0xff]  }
  0x74   : > { %988 = vmatmul.mubr.bf16.gmra.mxu0 %v544_v52  ;;  %2071 = vmatprep.subr.bf16.mxu1 %v6154_v31  ;;  %v6169_v52 = vld [vmem:[%s8470_s1 + $0x450] ss:$8 sps:$4 sm:$0xff]   ;;  %v310_v31 = vor.u32 %v308_v19, %v307_v37 }
  0x75   : > { %997 = vmatprep.mubr.bf16.mxu0 %v6769_v62  ;;  %v6158_v62 = vld [vmem:[%s8470_s1 + $0x344] ss:$8 sps:$4 sm:$0xff]  }
  0x76   : > { %1414 = vmatmul.mubr.bf16.gmra.mxu1 %v279_v34  ;;  %v6193_v34 = vld [vmem:[%s8470_s1 + $0x3d4] ss:$8 sps:$4 sm:$0xff]  }
  0x77   : > { %1423 = vmatprep.mubr.bf16.mxu1 %v6958_v24  ;;  %2072 = vmatpush1.bf16.msra.mxu1 %v6152_v36  ;;  %v6190_v36 = vld [vmem:[%s8470_s1 + $0x434] ss:$8 sps:$4 sm:$0xff]   ;;  %v6199_v24 = vld [vmem:[%s8470_s1 + $0x424] ss:$8 sps:$4 sm:$0xff]  }
  0x78   : > { %2073 = vmatprep.subr.bf16.mxu1 %v6158_v62  ;;  %v316_v62 = vshll.u32 %v7066_v18, 16 }
  0x7b   : > { %2074 = vmatpush1.bf16.msra.mxu1 %v6156_v44  ;;  %v311_v44 = vsel %vm264_vm1, %v299_v6, %v310_v31  ;;  %v6206_v6 = vld [vmem:[%s8470_s1 + $0x410] ss:$8 sps:$4 sm:$0xff]   ;;  %v357_v31 = vrot.slane %v316_v62, 1 }
  0x7c   : > { %998 = vmatmul.mubr.bf16.gmra.mxu0 %v552_v9  ;;  %2075 = vmatprep.subr.bf16.mxu1 %v6164_v46  ;;  %v347_v9 = vor.u32 %v345_v16, %v281_v29  ;;  %v315_v46 = vrot.slane %v313_v27, 7 }
  0x7d   : > { %1007 = vmatprep.mubr.bf16.mxu0 %v6797_v11  ;;  %v6168_v11 = vld [vmem:[%s8470_s1 + $0x324] ss:$8 sps:$4 sm:$0xff]   ;;  %v359_v50 = vor.u32 %v357_v31, %v313_v27 }
  0x7e   : > { %1424 = vmatmul.mubr.bf16.gmra.mxu1 %v287_v45  ;;  %v349_v29 = vsel %vm339_vm0, %v347_v9, %v348_v25  ;;  %v318_v45 = vor.u32 %v316_v62, %v315_v46 }
  0x7f   : > { %1433 = vmatprep.mubr.bf16.mxu1 %v6980_v32  ;;  %2076 = vmatpush1.bf16.msra.mxu1 %v6162_v56  ;;  %v6202_v56 = vld [vmem:[%s8470_s1 + $0x3b4] ss:$8 sps:$4 sm:$0xff]   ;;  %v6205_v32 = vld [vmem:[%s8470_s1 + $0x3a4] ss:$8 sps:$4 sm:$0xff]  }
  0x80   : > { %2077 = vmatprep.subr.bf16.mxu1 %v6168_v11  ;;  %v7142_v11 = vld [vmem:[#allocation2 + $0x10] sm:$0xf]  ;;  %v319_v1 = vsel %vm264_vm1, %v307_v37, %v318_v45 }
  0x81   : > { %v7247_v45 = vld [vmem:[#allocation2 + $0x30] sm:$0xff]  }
  0x83   : > { %2078 = vmatpush1.bf16.msra.mxu1 %v6166_v54  ;;  %v350_v54 = vor.u32 %v348_v25, %v289_v39  ;;  %v7165_v39 = vld [vmem:[#allocation2 + $0x4c] sm:$0xf] }
  0x84   : > { %1008 = vmatmul.mubr.bf16.gmra.mxu0 %v560_v57  ;;  %2079 = vmatprep.subr.bf16.mxu1 %v6174_v51  ;;  %v6197_v57 = vld [vmem:[%s8470_s1 + $0x420] ss:$8 sps:$4 sm:$0xff]   ;;  %v351_v51 = vrot.slane %v300_v40, 1  ;;  %v7171_v40 = vcombine.low %v7142_v11, %v1599_v21 }
  0x85   : > { %1516 = vmatprep.mubr.bf16.mxu0 %v6428_v2 }
  0x86   : > { %1434 = vmatmul.mubr.bf16.gmra.mxu1 %v295_v5  ;;  %v324_v5 = vshll.u32 %v7114_v38, 16  ;;  %v1661_v14 = vshrl.u32 %v7171_v40, 16  ;;  %v353_v16 = vor.u32 %v351_v51, %v297_v60 }
  0x87   : > { %1443 = vmatprep.mubr.bf16.mxu1 %v7009_v41  ;;  %2080 = vmatpush1.bf16.msra.mxu1 %v6172_v0  ;;  %v6200_v0 = vld [vmem:[%s8470_s1 + $0x3b0] ss:$8 sps:$4 sm:$0xff]  }
  0x88   : > { %2081 = vmatprep.subr.bf16.mxu1 %v6178_v42  ;;  %v6217_v42 = vld [vmem:[%s8470_s1 + $0x404] ss:$8 sps:$4 sm:$0xff]   ;;  %v1663_v41 = vrot.slane %v1661_v14, 7  ;;  %v360_v62 = vrot.slane %v324_v5, 1 }
  0x8b   : > { %2082 = vmatpush1.bf16.msra.mxu1 %v6176_v61  ;;  %v326_v61 = vor.u32 %v324_v5, %v323_v3  ;;  %v7263_v5 = vld [vmem:[#allocation2 + $0x38] sm:$0xff]  }
  0x8c   : > { %1517 = vmatmul.mubr.bf16.vlgmr.msra.gmra.mxu0 %v343_v20  ;;  %2083 = vmatprep.subr.bf16.mxu1 %v6184_v26  ;;  %v6211_v20 = vld [vmem:[%s8470_s1 + $0x394] ss:$8 sps:$4 sm:$0xff]   ;;  %v6215_v26 = vld [vmem:[%s8470_s1 + $0x400] ss:$8 sps:$4 sm:$0xff]  }
  0x8d   : > { %2181 = vmatpush1.bf16.msra.mxu0 %v6149_v12  ;;  %1526 = vmatprep.mubr.bf16.mxu0 %v6428_v2  ;;  %v352_v12 = vsel %vm339_vm0, %v350_v54, %v351_v51  ;;  %v327_v37 = vsel %vm264_vm1, %v315_v46, %v326_v61  ;;  %v6230_v61 = vld [vmem:[%s8471_s2 + $0xac] ss:$12 sps:$4 sm:$0xff]  }
  0x8e   : > { %2182 = vmatprep.subr.bf16.mxu0 %v6161_v10  ;;  %1444 = vmatmul.mubr.bf16.gmra.mxu1 %v303_v53  ;;  %v6203_v10 = vld [vmem:[%s8470_s1 + $0x3a0] ss:$8 sps:$4 sm:$0xff]   ;;  %v7201_v53 = vld [vmem:[#allocation2 + $0x18] sm:$0xff]  }
  0x8f   : > { %1453 = vmatprep.mubr.bf16.mxu1 %v7031_v63  ;;  %2084 = vmatpush2.bf16.msra.mxu1 %v6182_v23  ;;  %v1664_v23 = vshll.u32 %v7171_v40, 16  ;;  %v1671_v9 = vshll.u32 %v7201_v53, 16 }
  0x90   : > { %2085 = vmatprep.subr.bf16.mxu1 %v6187_v13  ;;  %v6212_v13 = vld [vmem:[%s8470_s1 + $0x380] ss:$8 sps:$4 sm:$0xff]  }
  0x91   : > { %2183 = vmatpush1.bf16.msra.mxu0 %v6159_v15  ;;  %v5224_v15 = vcombine.low %v7165_v39, %v7165_v39 }
  0x92   : > { %2184 = vmatprep.subr.bf16.mxu0 %v6171_v7  ;;  %v354_v7 = vrot.slane %v308_v19, 1 }
  0x93   : > { %2086 = vmatpush2.bf16.msra.mxu1 %v6185_v30  ;;  %v1618_v60 = vshrl.u32 %v5224_v15, 16  ;;  %v6228_v15 = vld [vmem:[%s8471_s2 + $0xa8] ss:$12 sps:$4 sm:$0xff]  }
  0x94   : > { %1527 = vmatmul.mubr.bf16.gmra.mxu0 %v346_v28  ;;  %2087 = vmatprep.subr.bf16.mxu1 %v6193_v34  ;;  %v355_v19 = vsel %vm339_vm0, %v353_v16, %v354_v7  ;;  %v1668_v28 = vshrl.u32 %v7201_v53, 16  ;;  %v356_v30 = vor.u32 %v354_v7, %v305_v8  ;;  %v7220_v34 = vld [vmem:[#allocation2 + $0x20] sm:$0xff]   ;;  %v5069_v8 = vcombine.low %v6852_v33, %v6852_v33 }
  0x95   : > { %1536 = vmatprep.mubr.bf16.mxu0 %v6428_v2  ;;  %2185 = vmatpush1.bf16.msra.mxu0 %v6169_v52  ;;  %v6214_v52 = vld [vmem:[%s8470_s1 + $0x384] ss:$8 sps:$4 sm:$0xff]   ;;  %v1620_v17 = vrot.slane %v1618_v60, 3  ;;  %v1676_v63 = vshrl.u32 %v7220_v34, 16  ;;  %v1679_v33 = vshll.u32 %v7220_v34, 16  ;;  %v1703_v7 = vshll.u32 %v7263_v5, 16 }
  0x96   : > { %2186 = vmatprep.subr.bf16.mxu0 %v6181_v58  ;;  %1454 = vmatmul.mubr.bf16.gmra.mxu1 %v311_v44  ;;  %v1666_v58 = vor.u32 %v1664_v23, %v1663_v41  ;;  %v1670_v25 = vrot.slane %v1668_v28, 7  ;;  %v7235_v44 = vld [vmem:[#allocation2 + $0x28] sm:$0xff]  }
  0x97   : > { %1463 = vmatprep.mubr.bf16.mxu1 %v7066_v18  ;;  %2088 = vmatpush2.bf16.msra.mxu1 %v6191_v43  ;;  %v1684_v27 = vshrl.u32 %v7235_v44, 16  ;;  %v1687_v54 = vshll.u32 %v7235_v44, 16  ;;  %v1612_v60 = vld [vmem:[#allocation2 + $0x48] sm:$0xf] }
  0x98   : > { %2089 = vmatprep.subr.bf16.mxu1 %v6196_v47  ;;  %v1673_v43 = vor.u32 %v1671_v9, %v1670_v25  ;;  %v1678_v47 = vrot.slane %v1676_v63, 7 }
  0x99   : > { %2187 = vmatpush1.bf16.msra.mxu0 %v6179_v35  ;;  %v1731_v35 = vsel %vm6742_vm3, %v1620_v17, %v1666_v58  ;;  %v1686_v21 = vrot.slane %v1684_v27, 7  ;;  %v6234_v58 = vld [vmem:[%s8471_s2 + $0x78] ss:$12 sps:$4 sm:$0xff]  }
  0x9a   : > { %2188 = vmatprep.subr.bf16.mxu0 %v6190_v36  ;;  %v358_v36 = vsel %vm339_vm0, %v356_v30, %v357_v31  ;;  %v1674_v46 = vsel %vm264_vm1, %v1663_v41, %v1673_v43  ;;  %v1681_v18 = vor.u32 %v1679_v33, %v1678_v47  ;;  %v1740_v41 = vrot.slane %v1687_v54, 1  ;;  %v6242_v43 = vld [vmem:[%s8471_s2 + $0x4c] ss:$12 sps:$4 sm:$0xff]  }
  0x9b   : > { %2090 = vmatpush2.bf16.msra.mxu1 %v6194_v49  ;;  %v1689_v51 = vor.u32 %v1687_v54, %v1686_v21  ;;  %v7306_v31 = vcombine.low %v1612_v60, %v7165_v39  ;;  %v6254_v54 = vld [vmem:[%s8471_s2 + $0x16c] ss:$12 sps:$4 sm:$0xff]   ;;  %v6270_v60 = vld [vmem:[%s8471_s2 + $0x108] ss:$12 sps:$4 sm:$0xff]  }
  0x9c   : > { %1537 = vmatmul.mubr.bf16.gmra.mxu0 %v349_v29  ;;  %2091 = vmatprep.subr.bf16.mxu1 %v6202_v56  ;;  %v362_v29 = vor.u32 %v360_v62, %v321_v4  ;;  %v1682_v56 = vsel %vm264_vm1, %v1670_v25, %v1681_v18  ;;  %v1742_v39 = vor.u32 %v1740_v41, %v1684_v27  ;;  %v6248_v18 = vld [vmem:[%s8471_s2 + $0x1c] ss:$12 sps:$4 sm:$0xff]  }
  0x9d   : > { %1546 = vmatprep.mubr.bf16.mxu0 %v6428_v2  ;;  %2189 = vmatpush1.bf16.msra.mxu0 %v6188_v48  ;;  %v373_v48 = vshll.u32 %v5069_v8, 16  ;;  %v1716_v25 = vshrl.u32 %v7306_v31, 16 }
  0x9e   : > { %2190 = vmatprep.subr.bf16.mxu0 %v6199_v24  ;;  %1464 = vmatmul.mubr.bf16.gmra.mxu1 %v319_v1  ;;  %v361_v24 = vsel %vm339_vm0, %v359_v50, %v360_v62  ;;  %v1690_v1 = vsel %vm264_vm1, %v1678_v47, %v1689_v51  ;;  %v6240_v50 = vld [vmem:[%s8471_s2 + $0x48] ss:$12 sps:$4 sm:$0xff]  }
  0x9f   : > { %1473 = vmatprep.mubr.bf16.mxu1 %v7114_v38  ;;  %2092 = vmatpush2.bf16.msra.mxu1 %v6200_v0  ;;  %v375_v49 = vrot.slane %v373_v48, 1  ;;  %v1692_v38 = vshrl.u32 %v7247_v45, 16  ;;  %v1734_v0 = vrot.slane %v1671_v9, 1  ;;  %v1718_v8 = vrot.slane %v1716_v25, 7  ;;  %v6243_v48 = vld [vmem:[%s8471_s2 + $0x30] ss:$12 sps:$4 sm:$0xff]  }
  0xa0   : > { %2093 = vmatprep.subr.bf16.mxu1 %v6205_v32  ;;  %v6257_v51 = vld [vmem:[%s8471_s2 + $0x154] ss:$12 sps:$4 sm:$0xff]  }
  0xa1   : > { %2191 = vmatpush1.bf16.msra.mxu0 %v6197_v57  ;;  %v1732_v57 = vrot.slane %v1664_v23, 1  ;;  %v1694_v3 = vrot.slane %v1692_v38, 7 }
  0xa2   : > { %2192 = vmatprep.subr.bf16.mxu0 %v6208_v59  ;;  %v379_v59 = vsel %vm6893_vm5, %v362_v29, %v375_v49  ;;  %v6246_v29 = vld [vmem:[%s8471_s2 + $0x18] ss:$12 sps:$4 sm:$0xff]  }
  0xa3   : > { %2094 = vmatpush2.bf16.msra.mxu1 %v6203_v10  ;;  %v1733_v4 = vor.u32 %v1732_v57, %v1661_v14  ;;  %v1737_v10 = vrot.slane %v1679_v33, 1  ;;  %v7276_v14 = vld [vmem:[#allocation2 + $0x40] sm:$0xff]   ;;  %v1746_v33 = vrot.slane %v1703_v7, 1 }
  0xa4   : > { %1547 = vmatmul.mubr.bf16.gmra.mxu0 %v352_v12  ;;  %2095 = vmatprep.subr.bf16.mxu1 %v6211_v20  ;;  %v1700_v12 = vshrl.u32 %v7263_v5, 16  ;;  %v1711_v30 = vshll.u32 %v7276_v14, 16 }
  0xa5   : > { %1556 = vmatprep.mubr.bf16.mxu0 %v6428_v2  ;;  %2193 = vmatpush1.bf16.msra.mxu0 %v6206_v6  ;;  %v1735_v32 = vsel %vm339_vm0, %v1733_v4, %v1734_v0  ;;  %v1695_v6 = vshll.u32 %v7247_v45, 16 }
  0xa6   : > { %2194 = vmatprep.subr.bf16.mxu0 %v6217_v42  ;;  %1474 = vmatmul.mubr.bf16.gmra.mxu1 %v327_v37  ;;  %v6231_v37 = vld [vmem:[%s8471_s2 + $0x90] ss:$12 sps:$4 sm:$0xff]   ;;  %v1749_v57 = vrot.slane %v1711_v30, 1 }
  0xa7   : > { %2099 = vmatprep.mubr.bf16.mxu1 %v7171_v40  ;;  %2096 = vmatpush2.bf16.msra.mxu1 %v6209_v22  ;;  %v1697_v42 = vor.u32 %v1695_v6, %v1694_v3  ;;  %v1736_v40 = vor.u32 %v1734_v0, %v1668_v28  ;;  %v6233_v22 = vld [vmem:[%s8471_s2 + $0x94] ss:$12 sps:$4 sm:$0xff]   ;;  %v1743_v9 = vrot.slane %v1695_v6, 1  ;;  %v6255_v0 = vld [vmem:[%s8471_s2 + $0x150] ss:$12 sps:$4 sm:$0xff]  }
  0xa8   : > { %2097 = vmatprep.subr.bf16.mxu1 %v6214_v52  ;;  %v1739_v52 = vor.u32 %v1737_v10, %v1676_v63 }
  0xa9   : > { %2195 = vmatpush1.bf16.msra.mxu0 %v6215_v26  ;;  %v1698_v20 = vsel %vm264_vm1, %v1686_v21, %v1697_v42  ;;  %v1702_v26 = vrot.slane %v1700_v12, 7  ;;  %v1738_v16 = vsel %vm339_vm0, %v1736_v40, %v1737_v10  ;;  %v1744_v62 = vsel %vm339_vm0, %v1742_v39, %v1743_v9  ;;  %v6260_v40 = vld [vmem:[%s8471_s2 + $0x138] ss:$12 sps:$4 sm:$0xff]   ;;  %v6262_v10 = vld [vmem:[%s8471_s2 + $0x13c] ss:$12 sps:$4 sm:$0xff]  }
  0xaa   : > { %v1741_v28 = vsel %vm339_vm0, %v1739_v52, %v1740_v41  ;;  %v1748_v21 = vor.u32 %v1746_v33, %v1700_v12  ;;  %v6280_v39 = vld [vmem:[%s8471_s2 + $0xd8] ss:$12 sps:$4 sm:$0xff]  }
  0xab   : > { %2098 = vmatpush2.bf16.msra.mxu1 %v6212_v13  ;;  %v1705_v23 = vor.u32 %v1703_v7, %v1702_v26  ;;  %v6265_v7 = vld [vmem:[%s8471_s2 + $0x120] ss:$12 sps:$4 sm:$0xff]  }
  0xac   : > { %1557 = vmatmul.mubr.bf16.gmra.mxu0 %v355_v19  ;;  %2899 = vmatprep.subr.bf16.mxu1 %v6230_v61  ;;  %v6236_v19 = vld [vmem:[%s8471_s2 + $0x7c] ss:$12 sps:$4 sm:$0xff]   ;;  %v1750_v4 = vsel %vm339_vm0, %v1748_v21, %v1749_v57 }
  0xad   : > { %1566 = vmatprep.mubr.bf16.mxu0 %v6428_v2  ;;  %v1706_v13 = vsel %vm264_vm1, %v1694_v3, %v1705_v23  ;;  %v6259_v3 = vld [vmem:[%s8471_s2 + $0xb0] ss:$12 sps:$4 sm:$0xff]   ;;  %v6269_v23 = vld [vmem:[%s8471_s2 + $0x80] ss:$12 sps:$4 sm:$0xff]  }
  0xae   : > { %2100 = vmatmul.mubr.bf16.vlgmr.msra.gmra.mxu1 %v1731_v35 }
  0xaf   : > { %2109 = vmatprep.mubr.bf16.mxu1 %v7201_v53  ;;  %2900 = vmatpush1.bf16.msra.mxu1 %v6228_v15  ;;  %v1708_v53 = vshrl.u32 %v7276_v14, 16 }
  0xb0   : > { %2901 = vmatprep.subr.bf16.mxu1 %v6233_v22  ;;  %v6268_v22 = vld [vmem:[%s8471_s2 + $0x140] ss:$12 sps:$4 sm:$0xff]  }
  0xb1   : > { %v1710_v17 = vrot.slane %v1708_v53, 7  ;;  %v1751_v42 = vor.u32 %v1749_v57, %v1708_v53 }
  0xb3   : > { %2902 = vmatpush1.bf16.msra.mxu1 %v6231_v37  ;;  %v1713_v35 = vor.u32 %v1711_v30, %v1710_v17 }
  0xb4   : > { %1567 = vmatmul.mubr.bf16.gmra.mxu0 %v358_v36  ;;  %2903 = vmatprep.subr.bf16.mxu1 %v6236_v19  ;;  %v6237_v36 = vld [vmem:[%s8471_s2 + $0x60] ss:$12 sps:$4 sm:$0xff]  }
  0xb5   : > { %1576 = vmatprep.mubr.bf16.mxu0 %v6428_v2  ;;  %v1714_v63 = vsel %vm264_vm1, %v1702_v26, %v1713_v35  ;;  %v6267_v26 = vld [vmem:[%s8471_s2 + $0x124] ss:$12 sps:$4 sm:$0xff]   ;;  %v6272_v19 = vld [vmem:[%s8471_s2 + $0x10c] ss:$12 sps:$4 sm:$0xff]  }
  0xb6   : > { %2110 = vmatmul.mubr.bf16.gmra.mxu1 %v1674_v46  ;;  %v6245_v46 = vld [vmem:[%s8471_s2 + $0x34] ss:$12 sps:$4 sm:$0xff]   ;;  %v6278_v35 = vld [vmem:[%s8471_s2 + $0x110] ss:$12 sps:$4 sm:$0xff]  }
  0xb7   : > { %2119 = vmatprep.mubr.bf16.mxu1 %v7220_v34  ;;  %2904 = vmatpush1.bf16.msra.mxu1 %v6234_v58  ;;  %v6239_v34 = vld [vmem:[%s8471_s2 + $0x64] ss:$12 sps:$4 sm:$0xff]   ;;  %v6274_v58 = vld [vmem:[%s8471_s2 + $0x68] ss:$12 sps:$4 sm:$0xff]  }
  0xb8   : > { %2905 = vmatprep.subr.bf16.mxu1 %v6239_v34  ;;  %v6275_v34 = vld [vmem:[%s8471_s2 + $0xf0] ss:$12 sps:$4 sm:$0xff]  }
  0xbb   : > { %2906 = vmatpush1.bf16.msra.mxu1 %v6237_v36 }
  0xbc   : > { %1577 = vmatmul.mubr.bf16.gmra.mxu0 %v361_v24  ;;  %2907 = vmatprep.subr.bf16.mxu1 %v6242_v43  ;;  %v1745_v24 = vor.u32 %v1743_v9, %v1692_v38  ;;  %v6282_v9 = vld [vmem:[%s8471_s2 + $0xdc] ss:$12 sps:$4 sm:$0xff]  }
  0xbd   : > { %1586 = vmatprep.mubr.bf16.mxu0 %v6428_v2 }
  0xbe   : > { %2120 = vmatmul.mubr.bf16.gmra.mxu1 %v1682_v56  ;;  %v1747_v49 = vsel %vm339_vm0, %v1745_v24, %v1746_v33  ;;  %v6249_v56 = vld [vmem:[%s8471_s2] ss:$12 sps:$4 sm:$0xff]  }
  0xbf   : > { %2129 = vmatprep.mubr.bf16.mxu1 %v7235_v44  ;;  %v1719_v44 = vshll.u32 %v7306_v31, 16  ;;  %2908 = vmatpush1.bf16.msra.mxu1 %v6240_v50  ;;  %v6287_v50 = vld [vmem:[%s8471_s2 + $0xc4] ss:$12 sps:$4 sm:$0xff]  }
  0xc0   : > { %2909 = vmatprep.subr.bf16.mxu1 %v6245_v46  ;;  %v6288_v46 = vld [vmem:[%s8471_s2 + $0xe0] ss:$12 sps:$4 sm:$0xff]  }
  0xc1   : > { %v1721_v47 = vor.u32 %v1719_v44, %v1718_v8  ;;  %v1752_v12 = vrot.slane %v1719_v44, 1  ;;  %v6284_v8 = vld [vmem:[%s8471_s2 + $0x38] ss:$12 sps:$4 sm:$0xff]   ;;  %v6285_v44 = vld [vmem:[%s8471_s2 + $0xc0] ss:$12 sps:$4 sm:$0xff]  }
  0xc3   : > { %2910 = vmatpush1.bf16.msra.mxu1 %v6243_v48  ;;  %v1722_v27 = vsel %vm264_vm1, %v1710_v17, %v1721_v47  ;;  %v1754_v52 = vor.u32 %v1752_v12, %v1716_v25  ;;  %v6273_v17 = vld [vmem:[%s8471_s2 + $0x128] ss:$12 sps:$4 sm:$0xff]   ;;  %v6279_v25 = vld [vmem:[%s8471_s2 + $0x50] ss:$12 sps:$4 sm:$0xff]   ;;  %v7472_v47 = vcombine.high %v6428_v2, %v6428_v2  ;;  %v6289_v48 = vld [vmem:[%s8471_s2 + $0x20] ss:$12 sps:$4 sm:$0xff]  }
  0xc4   : > { %1587 = vmatmul.mubr.bf16.gmra.mxu0 %v379_v59  ;;  %2911 = vmatprep.subr.bf16.mxu1 %v6248_v18  ;;  %v6252_v59 = vld [vmem:[%s8471_s2 + $0x168] ss:$12 sps:$4 sm:$0xff]  }
  0xc5   : > { %2212 = vmatprep.mubr.bf16.mxu0 %v6428_v2 }
  0xc6   : > { %2130 = vmatmul.mubr.bf16.gmra.mxu1 %v1690_v1  ;;  %v6258_v1 = vld [vmem:[%s8471_s2 + $0x170] ss:$12 sps:$4 sm:$0xff]  }
  0xc7   : > { %2139 = vmatprep.mubr.bf16.mxu1 %v7247_v45  ;;  %2912 = vmatpush1.bf16.msra.mxu1 %v6246_v29  ;;  %v6251_v45 = vld [vmem:[%s8471_s2 + $0x4] ss:$12 sps:$4 sm:$0xff]  }
  0xc8   : > { %2913 = vmatprep.subr.bf16.mxu1 %v6251_v45  ;;  %5765 = vmatprep.subr.bf16.mxu0 %v6258_v1 }
  0xcb   : > { %2914 = vmatpush1.bf16.msra.mxu1 %v6249_v56 }
  0xcc   : > { %2213 = vmatmul.mubr.bf16.vlgmr.msra.gmra.mxu0 %v1735_v32  ;;  %2915 = vmatprep.subr.bf16.mxu1 %v6254_v54  ;;  %v5233_v32 = vcombine.low %v7142_v11, %v7142_v11  ;;  %v6263_v11 = vld [vmem:[%s8471_s2 + $0x158] ss:$12 sps:$4 sm:$0xff]  }
  0xcd   : > { %2222 = vmatprep.mubr.bf16.mxu0 %v6428_v2  ;;  %5766 = vmatpush3.bf16.msra.mxu0 %v6259_v3  ;;  %v6294_v3 = vld [vmem:[%s8471_s2 + $0x22c] ss:$12 sps:$4 sm:$0xff]  }
  0xce   : > { %2140 = vmatmul.mubr.bf16.gmra.mxu1 %v1698_v20  ;;  %v6264_v20 = vld [vmem:[%s8471_s2 + $0x98] ss:$12 sps:$4 sm:$0xff]   ;;  %5767 = vmatprep.subr.bf16.mxu0 %v6263_v11  ;;  %v6295_v11 = vld [vmem:[%s8471_s2 + $0x210] ss:$12 sps:$4 sm:$0xff]  }
  0xcf   : > { %2149 = vmatprep.mubr.bf16.mxu1 %v7263_v5  ;;  %2916 = vmatpush2.bf16.msra.mxu1 %v6252_v59  ;;  %v6290_v59 = vld [vmem:[%s8471_s2 + $0xc8] ss:$12 sps:$4 sm:$0xff]  }
  0xd0   : > { %2917 = vmatprep.subr.bf16.mxu1 %v6257_v51  ;;  %v6291_v51 = vld [vmem:[%s8471_s2 + $0x8] ss:$12 sps:$4 sm:$0xff]  }
  0xd1   : > { %5768 = vmatpush3.bf16.msra.mxu0 %v6264_v20 }
  0xd2   : > { %5769 = vmatprep.subr.bf16.mxu0 %v6268_v22  ;;  %v6298_v22 = vld [vmem:[%s8471_s2 + $0x1f8] ss:$12 sps:$4 sm:$0xff]  }
  0xd3   : > { %2918 = vmatpush2.bf16.msra.mxu1 %v6255_v0 }
  0xd4   : > { %2223 = vmatmul.mubr.bf16.gmra.mxu0 %v1738_v16  ;;  %2919 = vmatprep.subr.bf16.mxu1 %v6262_v10  ;;  %v1753_v16 = vsel %vm339_vm0, %v1751_v42, %v1752_v12  ;;  %v6297_v10 = vld [vmem:[%s8471_s2 + $0x214] ss:$12 sps:$4 sm:$0xff]  }
  0xd5   : > { %2232 = vmatprep.mubr.bf16.mxu0 %v6428_v2  ;;  %5770 = vmatpush3.bf16.msra.mxu0 %v6269_v23 }
  0xd6   : > { %2150 = vmatmul.mubr.bf16.gmra.mxu1 %v1706_v13  ;;  %5771 = vmatprep.subr.bf16.mxu0 %v6273_v17 }
  0xd7   : > { %2159 = vmatprep.mubr.bf16.mxu1 %v7276_v14  ;;  %v1765_v14 = vshll.u32 %v5233_v32, 16  ;;  %2920 = vmatpush2.bf16.msra.mxu1 %v6260_v40  ;;  %v6292_v32 = vld [vmem:[%s8471_s2 + $0x228] ss:$12 sps:$4 sm:$0xff]  }
  0xd8   : > { %2921 = vmatprep.subr.bf16.mxu1 %v6267_v26 }
  0xd9   : > { %v1767_v41 = vrot.slane %v1765_v14, 1  ;;  %5772 = vmatpush3.bf16.msra.mxu0 %v6274_v58 }
  0xda   : > { %5773 = vmatprep.subr.bf16.mxu0 %v6278_v35 }
  0xdb   : > { %2922 = vmatpush2.bf16.msra.mxu1 %v6265_v7 }
  0xdc   : > { %2233 = vmatmul.mubr.bf16.gmra.mxu0 %v1741_v28  ;;  %2923 = vmatprep.subr.bf16.mxu1 %v6272_v19  ;;  %v6277_v28 = vld [vmem:[%s8471_s2 + $0xf4] ss:$12 sps:$4 sm:$0xff]  }
  0xdd   : > { %2242 = vmatprep.mubr.bf16.mxu0 %v6428_v2  ;;  %5774 = vmatpush3.bf16.msra.mxu0 %v6279_v25  ;;  %v6301_v19 = vld [vmem:[%s8471_s2 + $0x1e0] ss:$12 sps:$4 sm:$0xff]  }
  0xde   : > { %2160 = vmatmul.mubr.bf16.gmra.mxu1 %v1714_v63  ;;  %v6283_v63 = vld [vmem:[%s8471_s2 + $0xf8] ss:$12 sps:$4 sm:$0xff]  }
  0xdf   : > { %2169 = vmatprep.mubr.bf16.mxu1 %v7306_v31  ;;  %v1769_v31 = vsel %vm6893_vm5, %v1754_v52, %v1767_v41  ;;  %2924 = vmatpush2.bf16.msra.mxu1 %v6270_v60  ;;  %v6303_v41 = vld [vmem:[%s8471_s2 + $0x1e4] ss:$12 sps:$4 sm:$0xff]  }
  0xe0   : > { %2925 = vmatprep.subr.bf16.mxu1 %v6277_v28  ;;  %5775 = vmatprep.subr.bf16.mxu0 %v6283_v63 }
  0xe1   : > { %5776 = vmatpush3.bf16.msra.mxu0 %v6284_v8 }
  0xe2   : > { %5777 = vmatprep.subr.bf16.mxu0 %v6288_v46 }
  0xe3   : > { %2926 = vmatpush2.bf16.msra.mxu1 %v6275_v34  ;;  %v6304_v34 = vld [vmem:[%s8471_s2 + $0x1c8] ss:$12 sps:$4 sm:$0xff]  }
  0xe4   : > { %2243 = vmatmul.mubr.bf16.gmra.mxu0 %v1744_v62  ;;  %2927 = vmatprep.subr.bf16.mxu1 %v6282_v9 }
  0xe5   : > { %2252 = vmatprep.mubr.bf16.mxu0 %v6428_v2  ;;  %5778 = vmatpush3.bf16.msra.mxu0 %v6289_v48  ;;  %v6310_v48 = vld [vmem:[%s8471_s2 + $0x198] ss:$12 sps:$4 sm:$0xff]  }
  0xe6   : > { %2170 = vmatmul.mubr.bf16.gmra.mxu1 %v1722_v27  ;;  %5779 = vmatprep.subr.bf16.mxu0 %v6290_v59  ;;  %v6313_v59 = vld [vmem:[%s8471_s2 + $0x180] ss:$12 sps:$4 sm:$0xff]  }
  0xe7   : > { %2928 = vmatpush2.bf16.msra.mxu1 %v6280_v39  ;;  %2931 = vmatprep.mubr.bf16.mxu1 %v7472_v47  ;;  %v6309_v39 = vld [vmem:[%s8471_s2 + $0x1b4] ss:$12 sps:$4 sm:$0xff]  }
  0xe8   : > { %2929 = vmatprep.subr.bf16.mxu1 %v6287_v50 }
  0xe9   : > { %5780 = vmatpush3.bf16.msra.mxu0 %v6291_v51 }
  0xeb   : > { %2930 = vmatpush2.bf16.msra.mxu1 %v6285_v44  ;;  %v6312_v44 = vld [vmem:[%s8471_s2 + $0x19c] ss:$12 sps:$4 sm:$0xff]  }
  0xec   : > { %2253 = vmatmul.mubr.bf16.gmra.mxu0 %v1747_v49  ;;  %v7486_v49 = vcombine.low %v6428_v2, %v6428_v2  ;;  %3706 = vmatprep.subr.bf16.mxu1 %v6294_v3  ;;  %v6319_v3 = vld [vmem:[%s8471_s2 + $0x2f0] ss:$12 sps:$4 sm:$0xff]  }
  0xed   : > { %2262 = vmatprep.mubr.bf16.mxu0 %v6428_v2  ;;  %v7366_v38 = vpop.f32.mrf.mxu1  ;;  %5829 = vmatprep.subr.bf16.mxu0 %v6319_v3 }
  0xee   : > { %2932 = vmatmul.mubr.bf16.vlgmr.msra.gmra.mxu1 %v7486_v49 }
  0xef   : > { %v7378_v5 = vpop.f32.mrf.mxu1  ;;  %3707 = vmatpush1.bf16.msra.mxu1 %v6292_v32  ;;  %v6320_v32 = vld [vmem:[%s8471_s2 + $0x230] ss:$12 sps:$4 sm:$0xff]  }
  0xf0   : > { %3708 = vmatprep.subr.bf16.mxu1 %v6297_v10 }
  0xf1   : > { %v1056_v6 = vpop.f32.mrf.mxu1 }
  0xf3   : > { %v1058_v61 = vpop.f32.mrf.mxu1  ;;  %3709 = vmatpush1.bf16.msra.mxu1 %v6295_v11  ;;  %v6324_v11 = vld [vmem:[%s8471_s2 + $0x2d8] ss:$12 sps:$4 sm:$0xff]  }
  0xf4   : > { %2263 = vmatmul.mubr.bf16.gmra.mxu0 %v1750_v4 }
  0xf5   : > { %2272 = vmatprep.mubr.bf16.mxu0 %v6428_v2  ;;  %v7400_v15 = vpop.f32.mrf.mxu1 }
  0xf7   : > { %v7412_v53 = vpop.f32.mrf.mxu1 }
  0xf9   : > { %v1066_v37 = vpop.f32.mrf.mxu1 }
  0xfb   : > { %v1068_v13 = vpop.f32.mrf.mxu1 }
  0xfc   : > { %2273 = vmatmul.mubr.bf16.gmra.mxu0 %v1753_v16  ;;  %v6300_v16 = vld [vmem:[%s8471_s2 + $0x1fc] ss:$12 sps:$4 sm:$0xff]  }
  0xfd   : > { %2282 = vmatprep.mubr.bf16.mxu0 %v6428_v2  ;;  %v7432_v30 = vpop.f32.mrf.mxu1  ;;  %3710 = vmatprep.subr.bf16.mxu1 %v6300_v16  ;;  %v6325_v16 = vld [vmem:[%s8471_s2 + $0x218] ss:$12 sps:$4 sm:$0xff]  }
  0xfe   : > { %3711 = vmatpush1.bf16.msra.mxu1 %v6298_v22 }
  0xff   : > { %v7445_v36 = vpop.f32.mrf.mxu1  ;;  %3712 = vmatprep.subr.bf16.mxu1 %v6303_v41  ;;  %v6328_v41 = vld [vmem:[%s8471_s2 + $0x2bc] ss:$12 sps:$4 sm:$0xff]  }
 0x101   : > { %v1076_v55 = vpop.f32.mrf.mxu1 }
 0x102   : > { %3713 = vmatpush1.bf16.msra.mxu1 %v6301_v19 }
 0x103   : > { %v1078_v43 = vpop.f32.mrf.mxu1 }
 0x104   : > { %2283 = vmatmul.mubr.bf16.gmra.mxu0 %v1769_v31  ;;  %v6307_v43 = vld [vmem:[%s8471_s2 + $0x1b0] ss:$12 sps:$4 sm:$0xff]  }
 0x105   : > { %v7462_v62 = vpop.f32.mrf.mxu1  ;;  %3044 = vmatprep.mubr.bf16.mxu0 %v7472_v47 }
 0x107   : > { %v7477_v24 = vpop.f32.mrf.mxu1 }
 0x109   : > { %v1086_v18 = vpop.f32.mrf.mxu1 }
 0x10b   : > { %v1088_v45 = vpop.f32.mrf.mxu1 }
 0x10c   : > { %v939_v33 = vpop.f32.mrf.mxu0  ;;  %3045 = vmatmul.mubr.bf16.vlgmr.msra.gmra.mxu0 %v7486_v49  ;;  %v6315_v45 = vld [vmem:[%s8471_s2 + $0x184] ss:$12 sps:$4 sm:$0xff]  }
 0x10d   : > { %v7481_v27 = vadd.f32 %v7366_v38, %v939_v33  ;;  %5830 = vmatpush3.bf16.msra.mxu0 %v6320_v32 }
 0x10e   : > { %v941_v29 = vpop.f32.mrf.mxu0  ;;  %v7492_v57 = vpop.f32.mrf.mxu1  ;;  %5831 = vmatprep.subr.bf16.mxu0 %v6324_v11 }
 0x10f   : > { %v7489_v56 = vadd.f32 %v7378_v5, %v941_v29 }
 0x110   : > { %v943_v21 = vpop.f32.mrf.mxu0  ;;  %v7500_v38 = vpop.f32.mrf.mxu1 }
 0x111   : > { %5832 = vmatpush3.bf16.msra.mxu0 %v6325_v16 }
 0x112   : > { %v945_v54 = vpop.f32.mrf.mxu0  ;;  %v1096_v0 = vpop.f32.mrf.mxu1 }
 0x114   : > { %v949_v4 = vpop.f32.mrf.mxu0  ;;  %v1098_v6 = vpop.f32.mrf.mxu1 }
 0x115   : > { %v7503_v1 = vadd.f32 %v7400_v15, %v949_v4 }
 0x116   : > { %v951_v5 = vpop.f32.mrf.mxu0  ;;  %v7515_v40 = vpop.f32.mrf.mxu1 }
 0x117   : > { %v7512_v42 = vadd.f32 %v7412_v53, %v951_v5 }
 0x118   : > { %v953_v12 = vpop.f32.mrf.mxu0  ;;  %v7523_v20 = vpop.f32.mrf.mxu1 }
 0x11a   : > { %v955_v61 = vpop.f32.mrf.mxu0  ;;  %v1106_v14 = vpop.f32.mrf.mxu1 }
 0x11b   : > { %v6323_v61 = vld [vmem:[%s8471_s2 + $0x2d4] ss:$12 sps:$4 sm:$0xff]  }
 0x11c   : > { %v959_v26 = vpop.f32.mrf.mxu0  ;;  %v1108_v23 = vpop.f32.mrf.mxu1 }
 0x11d   : > { %v7526_v15 = vadd.f32 %v7432_v30, %v959_v26  ;;  %v6306_v30 = vld [vmem:[%s8471_s2 + $0x1cc] ss:$12 sps:$4 sm:$0xff]  }
 0x11e   : > { %v961_v7 = vpop.f32.mrf.mxu0  ;;  %v7537_v52 = vpop.f32.mrf.mxu1  ;;  %3714 = vmatprep.subr.bf16.mxu1 %v6306_v30 }
 0x11f   : > { %v7535_v53 = vadd.f32 %v7445_v36, %v961_v7  ;;  %3715 = vmatpush1.bf16.msra.mxu1 %v6304_v34  ;;  %v6333_v34 = vld [vmem:[%s8471_s2 + $0x2a4] ss:$12 sps:$4 sm:$0xff]  }
 0x120   : > { %v963_v37 = vpop.f32.mrf.mxu0  ;;  %v7545_v13 = vpop.f32.mrf.mxu1  ;;  %3716 = vmatprep.subr.bf16.mxu1 %v6309_v39 }
 0x122   : > { %v965_v60 = vpop.f32.mrf.mxu0  ;;  %v1116_v58 = vpop.f32.mrf.mxu1 }
 0x123   : > { %3717 = vmatpush1.bf16.msra.mxu1 %v6307_v43  ;;  %v6329_v60 = vld [vmem:[%s8471_s2 + $0x2c0] ss:$12 sps:$4 sm:$0xff]  }
 0x124   : > { %v969_v17 = vpop.f32.mrf.mxu0  ;;  %v1118_v35 = vpop.f32.mrf.mxu1  ;;  %3718 = vmatprep.subr.bf16.mxu1 %v6312_v44  ;;  %5833 = vmatprep.subr.bf16.mxu0 %v6329_v60  ;;  %v6358_v60 = vld [vmem:[%s8471_s2 + $0x3ac] ss:$12 sps:$4 sm:$0xff]  }
 0x125   : > { %v7548_v28 = vadd.f32 %v7462_v62, %v969_v17  ;;  %v6330_v17 = vld [vmem:[%s8471_s2 + $0x200] ss:$12 sps:$4 sm:$0xff]   ;;  %v6334_v35 = vld [vmem:[%s8471_s2 + $0x2a8] ss:$12 sps:$4 sm:$0xff]  }
 0x126   : > { %v971_v31 = vpop.f32.mrf.mxu0  ;;  %v7559_v55 = vpop.f32.mrf.mxu1  ;;  %5834 = vmatpush3.bf16.msra.mxu0 %v6330_v17 }
 0x127   : > { %v7557_v25 = vadd.f32 %v7477_v24, %v971_v31  ;;  %3719 = vmatpush1.bf16.msra.mxu1 %v6310_v48  ;;  %5835 = vmatprep.subr.bf16.mxu0 %v6334_v35  ;;  %v6339_v48 = vld [vmem:[%s8471_s2 + $0x290] ss:$12 sps:$4 sm:$0xff]  }
 0x128   : > { %v973_v36 = vpop.f32.mrf.mxu0  ;;  %v7567_v63 = vpop.f32.mrf.mxu1  ;;  %3720 = vmatprep.subr.bf16.mxu1 %v6315_v45 }
 0x12a   : > { %v975_v9 = vpop.f32.mrf.mxu0  ;;  %v1126_v50 = vpop.f32.mrf.mxu1 }
 0x12b   : > { %3721 = vmatpush1.bf16.msra.mxu1 %v6313_v59  ;;  %v6335_v9 = vld [vmem:[%s8471_s2 + $0x1e8] ss:$12 sps:$4 sm:$0xff]  }
 0x12c   : > { %v979_v8 = vpop.f32.mrf.mxu0  ;;  %v1128_v24 = vpop.f32.mrf.mxu1  ;;  %5836 = vmatpush3.bf16.msra.mxu0 %v6335_v9  ;;  %v6343_v59 = vld [vmem:[%s8471_s2 + $0x274] ss:$12 sps:$4 sm:$0xff]  }
 0x12d   : > { %v7570_v62 = vadd.f32 %v7492_v57, %v979_v8  ;;  %5837 = vmatprep.subr.bf16.mxu0 %v6339_v48 }
 0x12e   : > { %v981_v46 = vpop.f32.mrf.mxu0  ;;  %v1405_v29 = vpop.f32.mrf.mxu1 }
 0x12f   : > { %v7579_v33 = vadd.f32 %v7500_v38, %v981_v46  ;;  %v7585_v21 = vadd.f32 %v1405_v29, %v7481_v27  ;;  %v6318_v27 = vld [vmem:[%s8471_s2 + $0x2ec] ss:$12 sps:$4 sm:$0xff]  }
 0x130   : > { %v983_v18 = vpop.f32.mrf.mxu0  ;;  %v1407_v54 = vpop.f32.mrf.mxu1  ;;  %3722 = vmatprep.subr.bf16.mxu1 %v6318_v27  ;;  %v6338_v46 = vld [vmem:[%s8471_s2 + $0x28c] ss:$12 sps:$4 sm:$0xff]  }
 0x131   : > { %v7591_v51 = vadd.f32 %v1407_v54, %v7489_v56  ;;  %v6316_v56 = vld [vmem:[%s8471_s2 + $0x2e8] ss:$12 sps:$4 sm:$0xff]   ;;  %v6340_v18 = vld [vmem:[%s8471_s2 + $0x1d0] ss:$12 sps:$4 sm:$0xff]   ;;  %v6344_v54 = vld [vmem:[%s8471_s2 + $0x278] ss:$12 sps:$4 sm:$0xff]  }
 0x132   : > { %v985_v57 = vpop.f32.mrf.mxu0  ;;  %v1409_v4 = vpop.f32.mrf.mxu1  ;;  %3723 = vmatpush2.bf16.msra.mxu1 %v6316_v56  ;;  %5838 = vmatpush3.bf16.msra.mxu0 %v6340_v18  ;;  %v6345_v27 = vld [vmem:[%s8471_s2 + $0x1b8] ss:$12 sps:$4 sm:$0xff]  }
 0x133   : > { %3724 = vmatprep.subr.bf16.mxu1 %v6323_v61  ;;  %5839 = vmatprep.subr.bf16.mxu0 %v6344_v54  ;;  %v6350_v61 = vld [vmem:[%s8471_s2 + $0x1a0] ss:$12 sps:$4 sm:$0xff]  }
 0x134   : > { %v989_v38 = vpop.f32.mrf.mxu0  ;;  %v1411_v6 = vpop.f32.mrf.mxu1 }
 0x135   : > { %v7594_v0 = vadd.f32 %v7515_v40, %v989_v38  ;;  %v6348_v6 = vld [vmem:[%s8471_s2 + $0x25c] ss:$12 sps:$4 sm:$0xff]  }
 0x136   : > { %v991_v5 = vpop.f32.mrf.mxu0  ;;  %v1415_v10 = vpop.f32.mrf.mxu1  ;;  %5840 = vmatpush3.bf16.msra.mxu0 %v6345_v27 }
 0x137   : > { %v7609_v12 = vadd.f32 %v7523_v20, %v991_v5  ;;  %v7618_v26 = vadd.f32 %v1415_v10, %v7503_v1  ;;  %v6321_v20 = vld [vmem:[%s8471_s2 + $0x2d0] ss:$12 sps:$4 sm:$0xff]  }
 0x138   : > { %v993_v40 = vpop.f32.mrf.mxu0  ;;  %v1417_v7 = vpop.f32.mrf.mxu1  ;;  %3725 = vmatpush2.bf16.msra.mxu1 %v6321_v20  ;;  %v6354_v20 = vld [vmem:[%s8471_s2 + $0x248] ss:$12 sps:$4 sm:$0xff]  }
 0x139   : > { %v7627_v22 = vadd.f32 %v1417_v7, %v7512_v42  ;;  %v6326_v42 = vld [vmem:[%s8471_s2 + $0x2b8] ss:$12 sps:$4 sm:$0xff]   ;;  %3726 = vmatprep.subr.bf16.mxu1 %v6328_v41  ;;  %v6349_v40 = vld [vmem:[%s8471_s2 + $0x260] ss:$12 sps:$4 sm:$0xff]  }
 0x13a   : > { %v995_v14 = vpop.f32.mrf.mxu0  ;;  %v1419_v1 = vpop.f32.mrf.mxu1  ;;  %5841 = vmatprep.subr.bf16.mxu0 %v6349_v40  ;;  %v6351_v7 = vld [vmem:[%s8471_s2 + $0x240] ss:$12 sps:$4 sm:$0xff]  }
 0x13b   : > { %v6353_v14 = vld [vmem:[%s8471_s2 + $0x244] ss:$12 sps:$4 sm:$0xff]   ;;  %5842 = vmatpush3.bf16.msra.mxu0 %v6350_v61 }
 0x13c   : > { %v999_v23 = vpop.f32.mrf.mxu0  ;;  %v1421_v58 = vpop.f32.mrf.mxu1  ;;  %3727 = vmatpush2.bf16.msra.mxu1 %v6326_v42  ;;  %5843 = vmatprep.subr.bf16.mxu0 %v6354_v20 }
 0x13d   : > { %v7630_v37 = vadd.f32 %v7537_v52, %v999_v23  ;;  %3728 = vmatprep.subr.bf16.mxu1 %v6333_v34 }
 0x13e   : > { %v1001_v19 = vpop.f32.mrf.mxu0  ;;  %v1425_v31 = vpop.f32.mrf.mxu1 }
 0x13f   : > { %v7645_v52 = vadd.f32 %v7545_v13, %v1001_v19  ;;  %v7654_v36 = vadd.f32 %v1425_v31, %v7526_v15  ;;  %v6331_v13 = vld [vmem:[%s8471_s2 + $0x2a0] ss:$12 sps:$4 sm:$0xff]  }
 0x140   : > { %v1003_v30 = vpop.f32.mrf.mxu0  ;;  %v1427_v43 = vpop.f32.mrf.mxu1  ;;  %3729 = vmatpush2.bf16.msra.mxu1 %v6331_v13 }
 0x141   : > { %v7663_v8 = vadd.f32 %v1427_v43, %v7535_v53  ;;  %v6336_v53 = vld [vmem:[%s8471_s2 + $0x288] ss:$12 sps:$4 sm:$0xff]   ;;  %3730 = vmatprep.subr.bf16.mxu1 %v6338_v46 }
 0x142   : > { %v1005_v39 = vpop.f32.mrf.mxu0  ;;  %v1429_v15 = vpop.f32.mrf.mxu1 }
 0x144   : > { %v1009_v50 = vpop.f32.mrf.mxu0  ;;  %v1431_v29 = vpop.f32.mrf.mxu1  ;;  %3731 = vmatpush2.bf16.msra.mxu1 %v6336_v53 }
 0x145   : > { %v7666_v44 = vadd.f32 %v7559_v55, %v1009_v50  ;;  %3732 = vmatprep.subr.bf16.mxu1 %v6343_v59 }
 0x146   : > { %v1011_v24 = vpop.f32.mrf.mxu0  ;;  %v1435_v57 = vpop.f32.mrf.mxu1 }
 0x147   : > { %v7681_v55 = vadd.f32 %v7567_v63, %v1011_v24  ;;  %v7690_v38 = vadd.f32 %v1435_v57, %v7548_v28  ;;  %v6341_v63 = vld [vmem:[%s8471_s2 + $0x270] ss:$12 sps:$4 sm:$0xff]  }
 0x148   : > { %v1013_v45 = vpop.f32.mrf.mxu0  ;;  %v1437_v3 = vpop.f32.mrf.mxu1  ;;  %3733 = vmatpush2.bf16.msra.mxu1 %v6341_v63 }
 0x149   : > { %v1438_v5 = vadd.f32 %v1437_v3, %v7557_v25  ;;  %v6346_v25 = vld [vmem:[%s8471_s2 + $0x258] ss:$12 sps:$4 sm:$0xff]   ;;  %3734 = vmatprep.subr.bf16.mxu1 %v6348_v6 }
 0x14a   : > { %v1015_v4 = vpop.f32.mrf.mxu0  ;;  %v1439_v32 = vpop.f32.mrf.mxu1 }
 0x14c   : > { %v1518_v56 = vpop.f32.mrf.mxu0  ;;  %v1441_v11 = vpop.f32.mrf.mxu1  ;;  %3735 = vmatpush2.bf16.msra.mxu1 %v6346_v25 }
 0x14d   : > { %v7700_v28 = vadd.f32 %v1518_v56, %v7585_v21  ;;  %3736 = vmatprep.subr.bf16.mxu1 %v6353_v14  ;;  %v7764_v11 = vld [vmem:[%s8471_s2 + $0x470] ss:$12 sps:$4 sm:$0xff]  }
 0x14e   : > { %v1520_v10 = vpop.f32.mrf.mxu0  ;;  %v1445_v23 = vpop.f32.mrf.mxu1 }
 0x14f   : > { %v7715_v21 = vadd.f32 %v1520_v10, %v7591_v51  ;;  %v6355_v51 = vld [vmem:[%s8471_s2 + $0x188] ss:$12 sps:$4 sm:$0xff]   ;;  %v1446_v1 = vadd.f32 %v1445_v23, %v7570_v62 }
 0x150   : > { %v1522_v16 = vpop.f32.mrf.mxu0  ;;  %v1447_v19 = vpop.f32.mrf.mxu1  ;;  %3737 = vmatpush2.bf16.msra.mxu1 %v6351_v7  ;;  %5844 = vmatpush3.bf16.msra.mxu0 %v6355_v51 }
 0x151   : > { %v1448_v42 = vadd.f32 %v1447_v19, %v7579_v33  ;;  %4512 = vmatprep.subr.bf16.mxu1 %v6358_v60  ;;  %5893 = vmatprep.subr.bf16.mxu0 %v7764_v11 }
 0x152   : > { %v1524_v41 = vpop.f32.mrf.mxu0  ;;  %v1449_v58 = vpop.f32.mrf.mxu1 }
 0x154   : > { %v1528_v17 = vpop.f32.mrf.mxu0  ;;  %v1451_v34 = vpop.f32.mrf.mxu1 }
 0x155   : > { %v7735_v30 = vadd.f32 %v1528_v17, %v7618_v26 }
 0x156   : > { %v1530_v31 = vpop.f32.mrf.mxu0  ;;  %v1455_v39 = vpop.f32.mrf.mxu1 }
 0x157   : > { %v7738_v62 = vadd.f32 %v1530_v31, %v7627_v22  ;;  %v1456_v13 = vadd.f32 %v1455_v39, %v7594_v0 }
 0x158   : > { %v1532_v35 = vpop.f32.mrf.mxu0  ;;  %v1457_v43 = vpop.f32.mrf.mxu1 }
 0x159   : > { %v1458_v33 = vadd.f32 %v1457_v43, %v7609_v12 }
 0x15a   : > { %v1534_v9 = vpop.f32.mrf.mxu0  ;;  %v1459_v15 = vpop.f32.mrf.mxu1 }
 0x15c   : > { %v1538_v50 = vpop.f32.mrf.mxu0  ;;  %v1461_v48 = vpop.f32.mrf.mxu1 }
 0x15d   : > { %v7743_v46 = vadd.f32 %v1538_v50, %v7654_v36 }
 0x15e   : > { %v1540_v26 = vpop.f32.mrf.mxu0  ;;  %v1465_v53 = vpop.f32.mrf.mxu1 }
 0x15f   : > { %v7746_v24 = vadd.f32 %v1540_v26, %v7663_v8  ;;  %v1466_v18 = vadd.f32 %v1465_v53, %v7630_v37 }
 0x160   : > { %v1542_v22 = vpop.f32.mrf.mxu0  ;;  %v1467_v0 = vpop.f32.mrf.mxu1 }
 0x161   : > { %v1468_v45 = vadd.f32 %v1467_v0, %v7645_v52 }
 0x162   : > { %v1544_v29 = vpop.f32.mrf.mxu0  ;;  %v1469_v12 = vpop.f32.mrf.mxu1 }
 0x164   : > { %v1548_v57 = vpop.f32.mrf.mxu0  ;;  %v1471_v54 = vpop.f32.mrf.mxu1 }
 0x165   : > { %v7751_v59 = vadd.f32 %v1548_v57, %v7690_v38 }
 0x166   : > { %v1550_v36 = vpop.f32.mrf.mxu0  ;;  %v1475_v8 = vpop.f32.mrf.mxu1 }
 0x167   : > { %v7753_v4 = vadd.f32 %v1550_v36, %v1438_v5  ;;  %v1476_v27 = vadd.f32 %v1475_v8, %v7666_v44 }
 0x168   : > { %v1552_v63 = vpop.f32.mrf.mxu0  ;;  %v1477_v56 = vpop.f32.mrf.mxu1 }
 0x169   : > { %v1478_v37 = vadd.f32 %v1477_v56, %v7681_v55 }
 0x16a   : > { %v1554_v3 = vpop.f32.mrf.mxu0  ;;  %v1479_v52 = vpop.f32.mrf.mxu1 }
 0x16c   : > { %v1558_v32 = vpop.f32.mrf.mxu0  ;;  %v1481_v38 = vpop.f32.mrf.mxu1 }
 0x16d   : > { %v7757_v6 = vadd.f32 %v1558_v32, %v1446_v1 }
 0x16e   : > { %v1560_v40 = vpop.f32.mrf.mxu0  ;;  %v2101_v5 = vpop.f32.mrf.mxu1 }
 0x16f   : > { %v7759_v10 = vadd.f32 %v1560_v40, %v1448_v42 }
 0x170   : > { %v1562_v25 = vpop.f32.mrf.mxu0  ;;  %v2103_v14 = vpop.f32.mrf.mxu1 }
 0x172   : > { %v1564_v61 = vpop.f32.mrf.mxu0  ;;  %v2105_v16 = vpop.f32.mrf.mxu1 }
 0x174   : > { %v1568_v44 = vpop.f32.mrf.mxu0  ;;  %v2107_v23 = vpop.f32.mrf.mxu1 }
 0x175   : > { %v7767_v55 = vadd.f32 %v1568_v44, %v1456_v13 }
 0x176   : > { %v1570_v20 = vpop.f32.mrf.mxu0  ;;  %v2111_v41 = vpop.f32.mrf.mxu1 }
 0x177   : > { %v7769_v7 = vadd.f32 %v1570_v20, %v1458_v33 }
 0x178   : > { %v1572_v51 = vpop.f32.mrf.mxu0  ;;  %v2113_v19 = vpop.f32.mrf.mxu1 }
 0x17a   : > { %v1574_v1 = vpop.f32.mrf.mxu0  ;;  %v2115_v58 = vpop.f32.mrf.mxu1 }
 0x17c   : > { %v1578_v60 = vpop.f32.mrf.mxu0  ;;  %v2117_v35 = vpop.f32.mrf.mxu1 }
 0x17d   : > { %v7771_v42 = vadd.f32 %v1578_v60, %v1466_v18 }
 0x17e   : > { %v1580_v17 = vpop.f32.mrf.mxu0  ;;  %v2121_v13 = vpop.f32.mrf.mxu1 }
 0x17f   : > { %v7773_v31 = vadd.f32 %v1580_v17, %v1468_v45 }
 0x180   : > { %v1582_v34 = vpop.f32.mrf.mxu0  ;;  %v2123_v43 = vpop.f32.mrf.mxu1 }
 0x182   : > { %v1584_v39 = vpop.f32.mrf.mxu0  ;;  %v2125_v15 = vpop.f32.mrf.mxu1 }
 0x184   : > { %v1588_v9 = vpop.f32.mrf.mxu0  ;;  %v2127_v22 = vpop.f32.mrf.mxu1 }
 0x185   : > { %v7775_v33 = vadd.f32 %v1588_v9, %v1476_v27 }
 0x186   : > { %v1590_v50 = vpop.f32.mrf.mxu0  ;;  %v2131_v18 = vpop.f32.mrf.mxu1 }
 0x187   : > { %v7777_v26 = vadd.f32 %v1590_v50, %v1478_v37 }
 0x188   : > { %v1592_v48 = vpop.f32.mrf.mxu0  ;;  %v7779_v0 = vpop.f32.mrf.mxu1 }
 0x18a   : > { %v1594_v53 = vpop.f32.mrf.mxu0  ;;  %v2135_v12 = vpop.f32.mrf.mxu1 }
 0x18c   : > { %v2214_v29 = vpop.f32.mrf.mxu0  ;;  %v2137_v8 = vpop.f32.mrf.mxu1 }
 0x18d   : > { %v2215_v45 = vadd.f32 %v2214_v29, %v2101_v5 }
 0x18e   : > { %v2216_v57 = vpop.f32.mrf.mxu0  ;;  %v7783_v56 = vpop.f32.mrf.mxu1 }
 0x18f   : > { %v2293_v36 = vadd.f32 %v2215_v45, %v7700_v28  ;;  %v2217_v54 = vadd.f32 %v2216_v57, %v2103_v14 }
 0x190   : > { %v2218_v63 = vpop.f32.mrf.mxu0  ;;  %v7785_v40 = vpop.f32.mrf.mxu1 }
 0x191   : > { %v2294_v27 = vadd.f32 %v2217_v54, %v7715_v21  ;;  %v2325_v37 = vmax.f32 %v2293_v36, 0.0 }
 0x192   : > { %v2220_v3 = vpop.f32.mrf.mxu0  ;;  %v2145_v5 = vpop.f32.mrf.mxu1 }
 0x193   : > { %v2326_v32 = vmax.f32 %v2294_v27, 0.0 }
 0x194   : > { %v2224_v52 = vpop.f32.mrf.mxu0  ;;  %v2147_v16 = vpop.f32.mrf.mxu1 }
 0x195   : > { %v5686_v38 = vpack.c.bf16 %v2326_v32, %v2325_v37  ;;  %v2225_v25 = vadd.f32 %v2224_v52, %v2111_v41 }
 0x196   : > { %v2226_v61 = vpop.f32.mrf.mxu0  ;;  %v7799_v1 = vpop.f32.mrf.mxu1 }
 0x197   : > { %v7788_v44 = vcombine.low %v5686_v38, %v6428_v2  ;;  %v7791_v28 = vcombine.high %v5686_v38, %v6428_v2  ;;  %v2297_v21 = vadd.f32 %v2225_v25, %v7735_v30  ;;  %v2227_v14 = vadd.f32 %v2226_v61, %v2113_v19 }
 0x198   : > { %v2228_v20 = vpop.f32.mrf.mxu0  ;;  %v7801_v30 = vpop.f32.mrf.mxu1 }
 0x199   : > { %v2298_v51 = vadd.f32 %v2227_v14, %v7738_v62  ;;  %2941 = vmatprep.mubr.bf16.mxu1 %v7791_v28  ;;  %3052 = vmatprep.mubr.bf16.mxu0 %v7791_v28  ;;  %v2329_v41 = vmax.f32 %v2297_v21, 0.0 }
 0x19a   : > { %v2230_v23 = vpop.f32.mrf.mxu0  ;;  %2942 = vmatmul.mubr.bf16.gmra.mxu1 %v7788_v44  ;;  %3053 = vmatmul.mubr.bf16.gmra.mxu0 %v7788_v44  ;;  %v2155_v62 = vpop.f32.mrf.mxu1 }
 0x19b   : > { %v2330_v60 = vmax.f32 %v2298_v51, 0.0 }
 0x19c   : > { %v2234_v17 = vpop.f32.mrf.mxu0  ;;  %v2157_v48 = vpop.f32.mrf.mxu1 }
 0x19d   : > { %v5688_v19 = vpack.c.bf16 %v2330_v60, %v2329_v41  ;;  %v2235_v58 = vadd.f32 %v2234_v17, %v2121_v13 }
 0x19e   : > { %v2236_v34 = vpop.f32.mrf.mxu0  ;;  %v7815_v53 = vpop.f32.mrf.mxu1 }
 0x19f   : > { %v7804_v35 = vcombine.low %v5688_v19, %v6428_v2  ;;  %v7807_v39 = vcombine.high %v5688_v19, %v6428_v2  ;;  %v2301_v9 = vadd.f32 %v2235_v58, %v7743_v46  ;;  %v2237_v50 = vadd.f32 %v2236_v34, %v2123_v43 }
 0x1a0   : > { %v2238_v15 = vpop.f32.mrf.mxu0  ;;  %v7817_v46 = vpop.f32.mrf.mxu1 }
 0x1a1   : > { %v2302_v22 = vadd.f32 %v2237_v50, %v7746_v24  ;;  %2951 = vmatprep.mubr.bf16.mxu1 %v7807_v39  ;;  %3060 = vmatprep.mubr.bf16.mxu0 %v7807_v39  ;;  %v2333_v29 = vmax.f32 %v2301_v9, 0.0 }
 0x1a2   : > { %v2240_v13 = vpop.f32.mrf.mxu0  ;;  %2952 = vmatmul.mubr.bf16.gmra.mxu1 %v7804_v35  ;;  %3061 = vmatmul.mubr.bf16.gmra.mxu0 %v7804_v35  ;;  %v2165_v24 = vpop.f32.mrf.mxu1 }
 0x1a3   : > { %v2334_v45 = vmax.f32 %v2302_v22, 0.0 }
 0x1a4   : > { %v2244_v57 = vpop.f32.mrf.mxu0  ;;  %v2167_v37 = vpop.f32.mrf.mxu1 }
 0x1a5   : > { %v5690_v43 = vpack.c.bf16 %v2334_v45, %v2333_v29  ;;  %v2245_v12 = vadd.f32 %v2244_v57, %v2131_v18 }
 0x1a6   : > { %v2246_v36 = vpop.f32.mrf.mxu0  ;;  %v2171_v52 = vpop.f32.mrf.mxu1 }
 0x1a7   : > { %v7820_v54 = vcombine.low %v5690_v43, %v6428_v2  ;;  %v7823_v63 = vcombine.high %v5690_v43, %v6428_v2  ;;  %v2305_v8 = vadd.f32 %v2245_v12, %v7751_v59  ;;  %v2247_v27 = vadd.f32 %v2246_v36, %v7779_v0 }
 0x1a8   : > { %v2248_v3 = vpop.f32.mrf.mxu0  ;;  %v2173_v59 = vpop.f32.mrf.mxu1 }
 0x1a9   : > { %v2306_v32 = vadd.f32 %v2247_v27, %v7753_v4  ;;  %2961 = vmatprep.mubr.bf16.mxu1 %v7823_v63  ;;  %3068 = vmatprep.mubr.bf16.mxu0 %v7823_v63  ;;  %v2337_v38 = vmax.f32 %v2305_v8, 0.0 }
 0x1aa   : > { %v2250_v18 = vpop.f32.mrf.mxu0  ;;  %2962 = vmatmul.mubr.bf16.gmra.mxu1 %v7820_v54  ;;  %3069 = vmatmul.mubr.bf16.gmra.mxu0 %v7820_v54  ;;  %v2175_v14 = vpop.f32.mrf.mxu1 }
 0x1ab   : > { %v2338_v25 = vmax.f32 %v2306_v32, 0.0  ;;  %v6361_v14 = vld [vmem:[%s8471_s2 + $0x394] ss:$12 sps:$4 sm:$0xff]  }
 0x1ac   : > { %v2254_v61 = vpop.f32.mrf.mxu0  ;;  %v2177_v41 = vpop.f32.mrf.mxu1 }
 0x1ad   : > { %v5692_v5 = vpack.c.bf16 %v2338_v25, %v2337_v38  ;;  %v2255_v0 = vadd.f32 %v2254_v61, %v7783_v56  ;;  %v7922_v41 = vld [vmem:[%s8471_s2 + $0x398] ss:$12 sps:$4 sm:$0xff]  }
 0x1ae   : > { %v2256_v21 = vpop.f32.mrf.mxu0 }
 0x1af   : > { %v7834_v4 = vcombine.low %v5692_v5, %v6428_v2  ;;  %v7837_v20 = vcombine.high %v5692_v5, %v6428_v2  ;;  %v2309_v16 = vadd.f32 %v2255_v0, %v7757_v6  ;;  %v2257_v51 = vadd.f32 %v2256_v21, %v7785_v40  ;;  %v7898_v21 = vpop.f32.mrf.mxu1 }
 0x1b0   : > { %v2258_v23 = vpop.f32.mrf.mxu0 }
 0x1b1   : > { %v2310_v60 = vadd.f32 %v2257_v51, %v7759_v10  ;;  %2971 = vmatprep.mubr.bf16.mxu1 %v7837_v20  ;;  %3076 = vmatprep.mubr.bf16.mxu0 %v7837_v20  ;;  %v2341_v17 = vmax.f32 %v2309_v16, 0.0  ;;  %v7910_v16 = vpop.f32.mrf.mxu1  ;;  %v3128_v51 = vrot.slane %v7898_v21, 7  ;;  %v6359_v23 = vld [vmem:[%s8471_s2 + $0x390] ss:$12 sps:$4 sm:$0xff]  }
 0x1b2   : > { %v2260_v56 = vpop.f32.mrf.mxu0  ;;  %2972 = vmatmul.mubr.bf16.gmra.mxu1 %v7834_v4  ;;  %3077 = vmatmul.mubr.bf16.gmra.mxu0 %v7834_v4 }
 0x1b3   : > { %v2342_v19 = vmax.f32 %v2310_v60, 0.0  ;;  %v6364_v60 = vld [vmem:[%s8471_s2 + $0x37c] ss:$12 sps:$4 sm:$0xff]   ;;  %v7933_v56 = vld [vmem:[%s8471_s2 + $0x440] ss:$12 sps:$4 sm:$0xff]  }
 0x1b4   : > { %v2264_v58 = vpop.f32.mrf.mxu0 }
 0x1b5   : > { %v5694_v34 = vpack.c.bf16 %v2342_v19, %v2341_v17  ;;  %v2265_v6 = vadd.f32 %v2264_v58, %v7799_v1 }
 0x1b6   : > { %v2266_v40 = vpop.f32.mrf.mxu0 }
 0x1b7   : > { %v7848_v62 = vcombine.low %v5694_v34, %v6428_v2  ;;  %v7851_v10 = vcombine.high %v5694_v34, %v6428_v2  ;;  %v2313_v9 = vadd.f32 %v2265_v6, %v7767_v55  ;;  %v2267_v50 = vadd.f32 %v2266_v40, %v7801_v30  ;;  %v6362_v34 = vld [vmem:[%s8471_s2 + $0x378] ss:$12 sps:$4 sm:$0xff]   ;;  %v7950_v6 = vld [vmem:[%s8471_s2 + $0x380] ss:$12 sps:$4 sm:$0xff]  }
 0x1b8   : > { %v2268_v15 = vpop.f32.mrf.mxu0  ;;  %v6367_v40 = vld [vmem:[%s8471_s2 + $0x364] ss:$12 sps:$4 sm:$0xff]  }
 0x1b9   : > { %v2314_v48 = vadd.f32 %v2267_v50, %v7769_v7  ;;  %2981 = vmatprep.mubr.bf16.mxu1 %v7851_v10  ;;  %3084 = vmatprep.mubr.bf16.mxu0 %v7851_v10  ;;  %v2345_v1 = vmax.f32 %v2313_v9, 0.0  ;;  %v7959_v9 = vld [vmem:[%s8471_s2 + $0x428] ss:$12 sps:$4 sm:$0xff]  }
 0x1ba   : > { %v2270_v22 = vpop.f32.mrf.mxu0  ;;  %2982 = vmatmul.mubr.bf16.gmra.mxu1 %v7848_v62  ;;  %3085 = vmatmul.mubr.bf16.gmra.mxu0 %v7848_v62 }
 0x1bb   : > { %v2346_v13 = vmax.f32 %v2314_v48, 0.0  ;;  %v6365_v22 = vld [vmem:[%s8471_s2 + $0x360] ss:$12 sps:$4 sm:$0xff]  }
 0x1bc   : > { %v2274_v29 = vpop.f32.mrf.mxu0 }
 0x1bd   : > { %v5696_v45 = vpack.c.bf16 %v2346_v13, %v2345_v1  ;;  %v2275_v55 = vadd.f32 %v2274_v29, %v7815_v53  ;;  %v7974_v1 = vld [vmem:[%s8471_s2 + $0x368] ss:$12 sps:$4 sm:$0xff]   ;;  %v6370_v13 = vld [vmem:[%s8471_s2 + $0x34c] ss:$12 sps:$4 sm:$0xff]   ;;  %v7983_v29 = vld [vmem:[%s8471_s2 + $0x410] ss:$12 sps:$4 sm:$0xff]  }
 0x1be   : > { %v2276_v57 = vpop.f32.mrf.mxu0 }
 0x1bf   : > { %v7862_v30 = vcombine.low %v5696_v45, %v6428_v2  ;;  %v7865_v7 = vcombine.high %v5696_v45, %v6428_v2  ;;  %v2317_v43 = vadd.f32 %v2275_v55, %v7771_v42  ;;  %v2277_v12 = vadd.f32 %v2276_v57, %v7817_v46 }
 0x1c0   : > { %v2278_v36 = vpop.f32.mrf.mxu0 }
 0x1c1   : > { %v2318_v24 = vadd.f32 %v2277_v12, %v7773_v31  ;;  %2991 = vmatprep.mubr.bf16.mxu1 %v7865_v7  ;;  %3092 = vmatprep.mubr.bf16.mxu0 %v7865_v7  ;;  %v2349_v53 = vmax.f32 %v2317_v43, 0.0  ;;  %v6368_v43 = vld [vmem:[%s8471_s2 + $0x348] ss:$12 sps:$4 sm:$0xff]   ;;  %v7995_v12 = vld [vmem:[%s8471_s2 + $0x350] ss:$12 sps:$4 sm:$0xff]  }
 0x1c2   : > { %v2280_v8 = vpop.f32.mrf.mxu0  ;;  %2992 = vmatmul.mubr.bf16.gmra.mxu1 %v7862_v30  ;;  %3093 = vmatmul.mubr.bf16.gmra.mxu0 %v7862_v30 }
 0x1c3   : > { %v2350_v27 = vmax.f32 %v2318_v24, 0.0  ;;  %v6373_v24 = vld [vmem:[%s8471_s2 + $0x334] ss:$12 sps:$4 sm:$0xff]   ;;  %v8005_v8 = vld [vmem:[%s8471_s2 + $0x3f8] ss:$12 sps:$4 sm:$0xff]  }
 0x1c4   : > { %v2284_v3 = vpop.f32.mrf.mxu0 }
 0x1c5   : > { %v5698_v37 = vpack.c.bf16 %v2350_v27, %v2349_v53  ;;  %v2285_v32 = vadd.f32 %v2284_v3, %v2171_v52  ;;  %v6371_v27 = vld [vmem:[%s8471_s2 + $0x330] ss:$12 sps:$4 sm:$0xff]   ;;  %v8025_v3 = vld [vmem:[%s8471_s2 + $0x338] ss:$12 sps:$4 sm:$0xff]  }
 0x1c6   : > { %v2286_v42 = vpop.f32.mrf.mxu0 }
 0x1c7   : > { %v7875_v46 = vcombine.low %v5698_v37, %v6428_v2  ;;  %v7878_v31 = vcombine.high %v5698_v37, %v6428_v2  ;;  %v2321_v18 = vadd.f32 %v2285_v32, %v7775_v33  ;;  %v2287_v38 = vadd.f32 %v2286_v42, %v2173_v59  ;;  %v7896_v59 = vld [vmem:[%s8471_s2 + $0x3b0] ss:$12 sps:$4 sm:$0xff]   ;;  %v8034_v32 = vld [vmem:[%s8471_s2 + $0x3e0] ss:$12 sps:$4 sm:$0xff]   ;;  %v6374_v42 = vld [vmem:[%s8471_s2 + $0x318] ss:$12 sps:$4 sm:$0xff]  }
 0x1c8   : > { %v2288_v25 = vpop.f32.mrf.mxu0  ;;  %v6376_v37 = vld [vmem:[%s8471_s2 + $0x31c] ss:$12 sps:$4 sm:$0xff]  }
 0x1c9   : > { %v2322_v61 = vadd.f32 %v2287_v38, %v7777_v26  ;;  %3001 = vmatprep.mubr.bf16.mxu1 %v7878_v31  ;;  %3100 = vmatprep.mubr.bf16.mxu0 %v7878_v31  ;;  %v2353_v5 = vmax.f32 %v2321_v18, 0.0  ;;  %v6356_v26 = vld [vmem:[%s8471_s2 + $0x3a8] ss:$12 sps:$4 sm:$0xff]   ;;  %v8043_v18 = vld [vmem:[%s8471_s2 + $0x320] ss:$12 sps:$4 sm:$0xff]  }
 0x1ca   : > { %3002 = vmatmul.mubr.bf16.gmra.mxu1 %v7875_v46  ;;  %3101 = vmatmul.mubr.bf16.gmra.mxu0 %v7875_v46  ;;  %v2290_v52 = vpop.f32.mrf.mxu0  ;;  %v6379_v38 = vld [vmem:[%s8471_s2 + $0x304] ss:$12 sps:$4 sm:$0xff]   ;;  %v8052_v25 = vld [vmem:[%s8471_s2 + $0x3c8] ss:$12 sps:$4 sm:$0xff]  }
 0x1cb   : > { %v2354_v0 = vmax.f32 %v2322_v61, 0.0  ;;  %3738 = vmatprep.mubr.bf16.mxu1 %v7791_v28  ;;  %3851 = vmatprep.mubr.bf16.mxu0 %v7791_v28  ;;  %v7906_v28 = vld [vmem:[%s8471_s2 + $0x458] ss:$12 sps:$4 sm:$0xff]   ;;  %v6377_v61 = vld [vmem:[%s8471_s2 + $0x300] ss:$12 sps:$4 sm:$0xff]  }
 0x1cc   : > { %v5781_v19 = vpop.f32.mrf.mxu0  ;;  %v8065_v52 = vld [vmem:[%s8471_s2 + $0x308] ss:$12 sps:$4 sm:$0xff]  }
 0x1cd   : > { %v7888_v33 = vpack.c.bf16 %v2354_v0, %v2353_v5  ;;  %v6382_v5 = vld [vmem:[%s8471_s2 + $0x46c] ss:$12 sps:$4 sm:$0xff]   ;;  %v6380_v0 = vld [vmem:[%s8471_s2 + $0x468] ss:$12 sps:$4 sm:$0xff]  }
 0x1ce   : > { %v5782_v50 = vpop.f32.mrf.mxu0 }
 0x1cf   : > { %v7963_v15 = vadd.f32 %v5782_v50, %v5781_v19  ;;  %v6397_v19 = vld [vmem:[%s8471_s2 + $0x424] ss:$12 sps:$4 sm:$0xff]   ;;  %v6400_v50 = vld [vmem:[%s8471_s2 + $0x408] ss:$12 sps:$4 sm:$0xff]  }
 0x1d0   : > { %v5784_v48 = vpop.f32.mrf.mxu0 }
 0x1d1   : > { %v3224_v55 = vrot.slane %v7963_v15, 1 }
 0x1d2   : > { %3739 = vmatmul.mubr.bf16.vlgmr.msra.gmra.mxu1 %v7788_v44  ;;  %3852 = vmatmul.mubr.bf16.vlgmr.msra.gmra.mxu0 %v7788_v44  ;;  %v7924_v44 = vpop.f32.mrf.mxu1  ;;  %v5785_v45 = vpop.f32.mrf.mxu0 }
 0x1d3   : > { %3748 = vmatprep.mubr.bf16.mxu1 %v7807_v39  ;;  %3859 = vmatprep.mubr.bf16.mxu0 %v7807_v39  ;;  %v3129_v17 = vrot.slane %v7924_v44, 7  ;;  %v7986_v57 = vadd.f32 %v5785_v45, %v5784_v48  ;;  %v8109_v48 = vcombine.high %v7888_v33, %v6428_v2  ;;  %v6412_v45 = vld [vmem:[%s8471_s2 + $0x3dc] ss:$12 sps:$4 sm:$0xff]  }
 0x1d4   : > { %4513 = vmatpush1.bf16.msra.mxu1 %v6356_v26  ;;  %5894 = vmatpush3.bf16.msra.mxu0 %v7896_v59  ;;  %v6387_v26 = vld [vmem:[%s8471_s2 + $0x454] ss:$12 sps:$4 sm:$0xff]  }
 0x1d5   : > { %4514 = vmatprep.subr.bf16.mxu1 %v6361_v14  ;;  %5895 = vmatprep.subr.bf16.mxu0 %v7906_v28  ;;  %v7941_v58 = vsel %vm336_vm2, %v3128_v51, %v3129_v17  ;;  %v3225_v36 = vrot.slane %v7986_v57, 1  ;;  %v6385_v14 = vld [vmem:[%s8471_s2 + $0x450] ss:$12 sps:$4 sm:$0xff]  }
 0x1d7   : > { %v8014_v53 = vsel %vm3223_vm6, %v3224_v55, %v3225_v36 }
 0x1d8   : > { %4515 = vmatpush1.bf16.msra.mxu1 %v6359_v23  ;;  %5896 = vmatpush3.bf16.msra.mxu0 %v7922_v41  ;;  %v6392_v23 = vld [vmem:[%s8471_s2 + $0x43c] ss:$12 sps:$4 sm:$0xff]  }
 0x1d9   : > { %4516 = vmatprep.subr.bf16.mxu1 %v6364_v60  ;;  %5897 = vmatprep.subr.bf16.mxu0 %v7933_v56  ;;  %v6390_v60 = vld [vmem:[%s8471_s2 + $0x438] ss:$12 sps:$4 sm:$0xff]  }
 0x1da   : > { %3749 = vmatmul.mubr.bf16.gmra.mxu1 %v7804_v35  ;;  %3860 = vmatmul.mubr.bf16.gmra.mxu0 %v7804_v35 }
 0x1db   : > { %3758 = vmatprep.mubr.bf16.mxu1 %v7823_v63  ;;  %3867 = vmatprep.mubr.bf16.mxu0 %v7823_v63 }
 0x1dc   : > { %4517 = vmatpush1.bf16.msra.mxu1 %v6362_v34  ;;  %5898 = vmatpush3.bf16.msra.mxu0 %v7950_v6  ;;  %v6395_v34 = vld [vmem:[%s8471_s2 + $0x420] ss:$12 sps:$4 sm:$0xff]  }
 0x1dd   : > { %4518 = vmatprep.subr.bf16.mxu1 %v6367_v40  ;;  %5899 = vmatprep.subr.bf16.mxu0 %v7959_v9  ;;  %v6402_v40 = vld [vmem:[%s8471_s2 + $0x40c] ss:$12 sps:$4 sm:$0xff]  }
 0x1e0   : > { %4519 = vmatpush1.bf16.msra.mxu1 %v6365_v22  ;;  %5900 = vmatpush3.bf16.msra.mxu0 %v7974_v1  ;;  %v6407_v22 = vld [vmem:[%s8471_s2 + $0x3f4] ss:$12 sps:$4 sm:$0xff]  }
 0x1e1   : > { %4520 = vmatprep.subr.bf16.mxu1 %v6370_v13  ;;  %5901 = vmatprep.subr.bf16.mxu0 %v7983_v29  ;;  %v6405_v13 = vld [vmem:[%s8471_s2 + $0x3f0] ss:$12 sps:$4 sm:$0xff]  }
 0x1e2   : > { %3759 = vmatmul.mubr.bf16.gmra.mxu1 %v7820_v54  ;;  %3868 = vmatmul.mubr.bf16.gmra.mxu0 %v7820_v54 }
 0x1e3   : > { %3768 = vmatprep.mubr.bf16.mxu1 %v7837_v20  ;;  %3875 = vmatprep.mubr.bf16.mxu0 %v7837_v20 }
 0x1e4   : > { %4521 = vmatpush1.bf16.msra.mxu1 %v6368_v43  ;;  %5902 = vmatpush3.bf16.msra.mxu0 %v7995_v12  ;;  %v5488_v43 = vcombine.low %v7888_v33, %v6428_v2  ;;  %v6415_v2 = vld [vmem:[%s8471_s2 + $0x3c0] ss:$12 sps:$4 sm:$0xff]  }
 0x1e5   : > { %4522 = vmatprep.subr.bf16.mxu1 %v6373_v24  ;;  %5903 = vmatprep.subr.bf16.mxu0 %v8005_v8  ;;  %v6410_v24 = vld [vmem:[%s8471_s2 + $0x3d8] ss:$12 sps:$4 sm:$0xff]  }
 0x1e8   : > { %4523 = vmatpush1.bf16.msra.mxu1 %v6371_v27  ;;  %5904 = vmatpush3.bf16.msra.mxu0 %v8025_v3  ;;  %v6417_v27 = vld [vmem:[%s8471_s2 + $0x3c4] ss:$12 sps:$4 sm:$0xff]  }
 0x1e9   : > { %4524 = vmatprep.subr.bf16.mxu1 %v6376_v37  ;;  %5905 = vmatprep.subr.bf16.mxu0 %v8034_v32 }
 0x1ea   : > { %3769 = vmatmul.mubr.bf16.gmra.mxu1 %v7834_v4  ;;  %3876 = vmatmul.mubr.bf16.gmra.mxu0 %v7834_v4 }
 0x1eb   : > { %3778 = vmatprep.mubr.bf16.mxu1 %v7851_v10  ;;  %3883 = vmatprep.mubr.bf16.mxu0 %v7851_v10 }
 0x1ec   : > { %4525 = vmatpush1.bf16.msra.mxu1 %v6374_v42  ;;  %5906 = vmatpush3.bf16.msra.mxu0 %v8043_v18 }
 0x1ed   : > { %4526 = vmatprep.subr.bf16.mxu1 %v6379_v38  ;;  %5907 = vmatprep.subr.bf16.mxu0 %v8052_v25 }
 0x1f0   : > { %4527 = vmatpush1.bf16.msra.mxu1 %v6377_v61  ;;  %5908 = vmatpush3.bf16.msra.mxu0 %v8065_v52 }
 0x1f1   : > { %4528 = vmatprep.subr.bf16.mxu1 %v6382_v5 }
 0x1f2   : > { %3779 = vmatmul.mubr.bf16.gmra.mxu1 %v7848_v62  ;;  %3884 = vmatmul.mubr.bf16.gmra.mxu0 %v7848_v62 }
 0x1f3   : > { %3788 = vmatprep.mubr.bf16.mxu1 %v7865_v7  ;;  %3891 = vmatprep.mubr.bf16.mxu0 %v7865_v7 }
 0x1f4   : > { %4529 = vmatpush2.bf16.msra.mxu1 %v6380_v0 }
 0x1f5   : > { %4530 = vmatprep.subr.bf16.mxu1 %v6387_v26 }
 0x1f8   : > { %4531 = vmatpush2.bf16.msra.mxu1 %v6385_v14 }
 0x1f9   : > { %4532 = vmatprep.subr.bf16.mxu1 %v6392_v23 }
 0x1fa   : > { %3789 = vmatmul.mubr.bf16.gmra.mxu1 %v7862_v30  ;;  %3892 = vmatmul.mubr.bf16.gmra.mxu0 %v7862_v30 }
 0x1fb   : > { %3798 = vmatprep.mubr.bf16.mxu1 %v7878_v31  ;;  %3899 = vmatprep.mubr.bf16.mxu0 %v7878_v31 }
 0x1fc   : > { %4533 = vmatpush2.bf16.msra.mxu1 %v6390_v60 }
 0x1fd   : > { %4534 = vmatprep.subr.bf16.mxu1 %v6397_v19 }
 0x200   : > { %4535 = vmatpush2.bf16.msra.mxu1 %v6395_v34 }
 0x201   : > { %4536 = vmatprep.subr.bf16.mxu1 %v6402_v40 }
 0x202   : > { %3799 = vmatmul.mubr.bf16.gmra.mxu1 %v7875_v46  ;;  %3900 = vmatmul.mubr.bf16.gmra.mxu0 %v7875_v46 }
 0x203   : > { %3808 = vmatprep.mubr.bf16.mxu1 %v8109_v48  ;;  %3907 = vmatprep.mubr.bf16.mxu0 %v8109_v48 }
 0x204   : > { %4537 = vmatpush2.bf16.msra.mxu1 %v6400_v50 }
 0x205   : > { %4538 = vmatprep.subr.bf16.mxu1 %v6407_v22 }
 0x208   : > { %4539 = vmatpush2.bf16.msra.mxu1 %v6405_v13 }
 0x209   : > { %4540 = vmatprep.subr.bf16.mxu1 %v6412_v45 }
 0x20a   : > { %3809 = vmatmul.mubr.bf16.gmra.mxu1 %v5488_v43  ;;  %3908 = vmatmul.mubr.bf16.gmra.mxu0 %v5488_v43 }
 0x20b   : > { %4544 = vmatprep.mubr.bf16.mxu1 %v7807_v39  ;;  %4657 = vmatprep.mubr.bf16.mxu0 %v7807_v39 }
 0x20c   : > { %4541 = vmatpush2.bf16.msra.mxu1 %v6410_v24 }
 0x20d   : > { %4542 = vmatprep.subr.bf16.mxu1 %v6417_v27 }
 0x210   : > { %4543 = vmatpush2.bf16.msra.mxu1 %v6415_v2 }
 0x211   : > { %5957 = vmatprep.subr.bf16.mxu1 %v7764_v11  ;;  %v2939_v11 = vpop.f32.mrf.mxu1 }
 0x212   : > { %4658 = vmatmul.mubr.bf16.vlgmr.msra.gmra.mxu0 %v7804_v35 }
 0x213   : > { %4545 = vmatmul.mubr.bf16.vlgmr.msra.gmra.mxu1 %v7804_v35  ;;  %4665 = vmatprep.mubr.bf16.mxu0 %v7823_v63 }
 0x214   : > { %4554 = vmatprep.mubr.bf16.mxu1 %v7823_v63  ;;  %5965 = vmatpush3.bf16.msra.mxu1 %v7896_v59 }
 0x215   : > { %5958 = vmatprep.subr.bf16.mxu1 %v7906_v28 }
 0x218   : > { %5966 = vmatpush3.bf16.msra.mxu1 %v7922_v41 }
 0x219   : > { %5959 = vmatprep.subr.bf16.mxu1 %v7933_v56 }
 0x21a   : > { %4666 = vmatmul.mubr.bf16.gmra.mxu0 %v7820_v54 }
 0x21b   : > { %4555 = vmatmul.mubr.bf16.gmra.mxu1 %v7820_v54  ;;  %4673 = vmatprep.mubr.bf16.mxu0 %v7837_v20 }
 0x21c   : > { %4564 = vmatprep.mubr.bf16.mxu1 %v7837_v20  ;;  %5967 = vmatpush3.bf16.msra.mxu1 %v7950_v6 }
 0x21d   : > { %5960 = vmatprep.subr.bf16.mxu1 %v7959_v9 }
 0x220   : > { %5968 = vmatpush3.bf16.msra.mxu1 %v7974_v1 }
 0x221   : > { %5961 = vmatprep.subr.bf16.mxu1 %v7983_v29 }
 0x222   : > { %4674 = vmatmul.mubr.bf16.gmra.mxu0 %v7834_v4 }
 0x223   : > { %4565 = vmatmul.mubr.bf16.gmra.mxu1 %v7834_v4  ;;  %4681 = vmatprep.mubr.bf16.mxu0 %v7851_v10 }
 0x224   : > { %4574 = vmatprep.mubr.bf16.mxu1 %v7851_v10  ;;  %5969 = vmatpush3.bf16.msra.mxu1 %v7995_v12 }
 0x225   : > { %5962 = vmatprep.subr.bf16.mxu1 %v8005_v8 }
 0x228   : > { %5970 = vmatpush3.bf16.msra.mxu1 %v8025_v3 }
 0x229   : > { %5963 = vmatprep.subr.bf16.mxu1 %v8034_v32 }
 0x22a   : > { %4682 = vmatmul.mubr.bf16.gmra.mxu0 %v7848_v62 }
 0x22b   : > { %4575 = vmatmul.mubr.bf16.gmra.mxu1 %v7848_v62  ;;  %4689 = vmatprep.mubr.bf16.mxu0 %v7865_v7 }
 0x22c   : > { %4584 = vmatprep.mubr.bf16.mxu1 %v7865_v7  ;;  %5971 = vmatpush3.bf16.msra.mxu1 %v8043_v18 }
 0x22d   : > { %5964 = vmatprep.subr.bf16.mxu1 %v8052_v25 }
 0x230   : > { %5972 = vmatpush3.bf16.msra.mxu1 %v8065_v52 }
 0x232   : > { %4690 = vmatmul.mubr.bf16.gmra.mxu0 %v7862_v30 }
 0x233   : > { %4585 = vmatmul.mubr.bf16.gmra.mxu1 %v7862_v30  ;;  %4697 = vmatprep.mubr.bf16.mxu0 %v7878_v31 }
 0x234   : > { %4594 = vmatprep.mubr.bf16.mxu1 %v7878_v31 }
 0x23a   : > { %4698 = vmatmul.mubr.bf16.gmra.mxu0 %v7875_v46 }
 0x23b   : > { %4595 = vmatmul.mubr.bf16.gmra.mxu1 %v7875_v46 }
 0x23c   : > { %4604 = vmatprep.mubr.bf16.mxu1 %v8109_v48 }
 0x243   : > { %4605 = vmatmul.mubr.bf16.gmra.mxu1 %v5488_v43 }
 0x244   : > { %4614 = vmatprep.mubr.bf16.mxu1 %v7472_v47 }
 0x24b   : > { %4615 = vmatmul.mubr.bf16.gmra.mxu1 %v7486_v49 }
 0x24c   : > { %4705 = vmatprep.mubr.bf16.mxu1 %v8109_v48 }
 0x253   : > { %4706 = vmatmul.mubr.bf16.vlgmr.msra.gmra.mxu1 %v5488_v43 }
 0x254   : > { %4713 = vmatprep.mubr.bf16.mxu1 %v7472_v47  ;;  %v3192_v47 = vadd.f32 %v7941_v58, %v2939_v11 }
 0x25a   : > { %v2943_v35 = vpop.f32.mrf.mxu1  ;;  %v5787_v39 = vpop.f32.mrf.mxu0 }
 0x25b   : > { %v3131_v54 = vrot.slane %v2943_v35, 7  ;;  %4714 = vmatmul.mubr.bf16.gmra.mxu1 %v7486_v49 }
 0x25c   : > { %v2945_v63 = vpop.f32.mrf.mxu1  ;;  %v5788_v4 = vpop.f32.mrf.mxu0 }
 0x25d   : > { %v3132_v20 = vsel %vm336_vm2, %v3129_v17, %v3131_v54  ;;  %v5789_v62 = vadd.f32 %v5788_v4, %v5787_v39 }
 0x25e   : > { %v3193_v10 = vadd.f32 %v3132_v20, %v2945_v63  ;;  %v2947_v30 = vpop.f32.mrf.mxu1  ;;  %v5790_v7 = vpop.f32.mrf.mxu0 }
 0x25f   : > { %v3227_v46 = vrot.slane %v5789_v62, 1  ;;  %v3133_v31 = vrot.slane %v2947_v30, 7 }
 0x260   : > { %v2949_v33 = vpop.f32.mrf.mxu1  ;;  %v5791_v59 = vpop.f32.mrf.mxu0 }
 0x261   : > { %v3134_v28 = vsel %vm336_vm2, %v3131_v54, %v3133_v31  ;;  %v5792_v41 = vadd.f32 %v5791_v59, %v5790_v7  ;;  %v3228_v49 = vsel %vm3223_vm6, %v3225_v36, %v3227_v46 }
 0x262   : > { %v3194_v44 = vadd.f32 %v3134_v28, %v2949_v33  ;;  %v2953_v56 = vpop.f32.mrf.mxu1  ;;  %v5793_v17 = vpop.f32.mrf.mxu0  ;;  %v8189_v6 = vadd.f32 %v3228_v49, %v3192_v47 }
 0x263   : > { %v3229_v9 = vrot.slane %v5792_v41, 1  ;;  %v3135_v1 = vrot.slane %v2953_v56, 7 }
 0x264   : > { %v2955_v29 = vpop.f32.mrf.mxu1  ;;  %v5794_v12 = vpop.f32.mrf.mxu0 }
 0x265   : > { %v3136_v58 = vsel %vm336_vm2, %v3133_v31, %v3135_v1  ;;  %v5795_v8 = vadd.f32 %v5794_v12, %v5793_v17  ;;  %v3230_v3 = vsel %vm3223_vm6, %v3227_v46, %v3229_v9 }
 0x266   : > { %v3195_v37 = vadd.f32 %v3136_v58, %v2955_v29  ;;  %v2957_v32 = vpop.f32.mrf.mxu1  ;;  %v5796_v42 = vpop.f32.mrf.mxu0  ;;  %v8193_v57 = vadd.f32 %v3230_v3, %v3193_v10 }
 0x267   : > { %v3231_v36 = vrot.slane %v5795_v8, 1  ;;  %v3137_v18 = vrot.slane %v2957_v32, 7 }
 0x268   : > { %v2959_v38 = vpop.f32.mrf.mxu1  ;;  %v5797_v25 = vpop.f32.mrf.mxu0 }
 0x269   : > { %v3138_v61 = vsel %vm336_vm2, %v3135_v1, %v3137_v18  ;;  %v5798_v52 = vadd.f32 %v5797_v25, %v5796_v42  ;;  %v3232_v5 = vsel %vm3223_vm6, %v3229_v9, %v3231_v36 }
 0x26a   : > { %v3196_v0 = vadd.f32 %v3138_v61, %v2959_v38  ;;  %v2963_v26 = vpop.f32.mrf.mxu1  ;;  %v5799_v14 = vpop.f32.mrf.mxu0  ;;  %v8197_v23 = vadd.f32 %v3232_v5, %v3194_v44 }
 0x26b   : > { %v3233_v60 = vrot.slane %v5798_v52, 1  ;;  %v3139_v19 = vrot.slane %v2963_v26, 7 }
 0x26c   : > { %v2965_v34 = vpop.f32.mrf.mxu1  ;;  %v5800_v40 = vpop.f32.mrf.mxu0 }
 0x26d   : > { %v3140_v50 = vsel %vm336_vm2, %v3137_v18, %v3139_v19  ;;  %v5801_v48 = vadd.f32 %v5800_v40, %v5799_v14  ;;  %v3234_v22 = vsel %vm3223_vm6, %v3231_v36, %v3233_v60 }
 0x26e   : > { %v3197_v13 = vadd.f32 %v3140_v50, %v2965_v34  ;;  %v2967_v45 = vpop.f32.mrf.mxu1  ;;  %v5802_v43 = vpop.f32.mrf.mxu0  ;;  %v8201_v24 = vadd.f32 %v3234_v22, %v3195_v37 }
 0x26f   : > { %v3235_v27 = vrot.slane %v5801_v48, 1  ;;  %v3141_v2 = vrot.slane %v2967_v45, 7 }
 0x270   : > { %v2969_v11 = vpop.f32.mrf.mxu1  ;;  %v5803_v35 = vpop.f32.mrf.mxu0 }
 0x271   : > { %v3142_v39 = vsel %vm336_vm2, %v3139_v19, %v3141_v2  ;;  %v5804_v54 = vadd.f32 %v5803_v35, %v5802_v43  ;;  %v3236_v63 = vsel %vm3223_vm6, %v3233_v60, %v3235_v27 }
 0x272   : > { %v3198_v4 = vadd.f32 %v3142_v39, %v2969_v11  ;;  %v2973_v20 = vpop.f32.mrf.mxu1  ;;  %v5805_v62 = vpop.f32.mrf.mxu0  ;;  %v8205_v10 = vadd.f32 %v3236_v63, %v3196_v0 }
 0x273   : > { %v3237_v30 = vrot.slane %v5804_v54, 1  ;;  %v3143_v7 = vrot.slane %v2973_v20, 7 }
 0x274   : > { %v2975_v46 = vpop.f32.mrf.mxu1  ;;  %v5806_v31 = vpop.f32.mrf.mxu0 }
 0x275   : > { %v3144_v47 = vsel %vm336_vm2, %v3141_v2, %v3143_v7  ;;  %v5807_v33 = vadd.f32 %v5806_v31, %v5805_v62  ;;  %v3238_v59 = vsel %vm3223_vm6, %v3235_v27, %v3237_v30 }
 0x276   : > { %v3199_v28 = vadd.f32 %v3144_v47, %v2975_v46  ;;  %v2977_v41 = vpop.f32.mrf.mxu1  ;;  %v5808_v49 = vpop.f32.mrf.mxu0  ;;  %v8209_v44 = vadd.f32 %v3238_v59, %v3197_v13 }
 0x277   : > { %v3239_v56 = vrot.slane %v5807_v33, 1  ;;  %v3145_v17 = vrot.slane %v2977_v41, 7 }
 0x278   : > { %v2979_v9 = vpop.f32.mrf.mxu1  ;;  %v5809_v1 = vpop.f32.mrf.mxu0 }
 0x279   : > { %v3146_v29 = vsel %vm336_vm2, %v3143_v7, %v3145_v17  ;;  %v5810_v12 = vadd.f32 %v5809_v1, %v5808_v49  ;;  %v3240_v58 = vsel %vm3223_vm6, %v3237_v30, %v3239_v56 }
 0x27a   : > { %v3200_v8 = vadd.f32 %v3146_v29, %v2979_v9  ;;  %v2983_v3 = vpop.f32.mrf.mxu1  ;;  %v5811_v37 = vpop.f32.mrf.mxu0  ;;  %v8213_v32 = vadd.f32 %v3240_v58, %v3198_v4 }
 0x27b   : > { %v3241_v42 = vrot.slane %v5810_v12, 1  ;;  %v3147_v36 = vrot.slane %v2983_v3, 7 }
 0x27c   : > { %v2985_v18 = vpop.f32.mrf.mxu1  ;;  %v5812_v38 = vpop.f32.mrf.mxu0 }
 0x27d   : > { %v3148_v25 = vsel %vm336_vm2, %v3145_v17, %v3147_v36  ;;  %v5813_v61 = vadd.f32 %v5812_v38, %v5811_v37  ;;  %v3242_v52 = vsel %vm3223_vm6, %v3239_v56, %v3241_v42 }
 0x27e   : > { %v3201_v5 = vadd.f32 %v3148_v25, %v2985_v18  ;;  %v2987_v0 = vpop.f32.mrf.mxu1  ;;  %v5814_v26 = vpop.f32.mrf.mxu0  ;;  %v8217_v14 = vadd.f32 %v3242_v52, %v3199_v28 }
 0x27f   : > { %v3243_v60 = vrot.slane %v5813_v61, 1  ;;  %v3149_v19 = vrot.slane %v2987_v0, 7 }
 0x280   : > { %v2989_v34 = vpop.f32.mrf.mxu1  ;;  %v5815_v40 = vpop.f32.mrf.mxu0 }
 0x281   : > { %v3150_v50 = vsel %vm336_vm2, %v3147_v36, %v3149_v19  ;;  %v5816_v48 = vadd.f32 %v5815_v40, %v5814_v26  ;;  %v3244_v22 = vsel %vm3223_vm6, %v3241_v42, %v3243_v60 }
 0x282   : > { %v3202_v13 = vadd.f32 %v3150_v50, %v2989_v34  ;;  %v2993_v45 = vpop.f32.mrf.mxu1  ;;  %v5817_v43 = vpop.f32.mrf.mxu0  ;;  %v8221_v27 = vadd.f32 %v3244_v22, %v3200_v8 }
 0x283   : > { %v3245_v2 = vrot.slane %v5816_v48, 1  ;;  %v3151_v11 = vrot.slane %v2993_v45, 7 }
 0x284   : > { %v2995_v35 = vpop.f32.mrf.mxu1  ;;  %v5818_v39 = vpop.f32.mrf.mxu0 }
 0x285   : > { %v3152_v54 = vsel %vm336_vm2, %v3149_v19, %v3151_v11  ;;  %v5819_v63 = vadd.f32 %v5818_v39, %v5817_v43  ;;  %v3246_v4 = vsel %vm3223_vm6, %v3243_v60, %v3245_v2 }
 0x286   : > { %v3203_v20 = vadd.f32 %v3152_v54, %v2995_v35  ;;  %v2997_v62 = vpop.f32.mrf.mxu1  ;;  %v5820_v30 = vpop.f32.mrf.mxu0  ;;  %v8225_v7 = vadd.f32 %v3246_v4, %v3201_v5 }
 0x287   : > { %v3247_v46 = vrot.slane %v5819_v63, 1  ;;  %v3153_v31 = vrot.slane %v2997_v62, 7 }
 0x288   : > { %v2999_v47 = vpop.f32.mrf.mxu1  ;;  %v5821_v33 = vpop.f32.mrf.mxu0 }
 0x289   : > { %v3154_v59 = vsel %vm336_vm2, %v3151_v11, %v3153_v31  ;;  %v5822_v28 = vadd.f32 %v5821_v33, %v5820_v30  ;;  %v3248_v41 = vsel %vm3223_vm6, %v3245_v2, %v3247_v46 }
 0x28a   : > { %v3204_v49 = vadd.f32 %v3154_v59, %v2999_v47  ;;  %v3003_v56 = vpop.f32.mrf.mxu1  ;;  %v5823_v17 = vpop.f32.mrf.mxu0  ;;  %v8229_v9 = vadd.f32 %v3248_v41, %v3202_v13 }
 0x28b   : > { %v3249_v1 = vrot.slane %v5822_v28, 1  ;;  %v3155_v29 = vrot.slane %v3003_v56, 7 }
 0x28c   : > { %v3005_v12 = vpop.f32.mrf.mxu1  ;;  %v5824_v58 = vpop.f32.mrf.mxu0 }
 0x28d   : > { %v3156_v8 = vsel %vm336_vm2, %v3153_v31, %v3155_v29  ;;  %v5825_v3 = vadd.f32 %v5824_v58, %v5823_v17  ;;  %v3250_v37 = vsel %vm3223_vm6, %v3247_v46, %v3249_v1 }
 0x28e   : > { %v3205_v42 = vadd.f32 %v3156_v8, %v3005_v12  ;;  %v3007_v36 = vpop.f32.mrf.mxu1  ;;  %v5826_v18 = vpop.f32.mrf.mxu0  ;;  %v8233_v38 = vadd.f32 %v3250_v37, %v3203_v20 }
 0x28f   : > { %v3251_v25 = vrot.slane %v5825_v3, 1  ;;  %v3110_v61 = vrot.slane %v3007_v36, 7 }
 0x290   : > { %v3009_v52 = vpop.f32.mrf.mxu1  ;;  %v5827_v5 = vpop.f32.mrf.mxu0 }
 0x291   : > { %v3174_v0 = vsel %vm336_vm2, %v3110_v61, %v3128_v51  ;;  %v3157_v26 = vsel %vm336_vm2, %v3155_v29, %v3110_v61  ;;  %v5828_v60 = vadd.f32 %v5827_v5, %v5826_v18  ;;  %v3252_v19 = vsel %vm3223_vm6, %v3249_v1, %v3251_v25 }
 0x292   : > { %v3191_v34 = vadd.f32 %v3174_v0, %v7910_v16  ;;  %v3206_v40 = vadd.f32 %v3157_v26, %v3009_v52  ;;  %v8241_v50 = vpop.f32.mrf.mxu1  ;;  %v5845_v48 = vpop.f32.mrf.mxu0  ;;  %v8243_v22 = vadd.f32 %v3252_v19, %v3204_v49 }
 0x293   : > { %v3253_v13 = vrot.slane %v5828_v60, 1  ;;  %v3934_v63 = vrot.slane %v8241_v50, 7 }
 0x294   : > { %v8245_v45 = vpop.f32.mrf.mxu1  ;;  %v5846_v43 = vpop.f32.mrf.mxu0  ;;  %v8248_v21 = vadd.f32 %v8014_v53, %v3191_v34 }
 0x295   : > { %v8250_v51 = vadd.f32 %v5846_v43, %v5845_v48  ;;  %v3254_v2 = vsel %vm3223_vm6, %v3251_v25, %v3253_v13  ;;  %v3272_v16 = vsel %vm3223_vm6, %v3253_v13, %v3224_v55 }
 0x296   : > { %v3744_v11 = vpop.f32.mrf.mxu1  ;;  %v5848_v35 = vpop.f32.mrf.mxu0  ;;  %v8256_v39 = vadd.f32 %v3254_v2, %v3205_v42  ;;  %v8258_v54 = vadd.f32 %v3272_v16, %v3206_v40 }
 0x297   : > { %v3935_v4 = vrot.slane %v3744_v11, 7  ;;  %v4029_v31 = vrot.slane %v8250_v51, 1 }
 0x298   : > { %v3746_v20 = vpop.f32.mrf.mxu1  ;;  %v5849_v53 = vpop.f32.mrf.mxu0 }
 0x299   : > { %v3936_v62 = vsel %vm336_vm2, %v3934_v63, %v3935_v4  ;;  %v5850_v30 = vadd.f32 %v5849_v53, %v5848_v35 }
 0x29a   : > { %v3982_v15 = vadd.f32 %v3936_v62, %v8189_v6  ;;  %v3750_v46 = vpop.f32.mrf.mxu1  ;;  %v5851_v55 = vpop.f32.mrf.mxu0 }
 0x29b   : > { %v4030_v47 = vrot.slane %v5850_v30, 1  ;;  %v3937_v33 = vrot.slane %v3750_v46, 7 }
 0x29c   : > { %v3998_v59 = vadd.f32 %v3982_v15, %v3746_v20  ;;  %v3752_v28 = vpop.f32.mrf.mxu1  ;;  %v5852_v41 = vpop.f32.mrf.mxu0 }
 0x29d   : > { %v8269_v49 = vsel %vm3223_vm6, %v4029_v31, %v4030_v47  ;;  %v3938_v56 = vsel %vm336_vm2, %v3935_v4, %v3937_v33  ;;  %v5853_v17 = vadd.f32 %v5852_v41, %v5851_v55 }
 0x29e   : > { %v3983_v1 = vadd.f32 %v3938_v56, %v8193_v57  ;;  %v3754_v6 = vpop.f32.mrf.mxu1  ;;  %v5854_v29 = vpop.f32.mrf.mxu0 }
 0x29f   : > { %v4032_v12 = vrot.slane %v5853_v17, 1  ;;  %v3939_v58 = vrot.slane %v3754_v6, 7 }
 0x2a0   : > { %v3999_v8 = vadd.f32 %v3983_v1, %v3752_v28  ;;  %v3756_v3 = vpop.f32.mrf.mxu1  ;;  %v5855_v37 = vpop.f32.mrf.mxu0 }
 0x2a1   : > { %v3940_v42 = vsel %vm336_vm2, %v3937_v33, %v3939_v58  ;;  %v5856_v36 = vadd.f32 %v5855_v37, %v5854_v29  ;;  %v4033_v18 = vsel %vm3223_vm6, %v4030_v47, %v4032_v12 }
 0x2a2   : > { %v3984_v25 = vadd.f32 %v3940_v42, %v8197_v23  ;;  %v3760_v61 = vpop.f32.mrf.mxu1  ;;  %v5857_v52 = vpop.f32.mrf.mxu0  ;;  %v8276_v5 = vadd.f32 %v4033_v18, %v3998_v59 }
 0x2a3   : > { %v4034_v0 = vrot.slane %v5856_v36, 1  ;;  %v3941_v57 = vrot.slane %v3760_v61, 7 }
 0x2a4   : > { %v4000_v26 = vadd.f32 %v3984_v25, %v3756_v3  ;;  %v3762_v60 = vpop.f32.mrf.mxu1  ;;  %v5858_v19 = vpop.f32.mrf.mxu0 }
 0x2a5   : > { %v3942_v34 = vsel %vm336_vm2, %v3939_v58, %v3941_v57  ;;  %v5859_v40 = vadd.f32 %v5858_v19, %v5857_v52  ;;  %v4035_v48 = vsel %vm3223_vm6, %v4032_v12, %v4034_v0 }
 0x2a6   : > { %v3985_v13 = vadd.f32 %v3942_v34, %v8201_v24  ;;  %v3764_v43 = vpop.f32.mrf.mxu1  ;;  %v5860_v2 = vpop.f32.mrf.mxu0  ;;  %v8281_v16 = vadd.f32 %v4035_v48, %v3999_v8 }
 0x2a7   : > { %v4036_v23 = vrot.slane %v5859_v40, 1  ;;  %v3943_v11 = vrot.slane %v3764_v43, 7 }
 0x2a8   : > { %v4001_v35 = vadd.f32 %v3985_v13, %v3762_v60  ;;  %v3766_v4 = vpop.f32.mrf.mxu1  ;;  %v5861_v20 = vpop.f32.mrf.mxu0 }
 0x2a9   : > { %v3944_v53 = vsel %vm336_vm2, %v3941_v57, %v3943_v11  ;;  %v5862_v62 = vadd.f32 %v5861_v20, %v5860_v2  ;;  %v4037_v30 = vsel %vm3223_vm6, %v4034_v0, %v4036_v23 }
 0x2aa   : > { %v3986_v15 = vadd.f32 %v3944_v53, %v8205_v10  ;;  %v3770_v46 = vpop.f32.mrf.mxu1  ;;  %v5863_v55 = vpop.f32.mrf.mxu0  ;;  %v8286_v47 = vadd.f32 %v4037_v30, %v4000_v26 }
 0x2ab   : > { %v4038_v24 = vrot.slane %v5862_v62, 1  ;;  %v3945_v33 = vrot.slane %v3770_v46, 7 }
 0x2ac   : > { %v4002_v59 = vadd.f32 %v3986_v15, %v3766_v4  ;;  %v3772_v28 = vpop.f32.mrf.mxu1  ;;  %v5864_v41 = vpop.f32.mrf.mxu0 }
 0x2ad   : > { %v3946_v56 = vsel %vm336_vm2, %v3943_v11, %v3945_v33  ;;  %v5865_v17 = vadd.f32 %v5864_v41, %v5863_v55  ;;  %v4039_v1 = vsel %vm3223_vm6, %v4036_v23, %v4038_v24 }
 0x2ae   : > { %v3987_v6 = vadd.f32 %v3946_v56, %v8209_v44  ;;  %v3774_v29 = vpop.f32.mrf.mxu1  ;;  %v5866_v12 = vpop.f32.mrf.mxu0  ;;  %v8291_v58 = vadd.f32 %v4039_v1, %v4001_v35 }
 0x2af   : > { %v4040_v10 = vrot.slane %v5865_v17, 1  ;;  %v3947_v8 = vrot.slane %v3774_v29, 7 }
 0x2b0   : > { %v4003_v3 = vadd.f32 %v3987_v6, %v3772_v28  ;;  %v3776_v37 = vpop.f32.mrf.mxu1  ;;  %v5867_v42 = vpop.f32.mrf.mxu0 }
 0x2b1   : > { %v3948_v36 = vsel %vm336_vm2, %v3945_v33, %v3947_v8  ;;  %v5868_v18 = vadd.f32 %v5867_v42, %v5866_v12  ;;  %v4041_v25 = vsel %vm3223_vm6, %v4038_v24, %v4040_v10 }
 0x2b2   : > { %v3988_v61 = vadd.f32 %v3948_v36, %v8213_v32  ;;  %v3780_v52 = vpop.f32.mrf.mxu1  ;;  %v5869_v0 = vpop.f32.mrf.mxu0  ;;  %v8296_v57 = vadd.f32 %v4041_v25, %v4002_v59 }
 0x2b3   : > { %v4042_v44 = vrot.slane %v5868_v18, 1  ;;  %v3949_v26 = vrot.slane %v3780_v52, 7 }
 0x2b4   : > { %v4004_v60 = vadd.f32 %v3988_v61, %v3776_v37  ;;  %v3782_v19 = vpop.f32.mrf.mxu1  ;;  %v5870_v34 = vpop.f32.mrf.mxu0 }
 0x2b5   : > { %v3950_v40 = vsel %vm336_vm2, %v3947_v8, %v3949_v26  ;;  %v5871_v48 = vadd.f32 %v5870_v34, %v5869_v0  ;;  %v4043_v13 = vsel %vm3223_vm6, %v4040_v10, %v4042_v44 }
 0x2b6   : > { %v3989_v43 = vadd.f32 %v3950_v40, %v8217_v14  ;;  %v3784_v2 = vpop.f32.mrf.mxu1  ;;  %v5872_v23 = vpop.f32.mrf.mxu0  ;;  %v8301_v11 = vadd.f32 %v4043_v13, %v4003_v3 }
 0x2b7   : > { %v4044_v32 = vrot.slane %v5871_v48, 1  ;;  %v3951_v35 = vrot.slane %v3784_v2, 7 }
 0x2b8   : > { %v4005_v4 = vadd.f32 %v3989_v43, %v3782_v19  ;;  %v3786_v20 = vpop.f32.mrf.mxu1  ;;  %v5873_v53 = vpop.f32.mrf.mxu0 }
 0x2b9   : > { %v3952_v62 = vsel %vm336_vm2, %v3949_v26, %v3951_v35  ;;  %v5874_v30 = vadd.f32 %v5873_v53, %v5872_v23  ;;  %v4045_v15 = vsel %vm3223_vm6, %v4042_v44, %v4044_v32 }
 0x2ba   : > { %v3990_v46 = vadd.f32 %v3952_v62, %v8221_v27  ;;  %v3790_v55 = vpop.f32.mrf.mxu1  ;;  %v5875_v24 = vpop.f32.mrf.mxu0  ;;  %v8306_v33 = vadd.f32 %v4045_v15, %v4004_v60 }
 0x2bb   : > { %v4046_v14 = vrot.slane %v5874_v30, 1  ;;  %v3953_v59 = vrot.slane %v3790_v55, 7 }
 0x2bc   : > { %v4006_v28 = vadd.f32 %v3990_v46, %v3786_v20  ;;  %v3792_v41 = vpop.f32.mrf.mxu1  ;;  %v5876_v56 = vpop.f32.mrf.mxu0 }
 0x2bd   : > { %v3954_v17 = vsel %vm336_vm2, %v3951_v35, %v3953_v59  ;;  %v5877_v1 = vadd.f32 %v5876_v56, %v5875_v24  ;;  %v4047_v6 = vsel %vm3223_vm6, %v4044_v32, %v4046_v14 }
 0x2be   : > { %v3991_v29 = vadd.f32 %v3954_v17, %v8225_v7  ;;  %v3794_v12 = vpop.f32.mrf.mxu1  ;;  %v5878_v10 = vpop.f32.mrf.mxu0  ;;  %v8311_v8 = vadd.f32 %v4047_v6, %v4005_v4 }
 0x2bf   : > { %v4048_v27 = vrot.slane %v5877_v1, 1  ;;  %v3955_v3 = vrot.slane %v3794_v12, 7 }
 0x2c0   : > { %v4007_v37 = vadd.f32 %v3991_v29, %v3792_v41  ;;  %v3796_v42 = vpop.f32.mrf.mxu1  ;;  %v5879_v36 = vpop.f32.mrf.mxu0 }
 0x2c1   : > { %v3956_v18 = vsel %vm336_vm2, %v3953_v59, %v3955_v3  ;;  %v5880_v25 = vadd.f32 %v5879_v36, %v5878_v10  ;;  %v4049_v61 = vsel %vm3223_vm6, %v4046_v14, %v4048_v27 }
 0x2c2   : > { %v3992_v52 = vadd.f32 %v3956_v18, %v8229_v9  ;;  %v3800_v0 = vpop.f32.mrf.mxu1  ;;  %v5881_v44 = vpop.f32.mrf.mxu0  ;;  %v8316_v26 = vadd.f32 %v4049_v61, %v4006_v28 }
 0x2c3   : > { %v4050_v7 = vrot.slane %v5880_v25, 1  ;;  %v3957_v60 = vrot.slane %v3800_v0, 7 }
 0x2c4   : > { %v4008_v19 = vadd.f32 %v3992_v52, %v3796_v42  ;;  %v3802_v34 = vpop.f32.mrf.mxu1  ;;  %v5882_v40 = vpop.f32.mrf.mxu0 }
 0x2c5   : > { %v3958_v48 = vsel %vm336_vm2, %v3955_v3, %v3957_v60  ;;  %v5883_v13 = vadd.f32 %v5882_v40, %v5881_v44  ;;  %v4051_v43 = vsel %vm3223_vm6, %v4048_v27, %v4050_v7 }
 0x2c6   : > { %v3993_v2 = vadd.f32 %v3958_v48, %v8233_v38  ;;  %v3804_v23 = vpop.f32.mrf.mxu1  ;;  %v5884_v32 = vpop.f32.mrf.mxu0  ;;  %v8321_v35 = vadd.f32 %v4051_v43, %v4007_v37 }
 0x2c7   : > { %v4052_v9 = vrot.slane %v5883_v13, 1  ;;  %v3959_v4 = vrot.slane %v3804_v23, 7 }
 0x2c8   : > { %v4009_v20 = vadd.f32 %v3993_v2, %v3802_v34  ;;  %v3806_v53 = vpop.f32.mrf.mxu1  ;;  %v5885_v62 = vpop.f32.mrf.mxu0 }
 0x2c9   : > { %v3960_v30 = vsel %vm336_vm2, %v3957_v60, %v3959_v4  ;;  %v5886_v15 = vadd.f32 %v5885_v62, %v5884_v32  ;;  %v4053_v46 = vsel %vm3223_vm6, %v4050_v7, %v4052_v9 }
 0x2ca   : > { %v3994_v55 = vadd.f32 %v3960_v30, %v8243_v22  ;;  %v3810_v24 = vpop.f32.mrf.mxu1  ;;  %v5887_v14 = vpop.f32.mrf.mxu0  ;;  %v8326_v59 = vadd.f32 %v4053_v46, %v4008_v19 }
 0x2cb   : > { %v4054_v38 = vrot.slane %v5886_v15, 1  ;;  %v3961_v28 = vrot.slane %v3810_v24, 7 }
 0x2cc   : > { %v4010_v41 = vadd.f32 %v3994_v55, %v3806_v53  ;;  %v3812_v56 = vpop.f32.mrf.mxu1  ;;  %v5888_v17 = vpop.f32.mrf.mxu0 }
 0x2cd   : > { %v3962_v1 = vsel %vm336_vm2, %v3959_v4, %v3961_v28  ;;  %v5889_v6 = vadd.f32 %v5888_v17, %v5887_v14  ;;  %v4055_v29 = vsel %vm3223_vm6, %v4052_v9, %v4054_v38 }
 0x2ce   : > { %v3995_v12 = vadd.f32 %v3962_v1, %v8256_v39  ;;  %v3814_v10 = vpop.f32.mrf.mxu1  ;;  %v5890_v27 = vpop.f32.mrf.mxu0  ;;  %v8331_v3 = vadd.f32 %v4055_v29, %v4009_v20 }
 0x2cf   : > { %v4056_v22 = vrot.slane %v5889_v6, 1  ;;  %v3917_v37 = vrot.slane %v3814_v10, 7 }
 0x2d0   : > { %v4011_v42 = vadd.f32 %v3995_v12, %v3812_v56  ;;  %v3816_v36 = vpop.f32.mrf.mxu1  ;;  %v5891_v18 = vpop.f32.mrf.mxu0 }
 0x2d1   : > { %v3980_v25 = vsel %vm336_vm2, %v3917_v37, %v3934_v63  ;;  %v3963_v61 = vsel %vm336_vm2, %v3961_v28, %v3917_v37  ;;  %v5892_v52 = vadd.f32 %v5891_v18, %v5890_v27  ;;  %v4057_v0 = vsel %vm3223_vm6, %v4054_v38, %v4056_v22 }
 0x2d2   : > { %v3981_v39 = vadd.f32 %v3980_v25, %v8248_v21  ;;  %v3996_v44 = vadd.f32 %v3963_v61, %v8258_v54  ;;  %v8340_v7 = vpop.f32.mrf.mxu0  ;;  %v8342_v60 = vadd.f32 %v4057_v0, %v4010_v41 }
 0x2d3   : > { %v4058_v19 = vrot.slane %v5892_v52, 1  ;;  %v8344_v34 = vpop.f32.mrf.mxu1 }
 0x2d4   : > { %v3997_v50 = vadd.f32 %v3981_v39, %v8245_v45  ;;  %v4012_v40 = vadd.f32 %v3996_v44, %v3816_v36  ;;  %v8347_v63 = vpop.f32.mrf.mxu0 }
 0x2d5   : > { %v8349_v48 = vpop.f32.mrf.mxu1  ;;  %v4059_v13 = vsel %vm3223_vm6, %v4056_v22, %v4058_v19  ;;  %v4077_v21 = vsel %vm3223_vm6, %v4058_v19, %v4029_v31 }
 0x2d6   : > { %v8355_v54 = vpop.f32.mrf.mxu0  ;;  %v8357_v43 = vadd.f32 %v4059_v13, %v4011_v42  ;;  %v8360_v2 = vadd.f32 %v8269_v49, %v3997_v50  ;;  %v8362_v23 = vadd.f32 %v4077_v21, %v4012_v40 }
 0x2d7   : > { %v8364_v45 = vpop.f32.mrf.mxu1 }
 0x2d8   : > { %v8366_v32 = vpop.f32.mrf.mxu0  ;;  %v4741_v31 = vrot.slane %v8364_v45, 7 }
 0x2d9   : > { %v8368_v9 = vpop.f32.mrf.mxu1 }
 0x2da   : > { %v5915_v4 = vpop.f32.mrf.mxu0 }
 0x2db   : > { %v4556_v20 = vpop.f32.mrf.mxu1 }
 0x2dc   : > { %v4743_v51 = vrot.slane %v4556_v20, 7  ;;  %v5916_v53 = vpop.f32.mrf.mxu0 }
 0x2dd   : > { %v4558_v62 = vpop.f32.mrf.mxu1  ;;  %v8374_v15 = vadd.f32 %v5916_v53, %v5915_v4 }
 0x2de   : > { %v5918_v30 = vpop.f32.mrf.mxu0  ;;  %v4744_v49 = vsel %vm336_vm2, %v4741_v31, %v4743_v51 }
 0x2df   : > { %v4560_v46 = vpop.f32.mrf.mxu1  ;;  %v4789_v28 = vadd.f32 %v4744_v49, %v8281_v16  ;;  %v4838_v17 = vrot.slane %v8374_v15, 1 }
 0x2e0   : > { %v4745_v55 = vrot.slane %v4560_v46, 7  ;;  %v5919_v24 = vpop.f32.mrf.mxu0 }
 0x2e1   : > { %v4562_v14 = vpop.f32.mrf.mxu1  ;;  %v5920_v38 = vadd.f32 %v5919_v24, %v5918_v30  ;;  %v4805_v42 = vadd.f32 %v4789_v28, %v4558_v62 }
 0x2e2   : > { %v4746_v41 = vsel %vm336_vm2, %v4743_v51, %v4745_v55  ;;  %v5921_v56 = vpop.f32.mrf.mxu0 }
 0x2e3   : > { %v4840_v1 = vrot.slane %v5920_v38, 1  ;;  %v4566_v6 = vpop.f32.mrf.mxu1  ;;  %v4790_v29 = vadd.f32 %v4746_v41, %v8286_v47 }
 0x2e4   : > { %v4747_v12 = vrot.slane %v4566_v6, 7  ;;  %v5922_v10 = vpop.f32.mrf.mxu0 }
 0x2e5   : > { %v4841_v27 = vsel %vm3223_vm6, %v4838_v17, %v4840_v1  ;;  %v4568_v22 = vpop.f32.mrf.mxu1  ;;  %v5923_v37 = vadd.f32 %v5922_v10, %v5921_v56  ;;  %v4806_v61 = vadd.f32 %v4790_v29, %v4562_v14 }
 0x2e6   : > { %v5924_v16 = vpop.f32.mrf.mxu0  ;;  %v4748_v36 = vsel %vm336_vm2, %v4745_v55, %v4747_v12  ;;  %v4886_v52 = vadd.f32 %v4841_v27, %v4805_v42 }
 0x2e7   : > { %v4842_v18 = vrot.slane %v5923_v37, 1  ;;  %v4570_v25 = vpop.f32.mrf.mxu1  ;;  %v4791_v50 = vadd.f32 %v4748_v36, %v8291_v58 }
 0x2e8   : > { %v4749_v0 = vrot.slane %v4570_v25, 7  ;;  %v5925_v39 = vpop.f32.mrf.mxu0  ;;  %v4902_v51 = vmax.f32 %v4886_v52, 0.0 }
 0x2e9   : > { %v4843_v47 = vsel %vm3223_vm6, %v4840_v1, %v4842_v18  ;;  %v4572_v44 = vpop.f32.mrf.mxu1  ;;  %v5926_v19 = vadd.f32 %v5925_v39, %v5924_v16  ;;  %v4807_v24 = vadd.f32 %v4791_v50, %v4568_v22 }
 0x2ea   : > { %v4887_v40 = vadd.f32 %v4843_v47, %v4806_v61  ;;  %v4750_v13 = vsel %vm336_vm2, %v4747_v12, %v4749_v0  ;;  %v5927_v21 = vpop.f32.mrf.mxu0 }
 0x2eb   : > { %v4844_v4 = vrot.slane %v5926_v19, 1  ;;  %v4576_v20 = vpop.f32.mrf.mxu1  ;;  %v4792_v62 = vadd.f32 %v4750_v13, %v8296_v57 }
 0x2ec   : > { %v4903_v53 = vmax.f32 %v4887_v40, 0.0  ;;  %v4751_v30 = vrot.slane %v4576_v20, 7  ;;  %v5928_v49 = vpop.f32.mrf.mxu0 }
 0x2ed   : > { %v4845_v58 = vsel %vm3223_vm6, %v4842_v18, %v4844_v4  ;;  %v4578_v46 = vpop.f32.mrf.mxu1  ;;  %v5929_v55 = vadd.f32 %v5928_v49, %v5927_v21  ;;  %v4808_v57 = vadd.f32 %v4792_v62, %v4572_v44 }
 0x2ee   : > { %v5726_v14 = vpack.c.bf16 %v4903_v53, %v4902_v51  ;;  %v5930_v38 = vpop.f32.mrf.mxu0  ;;  %v4752_v28 = vsel %vm336_vm2, %v4749_v0, %v4751_v30  ;;  %v4888_v1 = vadd.f32 %v4845_v58, %v4807_v24 }
 0x2ef   : > { %v4846_v41 = vrot.slane %v5929_v55, 1  ;;  %v4580_v56 = vpop.f32.mrf.mxu1  ;;  %v4793_v37 = vadd.f32 %v4752_v28, %v8301_v11 }
 0x2f0   : > { %5758 = vst [vmem:[%s8392_s24 + $0x8] sm:$0xff] %v5726_v14   ;;  %v4753_v6 = vrot.slane %v4580_v56, 7  ;;  %v5931_v29 = vpop.f32.mrf.mxu0  ;;  %v4904_v25 = vmax.f32 %v4888_v1, 0.0 }
 0x2f1   : > { %v4847_v12 = vsel %vm3223_vm6, %v4844_v4, %v4846_v41  ;;  %v4582_v10 = vpop.f32.mrf.mxu1  ;;  %v5932_v27 = vadd.f32 %v5931_v29, %v5930_v38  ;;  %v4809_v50 = vadd.f32 %v4793_v37, %v4578_v46 }
 0x2f2   : > { %v4889_v42 = vadd.f32 %v4847_v12, %v4808_v57  ;;  %v4754_v22 = vsel %vm336_vm2, %v4751_v30, %v4753_v6  ;;  %v5933_v16 = vpop.f32.mrf.mxu0 }
 0x2f3   : > { %v4848_v36 = vrot.slane %v5932_v27, 1  ;;  %v4586_v18 = vpop.f32.mrf.mxu1  ;;  %v4794_v52 = vadd.f32 %v4754_v22, %v8306_v33 }
 0x2f4   : > { %v4905_v61 = vmax.f32 %v4889_v42, 0.0  ;;  %v4755_v0 = vrot.slane %v4586_v18, 7  ;;  %v5934_v39 = vpop.f32.mrf.mxu0 }
 0x2f5   : > { %v4849_v47 = vsel %vm3223_vm6, %v4846_v41, %v4848_v36  ;;  %v4588_v44 = vpop.f32.mrf.mxu1  ;;  %v5935_v19 = vadd.f32 %v5934_v39, %v5933_v16  ;;  %v4810_v20 = vadd.f32 %v4794_v52, %v4582_v10 }
 0x2f6   : > { %v5731_v40 = vpack.c.bf16 %v4905_v61, %v4904_v25  ;;  %v5936_v11 = vpop.f32.mrf.mxu0  ;;  %v4756_v13 = vsel %vm336_vm2, %v4753_v6, %v4755_v0  ;;  %v4890_v51 = vadd.f32 %v4849_v47, %v4809_v50 }
 0x2f7   : > { %v4850_v21 = vrot.slane %v5935_v19, 1  ;;  %v4590_v4 = vpop.f32.mrf.mxu1  ;;  %v4795_v58 = vadd.f32 %v4756_v13, %v8311_v8 }
 0x2f8   : > { %5759 = vst [vmem:[%s8392_s24 + $0x10] sm:$0xff] %v5731_v40   ;;  %v4757_v53 = vrot.slane %v4590_v4, 7  ;;  %v5937_v62 = vpop.f32.mrf.mxu0  ;;  %v4906_v28 = vmax.f32 %v4890_v51, 0.0 }
 0x2f9   : > { %v4851_v33 = vsel %vm3223_vm6, %v4848_v36, %v4850_v21  ;;  %v4592_v30 = vpop.f32.mrf.mxu1  ;;  %v5938_v49 = vadd.f32 %v5937_v62, %v5936_v11  ;;  %v4811_v12 = vadd.f32 %v4795_v58, %v4588_v44  ;;  %v4740_v44 = vrot.slane %v8344_v34, 7 }
 0x2fa   : > { %v4891_v55 = vadd.f32 %v4851_v33, %v4810_v20  ;;  %v4758_v46 = vsel %vm336_vm2, %v4755_v0, %v4757_v53  ;;  %v5939_v24 = vpop.f32.mrf.mxu0  ;;  %v5914_v11 = vadd.f32 %v8366_v32, %v8355_v54  ;;  %v8429_v34 = vadd.f32 %v8347_v63, %v8340_v7 }
 0x2fb   : > { %v4852_v14 = vrot.slane %v5938_v49, 1  ;;  %v4596_v38 = vpop.f32.mrf.mxu1  ;;  %v4796_v56 = vadd.f32 %v4758_v46, %v8316_v26  ;;  %v4742_v40 = vsel %vm336_vm2, %v4740_v44, %v4741_v31 }
 0x2fc   : > { %v4907_v41 = vmax.f32 %v4891_v55, 0.0  ;;  %v5940_v57 = vpop.f32.mrf.mxu0  ;;  %v4759_v13 = vrot.slane %v4596_v38, 7  ;;  %v4788_v51 = vadd.f32 %v4742_v40, %v8276_v5  ;;  %v4836_v33 = vrot.slane %v5914_v11, 1 }
 0x2fd   : > { %v4853_v1 = vsel %vm3223_vm6, %v4850_v21, %v4852_v14  ;;  %v4598_v6 = vpop.f32.mrf.mxu1  ;;  %v5941_v29 = vadd.f32 %v5940_v57, %v5939_v24  ;;  %v4812_v37 = vadd.f32 %v4796_v56, %v4592_v30 }
 0x2fe   : > { %v5736_v10 = vpack.c.bf16 %v4907_v41, %v4906_v28  ;;  %v4892_v42 = vadd.f32 %v4853_v1, %v4811_v12  ;;  %v5942_v0 = vpop.f32.mrf.mxu0  ;;  %v4760_v45 = vsel %vm336_vm2, %v4757_v53, %v4759_v13  ;;  %v4839_v54 = vsel %vm3223_vm6, %v4836_v33, %v4838_v17 }
 0x2ff   : > { %v4854_v8 = vrot.slane %v5941_v29, 1  ;;  %v4600_v27 = vpop.f32.mrf.mxu1  ;;  %v4804_v5 = vadd.f32 %v4788_v51, %v8368_v9  ;;  %v4797_v55 = vadd.f32 %v4760_v45, %v8321_v35  ;;  %v4835_v53 = vrot.slane %v8429_v34, 1 }
 0x300   : > { %5760 = vst [vmem:[%s8392_s24 + $0x18] sm:$0xff] %v5736_v10   ;;  %v4908_v25 = vmax.f32 %v4892_v42, 0.0  ;;  %v5943_v19 = vpop.f32.mrf.mxu0  ;;  %v4761_v4 = vrot.slane %v4600_v27, 7 }
 0x301   : > { %v4855_v22 = vsel %vm3223_vm6, %v4852_v14, %v4854_v8  ;;  %v4602_v16 = vpop.f32.mrf.mxu1  ;;  %v5944_v20 = vadd.f32 %v5943_v19, %v5942_v0  ;;  %v4885_v24 = vadd.f32 %v4839_v54, %v4804_v5  ;;  %v4837_v38 = vsel %vm3223_vm6, %v4835_v53, %v4836_v33 }
 0x302   : > { %v4893_v36 = vadd.f32 %v4855_v22, %v4812_v37  ;;  %v4762_v32 = vsel %vm336_vm2, %v4759_v13, %v4761_v4  ;;  %v4813_v35 = vadd.f32 %v4797_v55, %v4598_v6 }
 0x303   : > { %v4606_v18 = vpop.f32.mrf.mxu1  ;;  %v4856_v49 = vrot.slane %v5944_v20, 1  ;;  %v4798_v15 = vadd.f32 %v4762_v32, %v8326_v59  ;;  %v4901_v29 = vmax.f32 %v4885_v24, 0.0 }
 0x304   : > { %v4909_v26 = vmax.f32 %v4893_v36, 0.0  ;;  %v4763_v46 = vrot.slane %v4606_v18, 7 }
 0x305   : > { %v8411_v61 = vpop.f32.mrf.mxu1  ;;  %v4857_v28 = vsel %vm3223_vm6, %v4854_v8, %v4856_v49  ;;  %v4814_v12 = vadd.f32 %v4798_v15, %v4602_v16 }
 0x306   : > { %v5741_v52 = vpack.c.bf16 %v4909_v26, %v4908_v25  ;;  %v4764_v57 = vsel %vm336_vm2, %v4761_v4, %v4763_v46  ;;  %v4894_v59 = vadd.f32 %v4857_v28, %v4813_v35 }
 0x307   : > { %v8413_v39 = vpop.f32.mrf.mxu1  ;;  %v4799_v22 = vadd.f32 %v4764_v57, %v8331_v3 }
 0x308   : > { %5761 = vst [vmem:[%s8392_s24 + $0x20] sm:$0xff] %v5741_v52   ;;  %v4765_v9 = vrot.slane %v8413_v39, 7  ;;  %v4910_v26 = vmax.f32 %v4894_v59, 0.0 }
 0x309   : > { %v8416_v47 = vpop.f32.mrf.mxu1  ;;  %v4815_v3 = vadd.f32 %v4799_v22, %v8411_v61 }
 0x30a   : > { %v4766_v27 = vsel %vm336_vm2, %v4763_v46, %v4765_v9 }
 0x30b   : > { %v4616_v50 = vpop.f32.mrf.mxu1  ;;  %v4800_v52 = vadd.f32 %v4766_v27, %v8342_v60 }
 0x30c   : > { %v4767_v37 = vrot.slane %v4616_v50, 7 }
 0x30d   : > { %v8424_v21 = vpop.f32.mrf.mxu1  ;;  %v4816_v4 = vadd.f32 %v4800_v52, %v8416_v47 }
 0x30e   : > { %v4768_v39 = vsel %vm336_vm2, %v4765_v9, %v4767_v37 }
 0x30f   : > { %v4620_v62 = vpop.f32.mrf.mxu1  ;;  %v4801_v20 = vadd.f32 %v4768_v39, %v8357_v43 }
 0x310   : > { %v4723_v30 = vrot.slane %v4620_v62, 7 }
 0x311   : > { %v4622_v31 = vpop.f32.mrf.mxu1  ;;  %v4817_v61 = vadd.f32 %v4801_v20, %v8424_v21 }
 0x312   : > { %v4786_v58 = vsel %vm336_vm2, %v4723_v30, %v4740_v44  ;;  %v4769_v44 = vsel %vm336_vm2, %v4767_v37, %v4723_v30 }
 0x313   : > { %v4787_v7 = vadd.f32 %v4786_v58, %v8360_v2  ;;  %v5945_v63 = vpop.f32.mrf.mxu1  ;;  %v4802_v60 = vadd.f32 %v4769_v44, %v8362_v23 }
 0x315   : > { %v4803_v17 = vadd.f32 %v4787_v7, %v8349_v48  ;;  %v5946_v14 = vpop.f32.mrf.mxu1  ;;  %v4818_v54 = vadd.f32 %v4802_v60, %v4622_v31 }
 0x316   : > { %v5947_v41 = vadd.f32 %v5946_v14, %v5945_v63 }
 0x317   : > { %v4884_v56 = vadd.f32 %v4837_v38, %v4803_v17  ;;  %v5948_v2 = vpop.f32.mrf.mxu1 }
 0x318   : > { %v4858_v1 = vrot.slane %v5947_v41, 1 }
 0x319   : > { %v4900_v10 = vmax.f32 %v4884_v56, 0.0  ;;  %v5949_v48 = vpop.f32.mrf.mxu1 }
 0x31a   : > { %v4859_v8 = vsel %vm3223_vm6, %v4856_v49, %v4858_v1  ;;  %v5950_v42 = vadd.f32 %v5949_v48, %v5948_v2 }
 0x31b   : > { %v5721_v6 = vpack.c.bf16 %v4901_v29, %v4900_v10  ;;  %v4895_v36 = vadd.f32 %v4859_v8, %v4814_v12  ;;  %v5951_v18 = vpop.f32.mrf.mxu1 }
 0x31c   : > { %v4860_v25 = vrot.slane %v5950_v42, 1 }
 0x31d   : > { %5722 = vst [vmem:[%s8392_s24] sm:$0xff] %v5721_v6   ;;  %v4911_v16 = vmax.f32 %v4895_v36, 0.0  ;;  %v5952_v0 = vpop.f32.mrf.mxu1 }
 0x31e   : > { %v4861_v19 = vsel %vm3223_vm6, %v4858_v1, %v4860_v25  ;;  %v5953_v50 = vadd.f32 %v5952_v0, %v5951_v18 }
 0x31f   : > { %v5746_v40 = vpack.c.bf16 %v4911_v16, %v4910_v26  ;;  %v5954_v11 = vpop.f32.mrf.mxu1  ;;  %v4896_v51 = vadd.f32 %v4861_v19, %v4815_v3 }
 0x320   : > { %v4862_v13 = vrot.slane %v5953_v50, 1 }
 0x321   : > { %5762 = vst [vmem:[%s8392_s24 + $0x28] sm:$0xff] %v5746_v40   ;;  %v5955_v62 = vpop.f32.mrf.mxu1  ;;  %v4912_v32 = vmax.f32 %v4896_v51, 0.0 }
 0x322   : > { %v4863_v34 = vsel %vm3223_vm6, %v4860_v25, %v4862_v13  ;;  %v5956_v33 = vadd.f32 %v5955_v62, %v5954_v11 }
 0x323   : > { %v4897_v45 = vadd.f32 %v4863_v34, %v4816_v4 }
 0x324   : > { %v4864_v30 = vrot.slane %v5956_v33, 1 }
 0x325   : > { %v4913_v49 = vmax.f32 %v4897_v45, 0.0 }
 0x326   : > { %v4865_v47 = vsel %vm3223_vm6, %v4862_v13, %v4864_v30  ;;  %v4883_v43 = vsel %vm3223_vm6, %v4864_v30, %v4835_v53 }
 0x327   : > { %v5751_v23 = vpack.c.bf16 %v4913_v49, %v4912_v32  ;;  %v4898_v58 = vadd.f32 %v4865_v47, %v4817_v61  ;;  %v4899_v5 = vadd.f32 %v4883_v43, %v4818_v54 }
 0x329   : > { %5763 = vst [vmem:[%s8392_s24 + $0x30] sm:$0xff] %v5751_v23   ;;  %v4914_v55 = vmax.f32 %v4898_v58, 0.0  ;;  %v4915_v7 = vmax.f32 %v4899_v5, 0.0 }
 0x32b   : > { %v5756_v63 = vpack.c.bf16 %v4915_v7, %v4914_v55 }
 0x32d   : > { %5764 = vst [vmem:[%s8392_s24 + $0x38] sm:$0xff] %v5756_v63  }
 0x32e PF: > { %s13_s12 = sadd.s32 1, %s6426_s12  }
 0x32f   : > { %p10_p4 = scmp.ge.s32.totalorder %s13_s12, 4  }
 0x331   :  { %12 = sbr.rel (!%p10_p4) target bundleno = 1 (0x1), region = 72 }

</bundles_post_ra>
